<compile_context>
chip_gen: v7x
topology: tpu7x:2x2x1
jax: 0.10.0
libtpu: 0.0.40
codegen_flags: <defaults>
</compile_context>

<pallas_src>
from functools import partial

import jax
import jax.numpy as jnp
from jax import lax
from jax.experimental import pallas as pl
from jax.experimental.pallas import tpu as pltpu

EPS = 1e-5  # nn.InstanceNorm2d / nn.LayerNorm default


def _inorm(y2, B, S):
    """InstanceNorm2d (affine=False): per-(element, channel) stats over the S spatial rows."""
    C = y2.shape[-1]
    y3 = y2.reshape(B, S, C)
    mu = jnp.mean(y3, axis=1, keepdims=True)
    var = jnp.mean(jnp.square(y3 - mu), axis=1, keepdims=True)
    return ((y3 - mu) * lax.rsqrt(var + EPS)).reshape(B * S, C)


def rn_gcb_d2_kernel(B, S, Ho, Wo, Cin, Cmid, C4, Cout, offs,
                     xp_ref, wp_ref, o_ref, pad_ref):
    BS = B * S
    Wp = wp_ref[...]                                   # (rows, Cpk) packed params

    def rows(name, n):
        o = offs[name]
        return Wp[o:o + n, :]

    w_ex   = rows("w_ex", 9 * Cin)[:, :Cmid]           # (9*Cin, Cmid)
    w_ca1  = rows("w_ca1", Cmid)[:, :Cmid]
    w_ca2  = rows("w_ca2", Cmid)[:, :Cmid]
    w1     = rows("w1", Cmid)[:, :C4]
    w2     = rows("w2", 9 * C4)[:, :C4]                # (9*C4, C4)
    w3     = rows("w3", C4)[:, :Cout]
    w_mask = rows("w_mask", 1)[:, :Cmid]               # (1, Cmid)
    b_mask = rows("b_mask", 1)[:, :1]                  # (1, 1)
    b_ca1  = rows("b_ca1", 1)[:, :Cmid]
    ln_g   = rows("ln_g", 1)[:, :Cmid]
    ln_b   = rows("ln_b", 1)[:, :Cmid]
    b_ca2  = rows("b_ca2", 1)[:, :Cmid]

    # ---- self.ex : 3x3 stride-2 conv == one im2col matmul (patches built in wrapper) ----
    xp = xp_ref[...].reshape(BS, 9 * Cin)
    out0 = jnp.dot(xp, w_ex, preferred_element_type=jnp.float32)        # (BS, Cmid)
    out0_3 = out0.reshape(B, S, Cmid)

    # ---- GCB: global context modelling (softmax over spatial, per batch element) ----
    logits = jnp.sum(out0 * w_mask, axis=-1, keepdims=True) + b_mask    # VPU mul + lane reduce
    lg = logits.reshape(B, S, 1)
    m = jnp.max(lg, axis=1, keepdims=True)
    e = jnp.exp(lg - m)
    attn = e / jnp.sum(e, axis=1, keepdims=True)                        # (B, S, 1)
    ctx = jnp.sum(out0_3 * attn, axis=1)                                # (B, Cmid)

    # ---- GCB: channel-add transform (conv1x1 -> LayerNorm -> ReLU -> conv1x1) ----
    t = jnp.dot(ctx, w_ca1, preferred_element_type=jnp.float32) + b_ca1
    mu = jnp.mean(t, axis=-1, keepdims=True)
    var = jnp.mean(jnp.square(t - mu), axis=-1, keepdims=True)
    t = (t - mu) * lax.rsqrt(var + EPS) * ln_g + ln_b
    t = jnp.maximum(t, 0.0)
    ca = jnp.dot(t, w_ca2, preferred_element_type=jnp.float32) + b_ca2  # (B, Cmid)
    gcb = (out0_3 + ca[:, None, :]).reshape(BS, Cmid)

    # ---- IN -> ReLU -> 1x1 conv ----
    h = jnp.maximum(_inorm(gcb, B, S), 0.0)
    h = jnp.dot(h, w1, preferred_element_type=jnp.float32)              # (BS, C4)
    h = jnp.maximum(_inorm(h, B, S), 0.0)

    # ---- 3x3 conv, dilation=2, pad=2: padded scratch + 9 static slices, ONE K=9*C4 matmul ----
    pad_ref[...] = jnp.zeros_like(pad_ref)                              # tiny buffer, one store
    pad_ref[:, 2:2 + Ho, 2:2 + Wo, :] = h.reshape(B, Ho, Wo, C4)
    P = pad_ref[...]                                                    # (B, Ho+4, Wo+4, C4)
    taps = []
    for dy in (0, 2, 4):
        for dx in (0, 2, 4):
            taps.append(P[:, dy:dy + Ho, dx:dx + Wo, :].reshape(BS, C4))
    hcat = jnp.concatenate(taps, axis=-1)                               # (BS, 9*C4)
    acc = jnp.dot(hcat, w2, preferred_element_type=jnp.float32)         # (BS, C4)

    # ---- IN -> ReLU -> 1x1 conv ----
    h = jnp.maximum(_inorm(acc, B, S), 0.0)
    dc = jnp.dot(h, w3, preferred_element_type=jnp.float32)             # (BS, Cout)

    # ---- residual + ReLU; channels-first per image, flattened onto lanes: ONE lane-dense
    #      (1, B, Cout*S) store per grid step, and the wrapper output is a pure reshape ----
    y = jnp.maximum(dc + out0, 0.0).reshape(B, S, Cout)
    yt = jnp.stack([y[b].T for b in range(B)], axis=0)                  # (B, Cout, S), XLU
    o_ref[...] = yt.reshape(1, B, Cout * S).astype(o_ref.dtype)


def _extract_patches_s2(x_nchw, Ho, Wo):
    """im2col for a 3x3 / stride-2 / pad-1 conv: (N,Cin,H,W) -> (N, Ho*Wo, 9*Cin), tap-major."""
    N, Cin, H, W = x_nchw.shape
    x = jnp.transpose(x_nchw.astype(jnp.float32), (0, 2, 3, 1))
    x = jnp.pad(x, ((0, 0), (1, 1), (1, 1), (0, 0)))
    taps = []
    for ky in range(3):
        for kx in range(3):
            taps.append(x[:, ky:ky + 2 * Ho - 1:2, kx:kx + 2 * Wo - 1:2, :])
    p = jnp.concatenate(taps, axis=-1)                                  # (N, Ho, Wo, 9*Cin)
    return p.reshape(N, Ho * Wo, 9 * Cin)


_PACK_ORDER = ("w_ex", "w_ca1", "w_ca2", "w1", "w2", "w3",
               "w_mask", "b_mask", "b_ca1", "ln_g", "ln_b", "b_ca2")


def _pack_params(p, Cpk):
    """Pack all parameter tensors into one (rows, Cpk) f32 array (one DMA / one VMEM buffer)."""
    pieces, offs, r = [], {}, 0
    for name in _PACK_ORDER:
        a = jnp.asarray(p[name], jnp.float32)
        if a.ndim == 0:
            a = a.reshape(1, 1)
        elif a.ndim == 1:
            a = a[None, :]
        a = jnp.pad(a, ((0, 0), (0, Cpk - a.shape[1])))
        offs[name] = r
        r += a.shape[0]
        pieces.append(a)
    return jnp.concatenate(pieces, axis=0), offs


def rn_gcb_d2(x_nchw, params, *, block_batch=8):
    N, Cin, H, W = x_nchw.shape
    Cmid = params["w_ca1"].shape[0]
    C4 = params["w1"].shape[1]
    Cout = params["w3"].shape[1]
    assert Cout == Cmid, "residual add requires out_channel == middle_channel"
    Ho = (H - 1) // 2 + 1
    Wo = (W - 1) // 2 + 1
    S = Ho * Wo

    patches = _extract_patches_s2(x_nchw, Ho, Wo)                       # (N, S, 9*Cin)
    Cpk = max(Cmid, Cout, C4)
    packed, offs = _pack_params(params, Cpk)

    B = min(block_batch, N)
    G = -(-N // B)                                                      # grid steps
    Npad = G * B
    if Npad != N:
        patches = jnp.pad(patches, ((0, Npad - N), (0, 0), (0, 0)))

    kernel = partial(rn_gcb_d2_kernel, B, S, Ho, Wo, Cin, Cmid, C4, Cout, offs)

    out = pl.pallas_call(
        kernel,
        out_shape=jax.ShapeDtypeStruct((G, B, Cout * S), jnp.float32),
        grid=(G,),
        in_specs=[
            pl.BlockSpec((B, S, 9 * Cin), lambda g: (g, 0, 0)),
            pl.BlockSpec(packed.shape, lambda g: (0, 0)),               # resident across grid
        ],
        out_specs=pl.BlockSpec((1, B, Cout * S), lambda g: (g, 0, 0)),  # lane-dense store
        scratch_shapes=[pltpu.VMEM((B, Ho + 4, Wo + 4, C4), jnp.float32)],
        compiler_params=pltpu.CompilerParams(dimension_semantics=("parallel",)),
    )(patches, packed)

    # channels-first already; pure view, no transpose
    return out.reshape(Npad, Cout, Ho, Wo)[:N]


def reference(x_nchw, p):
    """Pure-JAX mirror of the PyTorch forward (lax convs, NHWC internally)."""
    N, Cin, H, W = x_nchw.shape
    Cmid = p["w_ca1"].shape[0]
    C4 = p["w1"].shape[1]
    Cout = p["w3"].shape[1]
    x = jnp.transpose(x_nchw, (0, 2, 3, 1)).astype(jnp.float32)

    f = lax.conv_general_dilated(
        x, p["w_ex"].reshape(3, 3, Cin, Cmid), (2, 2), ((1, 1), (1, 1)),
        dimension_numbers=("NHWC", "HWIO", "NHWC"))
    Ho, Wo = f.shape[1], f.shape[2]
    S = Ho * Wo
    f = f.reshape(N, S, Cmid)

    logits = f @ p["w_mask"][:, None] + p["b_mask"]
    attn = jax.nn.softmax(logits, axis=1)
    ctx = jnp.sum(f * attn, axis=1, keepdims=True)                      # (N,1,Cmid)
    t = ctx @ p["w_ca1"] + p["b_ca1"]
    mu = jnp.mean(t, axis=-1, keepdims=True)
    var = jnp.mean((t - mu) ** 2, axis=-1, keepdims=True)
    t = (t - mu) / jnp.sqrt(var + EPS) * p["ln_g"] + p["ln_b"]
    ca = jax.nn.relu(t) @ p["w_ca2"] + p["b_ca2"]
    g = f + ca

    def inorm(y):
        mu = jnp.mean(y, axis=1, keepdims=True)
        var = jnp.mean((y - mu) ** 2, axis=1, keepdims=True)
        return (y - mu) / jnp.sqrt(var + EPS)

    h = jax.nn.relu(inorm(g)) @ p["w1"]
    h = jax.nn.relu(inorm(h))
    conv = lax.conv_general_dilated(
        h.reshape(N, Ho, Wo, C4), p["w2"].reshape(3, 3, C4, C4), (1, 1),
        ((2, 2), (2, 2)), rhs_dilation=(2, 2),
        dimension_numbers=("NHWC", "HWIO", "NHWC"))
    h = jax.nn.relu(inorm(conv.reshape(N, S, C4)))
    out = jax.nn.relu(h @ p["w3"] + f)
    return jnp.transpose(out.reshape(N, Ho, Wo, Cout), (0, 3, 1, 2))


if __name__ == "__main__":
    key = jax.random.PRNGKey(0)
    N, Cin, H, W = 8, 4, 16, 16
    Cmid = Cout = 16               # residual add requires out_channel == middle_channel
    C4 = Cmid // 4
    keys = jax.random.split(key, 12)

    def rnd(k, shape, scale=0.2):
        return scale * jax.random.normal(k, shape, jnp.float32)

    params = {
        "w_ex":  rnd(keys[0], (9 * Cin, Cmid)),       # ex: 3x3 s2 conv, (ky,kx,cin)-major rows
        "w_mask": rnd(keys[1], (Cmid,)),              # GCB conv_mask weight
        "b_mask": rnd(keys[2], ()),                   # GCB conv_mask bias
        "w_ca1": rnd(keys[3], (Cmid, Cmid)),          # GCB channel_add conv1 [in, out]
        "b_ca1": rnd(keys[4], (Cmid,)),
        "ln_g":  jnp.ones((Cmid,), jnp.float32),      # GCB LayerNorm affine (fresh init)
        "ln_b":  jnp.zeros((Cmid,), jnp.float32),
        "w_ca2": rnd(keys[5], (Cmid, Cmid)),          # GCB channel_add conv2 [in, out]
        "b_ca2": rnd(keys[6], (Cmid,)),
        "w1":    rnd(keys[7], (Cmid, C4)),            # bottleneck 1x1
        "w2":    rnd(keys[8], (9 * C4, C4)),          # 3x3 dilated conv taps, (ky,kx,cin)-major
        "w3":    rnd(keys[9], (C4, Cout)),            # bottleneck 1x1
    }
    x = jax.random.normal(keys[10], (N, Cin, H, W), jnp.float32)

    fwd = jax.jit(partial(rn_gcb_d2, block_batch=4))  # grid of 2 steps, 4 images per step
    out = jax.block_until_ready(fwd(x, params))
    ref = reference(x, params)

    assert out.shape == ref.shape == (N, Cout, H // 2, W // 2)
    err = float(jnp.max(jnp.abs(out - ref)))
    if not bool(jnp.allclose(out, ref, atol=2e-3, rtol=2e-3)):
        raise AssertionError(f"mismatch: max abs err = {err}")
    print("KERNEL_OK")
</pallas_src>

<mosaic_0001>
module attributes {stable_mosaic.version = 11 : i64} {
  func.func @rn_gcb_d2_kernel(%arg0: i32, %arg1: memref<4x64x36xf32, #tpu.memory_space<vmem>>, %arg2: memref<130x16xf32, #tpu.memory_space<vmem>>, %arg3: memref<1x4x1024xf32, #tpu.memory_space<vmem>>, %arg4: memref<4x12x12x4xf32, #tpu.memory_space<vmem>>) attributes {dimension_semantics = [#tpu.dimension_semantics<parallel>], iteration_bounds = array<i64: 2>, scalar_prefetch = 0 : i64, scratch_operands = 1 : i64, tpu.core_type = #tpu.core_type<tc>, window_params = [{transform_indices = @transform_0, window_bounds = array<i64: 4, 64, 36>}, {pipeline_mode = #tpu.pipeline_mode<synchronous>, transform_indices = @transform_1, window_bounds = array<i64: 130, 16>}, {transform_indices = @transform_2, window_bounds = array<i64: 1, 4, 1024>}]} {
    %c0 = arith.constant 0 : index
    %c0_0 = arith.constant 0 : index
    %0 = vector.load %arg2[%c0, %c0_0] : memref<130x16xf32, #tpu.memory_space<vmem>>, vector<130x16xf32>
    %1 = vector.extract_strided_slice %0 {offsets = [0, 0], sizes = [36, 16], strides = [1, 1]} : vector<130x16xf32> to vector<36x16xf32>
    %2 = vector.extract_strided_slice %0 {offsets = [36, 0], sizes = [16, 16], strides = [1, 1]} : vector<130x16xf32> to vector<16x16xf32>
    %3 = vector.extract_strided_slice %0 {offsets = [52, 0], sizes = [16, 16], strides = [1, 1]} : vector<130x16xf32> to vector<16x16xf32>
    %4 = vector.extract_strided_slice %0 {offsets = [68, 0], sizes = [16, 16], strides = [1, 1]} : vector<130x16xf32> to vector<16x16xf32>
    %5 = vector.extract_strided_slice %4 {offsets = [0, 0], sizes = [16, 4], strides = [1, 1]} : vector<16x16xf32> to vector<16x4xf32>
    %6 = vector.extract_strided_slice %0 {offsets = [84, 0], sizes = [36, 16], strides = [1, 1]} : vector<130x16xf32> to vector<36x16xf32>
    %7 = vector.extract_strided_slice %6 {offsets = [0, 0], sizes = [36, 4], strides = [1, 1]} : vector<36x16xf32> to vector<36x4xf32>
    %8 = vector.extract_strided_slice %0 {offsets = [120, 0], sizes = [4, 16], strides = [1, 1]} : vector<130x16xf32> to vector<4x16xf32>
    %9 = vector.extract_strided_slice %0 {offsets = [124, 0], sizes = [1, 16], strides = [1, 1]} : vector<130x16xf32> to vector<1x16xf32>
    %10 = vector.extract_strided_slice %0 {offsets = [125, 0], sizes = [1, 16], strides = [1, 1]} : vector<130x16xf32> to vector<1x16xf32>
    %11 = vector.extract_strided_slice %10 {offsets = [0, 0], sizes = [1, 1], strides = [1, 1]} : vector<1x16xf32> to vector<1x1xf32>
    %12 = vector.extract_strided_slice %0 {offsets = [126, 0], sizes = [1, 16], strides = [1, 1]} : vector<130x16xf32> to vector<1x16xf32>
    %13 = vector.extract_strided_slice %0 {offsets = [127, 0], sizes = [1, 16], strides = [1, 1]} : vector<130x16xf32> to vector<1x16xf32>
    %14 = vector.extract_strided_slice %0 {offsets = [128, 0], sizes = [1, 16], strides = [1, 1]} : vector<130x16xf32> to vector<1x16xf32>
    %15 = vector.extract_strided_slice %0 {offsets = [129, 0], sizes = [1, 16], strides = [1, 1]} : vector<130x16xf32> to vector<1x16xf32>
    %c0_1 = arith.constant 0 : index
    %c0_2 = arith.constant 0 : index
    %c0_3 = arith.constant 0 : index
    %16 = vector.load %arg1[%c0_1, %c0_2, %c0_3] : memref<4x64x36xf32, #tpu.memory_space<vmem>>, vector<4x64x36xf32>
    %17 = vector.shape_cast %16 : vector<4x64x36xf32> to vector<256x36xf32>
    %cst = arith.constant dense<0.000000e+00> : vector<256x16xf32>
    %18 = tpu.matmul %17, %1, %cst {dimension_numbers = #tpu.dot_dimension_numbers<[1], [0], [0], [1], [0, 0, 1, 1], [], []>} : vector<256x36xf32>, vector<36x16xf32>, vector<256x16xf32> -> vector<256x16xf32>
    %19 = vector.shape_cast %18 : vector<256x16xf32> to vector<4x64x16xf32>
    %20 = vector.broadcast %9 : vector<1x16xf32> to vector<256x16xf32>
    %21 = arith.mulf %18, %20 : vector<256x16xf32>
    %cst_4 = arith.constant dense<0.000000e+00> : vector<256xf32>
    %22 = vector.multi_reduction <add>, %21, %cst_4 [1] : vector<256x16xf32> to vector<256xf32>
    %23 = vector.shape_cast %22 : vector<256xf32> to vector<256x1xf32>
    %24 = vector.broadcast %11 : vector<1x1xf32> to vector<256x1xf32>
    %25 = arith.addf %23, %24 : vector<256x1xf32>
    %26 = vector.shape_cast %25 : vector<256x1xf32> to vector<4x64x1xf32>
    %cst_5 = arith.constant dense<0xFF800000> : vector<4x1xf32>
    %27 = vector.multi_reduction <maximumf>, %26, %cst_5 [1] : vector<4x64x1xf32> to vector<4x1xf32>
    %28 = vector.shape_cast %27 : vector<4x1xf32> to vector<4x1x1xf32>
    %29 = vector.broadcast %28 : vector<4x1x1xf32> to vector<4x64x1xf32>
    %30 = arith.subf %26, %29 : vector<4x64x1xf32>
    %31 = math.exp %30 : vector<4x64x1xf32>
    %cst_6 = arith.constant dense<0.000000e+00> : vector<4x1xf32>
    %32 = vector.multi_reduction <add>, %31, %cst_6 [1] : vector<4x64x1xf32> to vector<4x1xf32>
    %33 = vector.shape_cast %32 : vector<4x1xf32> to vector<4x1x1xf32>
    %34 = vector.broadcast %33 : vector<4x1x1xf32> to vector<4x64x1xf32>
    %35 = arith.divf %31, %34 : vector<4x64x1xf32>
    %36 = vector.broadcast %35 : vector<4x64x1xf32> to vector<4x64x16xf32>
    %37 = arith.mulf %19, %36 : vector<4x64x16xf32>
    %cst_7 = arith.constant dense<0.000000e+00> : vector<4x16xf32>
    %38 = vector.multi_reduction <add>, %37, %cst_7 [1] : vector<4x64x16xf32> to vector<4x16xf32>
    %cst_8 = arith.constant dense<0.000000e+00> : vector<4x16xf32>
    %39 = tpu.matmul %38, %2, %cst_8 {dimension_numbers = #tpu.dot_dimension_numbers<[1], [0], [0], [1], [0, 0, 1, 1], [], []>} : vector<4x16xf32>, vector<16x16xf32>, vector<4x16xf32> -> vector<4x16xf32>
    %40 = vector.broadcast %12 : vector<1x16xf32> to vector<4x16xf32>
    %41 = arith.addf %39, %40 : vector<4x16xf32>
    %cst_9 = arith.constant dense<0.000000e+00> : vector<4xf32>
    %42 = vector.multi_reduction <add>, %41, %cst_9 [1] : vector<4x16xf32> to vector<4xf32>
    %43 = vector.shape_cast %42 : vector<4xf32> to vector<4x1xf32>
    %cst_10 = arith.constant 1.600000e+01 : f32
    %44 = vector.broadcast %cst_10 : f32 to vector<4x1xf32>
    %45 = arith.divf %43, %44 : vector<4x1xf32>
    %46 = vector.broadcast %45 : vector<4x1xf32> to vector<4x16xf32>
    %47 = arith.subf %41, %46 : vector<4x16xf32>
    %48 = arith.mulf %47, %47 : vector<4x16xf32>
    %cst_11 = arith.constant dense<0.000000e+00> : vector<4xf32>
    %49 = vector.multi_reduction <add>, %48, %cst_11 [1] : vector<4x16xf32> to vector<4xf32>
    %50 = vector.shape_cast %49 : vector<4xf32> to vector<4x1xf32>
    %cst_12 = arith.constant 1.600000e+01 : f32
    %51 = vector.broadcast %cst_12 : f32 to vector<4x1xf32>
    %52 = arith.divf %50, %51 : vector<4x1xf32>
    %53 = vector.broadcast %45 : vector<4x1xf32> to vector<4x16xf32>
    %54 = arith.subf %41, %53 : vector<4x16xf32>
    %cst_13 = arith.constant 9.99999974E-6 : f32
    %55 = vector.broadcast %cst_13 : f32 to vector<4x1xf32>
    %56 = arith.addf %52, %55 : vector<4x1xf32>
    %57 = math.rsqrt %56 : vector<4x1xf32>
    %58 = vector.broadcast %57 : vector<4x1xf32> to vector<4x16xf32>
    %59 = arith.mulf %54, %58 : vector<4x16xf32>
    %60 = vector.broadcast %13 : vector<1x16xf32> to vector<4x16xf32>
    %61 = arith.mulf %59, %60 : vector<4x16xf32>
    %62 = vector.broadcast %14 : vector<1x16xf32> to vector<4x16xf32>
    %63 = arith.addf %61, %62 : vector<4x16xf32>
    %cst_14 = arith.constant 0.000000e+00 : f32
    %64 = vector.broadcast %cst_14 : f32 to vector<4x16xf32>
    %65 = arith.maximumf %63, %64 : vector<4x16xf32>
    %cst_15 = arith.constant dense<0.000000e+00> : vector<4x16xf32>
    %66 = tpu.matmul %65, %3, %cst_15 {dimension_numbers = #tpu.dot_dimension_numbers<[1], [0], [0], [1], [0, 0, 1, 1], [], []>} : vector<4x16xf32>, vector<16x16xf32>, vector<4x16xf32> -> vector<4x16xf32>
    %67 = vector.broadcast %15 : vector<1x16xf32> to vector<4x16xf32>
    %68 = arith.addf %66, %67 : vector<4x16xf32>
    %69 = vector.shape_cast %68 : vector<4x16xf32> to vector<4x1x16xf32>
    %70 = vector.broadcast %69 : vector<4x1x16xf32> to vector<4x64x16xf32>
    %71 = arith.addf %19, %70 : vector<4x64x16xf32>
    %72 = vector.shape_cast %71 : vector<4x64x16xf32> to vector<256x16xf32>
    %73 = vector.shape_cast %72 : vector<256x16xf32> to vector<4x64x16xf32>
    %cst_16 = arith.constant dense<0.000000e+00> : vector<4x16xf32>
    %74 = vector.multi_reduction <add>, %73, %cst_16 [1] : vector<4x64x16xf32> to vector<4x16xf32>
    %75 = vector.shape_cast %74 : vector<4x16xf32> to vector<4x1x16xf32>
    %cst_17 = arith.constant 6.400000e+01 : f32
    %76 = vector.broadcast %cst_17 : f32 to vector<4x1x16xf32>
    %77 = arith.divf %75, %76 : vector<4x1x16xf32>
    %78 = vector.broadcast %77 : vector<4x1x16xf32> to vector<4x64x16xf32>
    %79 = arith.subf %73, %78 : vector<4x64x16xf32>
    %80 = arith.mulf %79, %79 : vector<4x64x16xf32>
    %cst_18 = arith.constant dense<0.000000e+00> : vector<4x16xf32>
    %81 = vector.multi_reduction <add>, %80, %cst_18 [1] : vector<4x64x16xf32> to vector<4x16xf32>
    %82 = vector.shape_cast %81 : vector<4x16xf32> to vector<4x1x16xf32>
    %cst_19 = arith.constant 6.400000e+01 : f32
    %83 = vector.broadcast %cst_19 : f32 to vector<4x1x16xf32>
    %84 = arith.divf %82, %83 : vector<4x1x16xf32>
    %85 = vector.broadcast %77 : vector<4x1x16xf32> to vector<4x64x16xf32>
    %86 = arith.subf %73, %85 : vector<4x64x16xf32>
    %cst_20 = arith.constant 9.99999974E-6 : f32
    %87 = vector.broadcast %cst_20 : f32 to vector<4x1x16xf32>
    %88 = arith.addf %84, %87 : vector<4x1x16xf32>
    %89 = math.rsqrt %88 : vector<4x1x16xf32>
    %90 = vector.broadcast %89 : vector<4x1x16xf32> to vector<4x64x16xf32>
    %91 = arith.mulf %86, %90 : vector<4x64x16xf32>
    %92 = vector.shape_cast %91 : vector<4x64x16xf32> to vector<256x16xf32>
    %cst_21 = arith.constant 0.000000e+00 : f32
    %93 = vector.broadcast %cst_21 : f32 to vector<256x16xf32>
    %94 = arith.maximumf %92, %93 : vector<256x16xf32>
    %cst_22 = arith.constant dense<0.000000e+00> : vector<256x4xf32>
    %95 = tpu.matmul %94, %5, %cst_22 {dimension_numbers = #tpu.dot_dimension_numbers<[1], [0], [0], [1], [0, 0, 1, 1], [], []>} : vector<256x16xf32>, vector<16x4xf32>, vector<256x4xf32> -> vector<256x4xf32>
    %96 = vector.shape_cast %95 : vector<256x4xf32> to vector<4x64x4xf32>
    %cst_23 = arith.constant dense<0.000000e+00> : vector<4x4xf32>
    %97 = vector.multi_reduction <add>, %96, %cst_23 [1] : vector<4x64x4xf32> to vector<4x4xf32>
    %98 = vector.shape_cast %97 : vector<4x4xf32> to vector<4x1x4xf32>
    %cst_24 = arith.constant 6.400000e+01 : f32
    %99 = vector.broadcast %cst_24 : f32 to vector<4x1x4xf32>
    %100 = arith.divf %98, %99 : vector<4x1x4xf32>
    %101 = vector.broadcast %100 : vector<4x1x4xf32> to vector<4x64x4xf32>
    %102 = arith.subf %96, %101 : vector<4x64x4xf32>
    %103 = arith.mulf %102, %102 : vector<4x64x4xf32>
    %cst_25 = arith.constant dense<0.000000e+00> : vector<4x4xf32>
    %104 = vector.multi_reduction <add>, %103, %cst_25 [1] : vector<4x64x4xf32> to vector<4x4xf32>
    %105 = vector.shape_cast %104 : vector<4x4xf32> to vector<4x1x4xf32>
    %cst_26 = arith.constant 6.400000e+01 : f32
    %106 = vector.broadcast %cst_26 : f32 to vector<4x1x4xf32>
    %107 = arith.divf %105, %106 : vector<4x1x4xf32>
    %108 = vector.broadcast %100 : vector<4x1x4xf32> to vector<4x64x4xf32>
    %109 = arith.subf %96, %108 : vector<4x64x4xf32>
    %cst_27 = arith.constant 9.99999974E-6 : f32
    %110 = vector.broadcast %cst_27 : f32 to vector<4x1x4xf32>
    %111 = arith.addf %107, %110 : vector<4x1x4xf32>
    %112 = math.rsqrt %111 : vector<4x1x4xf32>
    %113 = vector.broadcast %112 : vector<4x1x4xf32> to vector<4x64x4xf32>
    %114 = arith.mulf %109, %113 : vector<4x64x4xf32>
    %115 = vector.shape_cast %114 : vector<4x64x4xf32> to vector<256x4xf32>
    %cst_28 = arith.constant 0.000000e+00 : f32
    %116 = vector.broadcast %cst_28 : f32 to vector<256x4xf32>
    %117 = arith.maximumf %115, %116 : vector<256x4xf32>
    %cst_29 = arith.constant 0.000000e+00 : f32
    %118 = vector.broadcast %cst_29 : f32 to vector<4x12x12x4xf32>
    %c0_30 = arith.constant 0 : index
    %c0_31 = arith.constant 0 : index
    %c0_32 = arith.constant 0 : index
    %c0_33 = arith.constant 0 : index
    %119 = vector.load %arg4[%c0_30, %c0_31, %c0_32, %c0_33] : memref<4x12x12x4xf32, #tpu.memory_space<vmem>>, vector<4x12x12x4xf32>
    tpu.vector_store %arg4[%c0_30, %c0_31, %c0_32, %c0_33], %118 {strides = array<i32>} : memref<4x12x12x4xf32, #tpu.memory_space<vmem>>, vector<4x12x12x4xf32>,
    %120 = vector.shape_cast %117 : vector<256x4xf32> to vector<4x8x8x4xf32>
    %c0_34 = arith.constant 0 : index
    %c2 = arith.constant 2 : index
    %c2_35 = arith.constant 2 : index
    %c0_36 = arith.constant 0 : index
    %121 = vector.load %arg4[%c0_34, %c2, %c2_35, %c0_36] : memref<4x12x12x4xf32, #tpu.memory_space<vmem>>, vector<4x8x8x4xf32>
    tpu.vector_store %arg4[%c0_34, %c2, %c2_35, %c0_36], %120 {strides = array<i32>} : memref<4x12x12x4xf32, #tpu.memory_space<vmem>>, vector<4x8x8x4xf32>,
    %c0_37 = arith.constant 0 : index
    %c0_38 = arith.constant 0 : index
    %c0_39 = arith.constant 0 : index
    %c0_40 = arith.constant 0 : index
    %122 = vector.load %arg4[%c0_37, %c0_38, %c0_39, %c0_40] : memref<4x12x12x4xf32, #tpu.memory_space<vmem>>, vector<4x12x12x4xf32>
    %123 = vector.extract_strided_slice %122 {offsets = [0, 0, 0, 0], sizes = [4, 8, 8, 4], strides = [1, 1, 1, 1]} : vector<4x12x12x4xf32> to vector<4x8x8x4xf32>
    %124 = vector.shape_cast %123 : vector<4x8x8x4xf32> to vector<256x4xf32>
    %125 = vector.extract_strided_slice %122 {offsets = [0, 0, 2, 0], sizes = [4, 8, 8, 4], strides = [1, 1, 1, 1]} : vector<4x12x12x4xf32> to vector<4x8x8x4xf32>
    %126 = vector.shape_cast %125 : vector<4x8x8x4xf32> to vector<256x4xf32>
    %127 = vector.extract_strided_slice %122 {offsets = [0, 0, 4, 0], sizes = [4, 8, 8, 4], strides = [1, 1, 1, 1]} : vector<4x12x12x4xf32> to vector<4x8x8x4xf32>
    %128 = vector.shape_cast %127 : vector<4x8x8x4xf32> to vector<256x4xf32>
    %129 = vector.extract_strided_slice %122 {offsets = [0, 2, 0, 0], sizes = [4, 8, 8, 4], strides = [1, 1, 1, 1]} : vector<4x12x12x4xf32> to vector<4x8x8x4xf32>
    %130 = vector.shape_cast %129 : vector<4x8x8x4xf32> to vector<256x4xf32>
    %131 = vector.extract_strided_slice %122 {offsets = [0, 2, 2, 0], sizes = [4, 8, 8, 4], strides = [1, 1, 1, 1]} : vector<4x12x12x4xf32> to vector<4x8x8x4xf32>
    %132 = vector.shape_cast %131 : vector<4x8x8x4xf32> to vector<256x4xf32>
    %133 = vector.extract_strided_slice %122 {offsets = [0, 2, 4, 0], sizes = [4, 8, 8, 4], strides = [1, 1, 1, 1]} : vector<4x12x12x4xf32> to vector<4x8x8x4xf32>
    %134 = vector.shape_cast %133 : vector<4x8x8x4xf32> to vector<256x4xf32>
    %135 = vector.extract_strided_slice %122 {offsets = [0, 4, 0, 0], sizes = [4, 8, 8, 4], strides = [1, 1, 1, 1]} : vector<4x12x12x4xf32> to vector<4x8x8x4xf32>
    %136 = vector.shape_cast %135 : vector<4x8x8x4xf32> to vector<256x4xf32>
    %137 = vector.extract_strided_slice %122 {offsets = [0, 4, 2, 0], sizes = [4, 8, 8, 4], strides = [1, 1, 1, 1]} : vector<4x12x12x4xf32> to vector<4x8x8x4xf32>
    %138 = vector.shape_cast %137 : vector<4x8x8x4xf32> to vector<256x4xf32>
    %139 = vector.extract_strided_slice %122 {offsets = [0, 4, 4, 0], sizes = [4, 8, 8, 4], strides = [1, 1, 1, 1]} : vector<4x12x12x4xf32> to vector<4x8x8x4xf32>
    %140 = vector.shape_cast %139 : vector<4x8x8x4xf32> to vector<256x4xf32>
    %141 = tpu.concatenate %124, %126, %128, %130, %132, %134, %136, %138, %140 in 1 : vector<256x4xf32>, vector<256x4xf32>, vector<256x4xf32>, vector<256x4xf32>, vector<256x4xf32>, vector<256x4xf32>, vector<256x4xf32>, vector<256x4xf32>, vector<256x4xf32> -> vector<256x36xf32>
    %cst_41 = arith.constant dense<0.000000e+00> : vector<256x4xf32>
    %142 = tpu.matmul %141, %7, %cst_41 {dimension_numbers = #tpu.dot_dimension_numbers<[1], [0], [0], [1], [0, 0, 1, 1], [], []>} : vector<256x36xf32>, vector<36x4xf32>, vector<256x4xf32> -> vector<256x4xf32>
    %143 = vector.shape_cast %142 : vector<256x4xf32> to vector<4x64x4xf32>
    %cst_42 = arith.constant dense<0.000000e+00> : vector<4x4xf32>
    %144 = vector.multi_reduction <add>, %143, %cst_42 [1] : vector<4x64x4xf32> to vector<4x4xf32>
    %145 = vector.shape_cast %144 : vector<4x4xf32> to vector<4x1x4xf32>
    %cst_43 = arith.constant 6.400000e+01 : f32
    %146 = vector.broadcast %cst_43 : f32 to vector<4x1x4xf32>
    %147 = arith.divf %145, %146 : vector<4x1x4xf32>
    %148 = vector.broadcast %147 : vector<4x1x4xf32> to vector<4x64x4xf32>
    %149 = arith.subf %143, %148 : vector<4x64x4xf32>
    %150 = arith.mulf %149, %149 : vector<4x64x4xf32>
    %cst_44 = arith.constant dense<0.000000e+00> : vector<4x4xf32>
    %151 = vector.multi_reduction <add>, %150, %cst_44 [1] : vector<4x64x4xf32> to vector<4x4xf32>
    %152 = vector.shape_cast %151 : vector<4x4xf32> to vector<4x1x4xf32>
    %cst_45 = arith.constant 6.400000e+01 : f32
    %153 = vector.broadcast %cst_45 : f32 to vector<4x1x4xf32>
    %154 = arith.divf %152, %153 : vector<4x1x4xf32>
    %155 = vector.broadcast %147 : vector<4x1x4xf32> to vector<4x64x4xf32>
    %156 = arith.subf %143, %155 : vector<4x64x4xf32>
    %cst_46 = arith.constant 9.99999974E-6 : f32
    %157 = vector.broadcast %cst_46 : f32 to vector<4x1x4xf32>
    %158 = arith.addf %154, %157 : vector<4x1x4xf32>
    %159 = math.rsqrt %158 : vector<4x1x4xf32>
    %160 = vector.broadcast %159 : vector<4x1x4xf32> to vector<4x64x4xf32>
    %161 = arith.mulf %156, %160 : vector<4x64x4xf32>
    %162 = vector.shape_cast %161 : vector<4x64x4xf32> to vector<256x4xf32>
    %cst_47 = arith.constant 0.000000e+00 : f32
    %163 = vector.broadcast %cst_47 : f32 to vector<256x4xf32>
    %164 = arith.maximumf %162, %163 : vector<256x4xf32>
    %cst_48 = arith.constant dense<0.000000e+00> : vector<256x16xf32>
    %165 = tpu.matmul %164, %8, %cst_48 {dimension_numbers = #tpu.dot_dimension_numbers<[1], [0], [0], [1], [0, 0, 1, 1], [], []>} : vector<256x4xf32>, vector<4x16xf32>, vector<256x16xf32> -> vector<256x16xf32>
    %166 = arith.addf %165, %18 : vector<256x16xf32>
    %cst_49 = arith.constant 0.000000e+00 : f32
    %167 = vector.broadcast %cst_49 : f32 to vector<256x16xf32>
    %168 = arith.maximumf %166, %167 : vector<256x16xf32>
    %169 = vector.shape_cast %168 : vector<256x16xf32> to vector<4x64x16xf32>
    %170 = vector.extract_strided_slice %169 {offsets = [0, 0, 0], sizes = [1, 64, 16], strides = [1, 1, 1]} : vector<4x64x16xf32> to vector<1x64x16xf32>
    %171 = vector.shape_cast %170 : vector<1x64x16xf32> to vector<64x16xf32>
    %172 = tpu.transpose %171, [1, 0] : vector<64x16xf32> -> vector<16x64xf32>
    %173 = vector.extract_strided_slice %169 {offsets = [1, 0, 0], sizes = [1, 64, 16], strides = [1, 1, 1]} : vector<4x64x16xf32> to vector<1x64x16xf32>
    %174 = vector.shape_cast %173 : vector<1x64x16xf32> to vector<64x16xf32>
    %175 = tpu.transpose %174, [1, 0] : vector<64x16xf32> -> vector<16x64xf32>
    %176 = vector.extract_strided_slice %169 {offsets = [2, 0, 0], sizes = [1, 64, 16], strides = [1, 1, 1]} : vector<4x64x16xf32> to vector<1x64x16xf32>
    %177 = vector.shape_cast %176 : vector<1x64x16xf32> to vector<64x16xf32>
    %178 = tpu.transpose %177, [1, 0] : vector<64x16xf32> -> vector<16x64xf32>
    %179 = vector.extract_strided_slice %169 {offsets = [3, 0, 0], sizes = [1, 64, 16], strides = [1, 1, 1]} : vector<4x64x16xf32> to vector<1x64x16xf32>
    %180 = vector.shape_cast %179 : vector<1x64x16xf32> to vector<64x16xf32>
    %181 = tpu.transpose %180, [1, 0] : vector<64x16xf32> -> vector<16x64xf32>
    %182 = vector.shape_cast %172 : vector<16x64xf32> to vector<1x16x64xf32>
    %183 = vector.shape_cast %175 : vector<16x64xf32> to vector<1x16x64xf32>
    %184 = vector.shape_cast %178 : vector<16x64xf32> to vector<1x16x64xf32>
    %185 = vector.shape_cast %181 : vector<16x64xf32> to vector<1x16x64xf32>
    %186 = tpu.concatenate %182, %183, %184, %185 in 0 : vector<1x16x64xf32>, vector<1x16x64xf32>, vector<1x16x64xf32>, vector<1x16x64xf32> -> vector<4x16x64xf32>
    %187 = vector.shape_cast %186 : vector<4x16x64xf32> to vector<1x4x1024xf32>
    %c0_50 = arith.constant 0 : index
    %c0_51 = arith.constant 0 : index
    %c0_52 = arith.constant 0 : index
    %188 = vector.load %arg3[%c0_50, %c0_51, %c0_52] : memref<1x4x1024xf32, #tpu.memory_space<vmem>>, vector<1x4x1024xf32>
    tpu.vector_store %arg3[%c0_50, %c0_51, %c0_52], %187 {strides = array<i32>} : memref<1x4x1024xf32, #tpu.memory_space<vmem>>, vector<1x4x1024xf32>,
    return
  }
  func.func @transform_0(%arg0: i32) -> (i32, i32, i32) {
    %c0_i32 = arith.constant 0 : i32
    %c0_i32_0 = arith.constant 0 : i32
    %c0_i32_1 = arith.constant 0 : i32
    return %arg0, %c0_i32, %c0_i32_0 : i32, i32, i32
  }
  func.func @transform_1(%arg0: i32) -> (i32, i32) {
    %c0_i32 = arith.constant 0 : i32
    %c0_i32_0 = arith.constant 0 : i32
    %c0_i32_1 = arith.constant 0 : i32
    return %c0_i32, %c0_i32_0 : i32, i32
  }
  func.func @transform_2(%arg0: i32) -> (i32, i32, i32) {
    %c0_i32 = arith.constant 0 : i32
    %c0_i32_0 = arith.constant 0 : i32
    %c0_i32_1 = arith.constant 0 : i32
    return %arg0, %c0_i32, %c0_i32_0 : i32, i32, i32
  }
}

</mosaic_0001>

<bundles_post_ra>
// kernel: rn_gcb_d2.1
= control target key start
LH: loop header
LB: loop body
LE: loop exit
PB: predicated region body
PF: predicated region fallthrough
CT: control target
= control target key end

     0   :  { %s6265_s9 = smov 0   ;;  %s9483_s0 = inlined_call_operand.vmem [shape: f32[8,64,36], index: 0, kind: input, shape index: {}]   ;;  %s9484_s1 = inlined_call_operand.vmem [shape: f32[130,16], index: 1, kind: input, shape index: {}]   ;;  %s9485_s2 = inlined_call_operand.vmem [shape: f32[2,4,1024], index: 2, kind: output, shape index: {}]  }
   0x1 LB: > { %s6271_s10 = sadd.s32 4294967295, %s6232_s9   ;;  %p5540_p0 = scmp.ge.s32.totalorder %s6232_s9, 1  ;;  %s6232_s9 = sphi %s6265_s9, %s12_s9  }
   0x2   : > { %p114_p1 = scmp.lt.s32.totalorder %s6232_s9, 3 }
   0x4   : > { %p115_p2 = pnand %p5540_p0, %p114_p1 }
   0x6   : > { %118 = sbr.rel (%p115_p2) target bundleno = 3186 (0xc72), region = 28 }
   0xd   : > { %v149_v0 = vld [vmem:[%s9484_s1] sm:$0xff]  ;;  %v150_v1 = vld [vmem:[%s9484_s1 + $0x8] sm:$0xff]  ;;  %v151_v2 = vld [vmem:[%s9484_s1 + $0x10] sm:$0xff]  ;;  %s5541_s17 = sshll.u32 %s6271_s10, 2  ;;  %vm198_vm0 = vcmask 293888   ;;  %vm295_vm1 = vcmask 1043456   ;;  %v524_v39 = vlaneseq }
   0xe   : > { %v6062_v3 = vpack.c.bf16 %v150_v1, %v149_v0  ;;  %v152_v4 = vld [vmem:[%s9484_s1 + $0x18] sm:$0xff]  ;;  %p138_p3 = scmp.lt.s32.totalorder %s5541_s17, 7  ;;  %v153_v6 = vld [vmem:[%s9484_s1 + $0x20] sm:$0xff]  ;;  %vm560_vm2 = vcmask 130048   ;;  %vm693_vm3 = vcmask 7168   ;;  %vm6236_vm4 = vmmov 0  }
   0xf   : > { %v6066_v5 = vpack.c.bf16 %v152_v4, %v151_v2  ;;  %v6362_v40 = vshrl.u32 %v524_v39, 7  ;;  %v6368_v42 = vld [vmem:[%s9484_s1 + $0x78] sm:$0xff]  ;;  %vm1278_vm5 = vcmask 1041409   ;;  %vm1280_vm6 = vcmask 1042434   ;;  %s6240_s21 = smov 8   ;;  %s6241_s22 = smov 24  }
  0x10   : > { %6063 = vmatprep.subr.bf16.mxu0 %v6062_v3  ;;  %s9705_s17 = smov (!%p138_p3, %s5541_s17), 7  ;;  %vm1282_vm7 = vcmask 1043459   ;;  %vm1365_vm8 = vcmask 125952   ;;  %vm2195_vm9 = vcmask 31744   ;;  %vm2509_vm10 = vcmask 27648   ;;  %s6242_s23 = smov 28  }
  0x11   : > { %6065 = vmatpush3.bf16.msra.mxu0 %v6062_v3  ;;  %s5681_s20 = sshll.u32 %s9705_s17, 6  ;;  %9567 = vst [vmem:[#allocation3_spill] sm:$0xff] %v6362_v40  ;;  %v526_v41 = vsub.s32 4, %v6362_v40  ;;  %vm2798_vm11 = vcmask 1045504   ;;  %s6243_s24 = smov 32   ;;  %vm3919_vm12 = vcmask 64512  }
  0x12   : > { %6067 = vmatprep.subr.bf16.mxu0 %v6066_v5  ;;  %s6294_s25 = scalar_lea.vmem %s9483_s0, %s5681_s20  ;;  %s6239_s20 = smov 4   ;;  %vm3952_vm13 = vcmask 97280   ;;  %vm4017_vm14 = vcmask 162816   ;;  %vm4050_vm15 = vcmask 195584  }
  0x13   : > { %v166_v7 = vld [vmem:[%s6294_s25] sm:$0xff]  ;;  %v167_v8 = vld [vmem:[%s6294_s25 + $0x8] sm:$0xff]  ;;  %v168_v9 = vld [vmem:[%s6294_s25 + $0x10] sm:$0xff]  ;;  %v6371_v43 = vrot.slane %v6368_v42, %v526_v41  ;;  %s6245_s26 = smov 16   ;;  %s6246_s27 = smov 20  }
  0x14   : > { %5840 = vmatprep.mubr.msk.f32.mxu0 %vm198_vm0, %v166_v7  ;;  %v169_v10 = vld [vmem:[%s6294_s25 + $0x18] sm:$0xff]  ;;  %v170_v11 = vld [vmem:[%s6294_s25 + $0x20] sm:$0xff]  ;;  %v171_v12 = vld [vmem:[%s6294_s25 + $0x28] sm:$0xff]  ;;  %s6249_s8 = smov 64   ;;  %p144_p4 = scmp.lt.s32.totalorder %s6271_s10, 1 }
  0x15   : > { %6069 = vmatpush3.bf16.msra.mxu0 %v6066_v5  ;;  %v172_v13 = vld [vmem:[%s6294_s25 + $0x30] sm:$0xff]  ;;  %v173_v14 = vld [vmem:[%s6294_s25 + $0x38] sm:$0xff]  ;;  %v174_v15 = vld [vmem:[%s6294_s25 + $0x40] sm:$0xff] }
  0x16   : > { %5838 = vmatprep.subr.msk.mxu0 %vm295_vm1, %v153_v6  ;;  %v175_v16 = vld [vmem:[%s6294_s25 + $0x48] sm:$0xff]  ;;  %v176_v17 = vld [vmem:[%s6294_s25 + $0x50] sm:$0xff]  ;;  %v177_v18 = vld [vmem:[%s6294_s25 + $0x58] sm:$0xff]  ;;  %s9707_s10 = smov (!%p144_p4, %s6271_s10), 1 }
  0x17   : > { %v178_v19 = vld [vmem:[%s6294_s25 + $0x60] sm:$0xff]  ;;  %v179_v20 = vld [vmem:[%s6294_s25 + $0x68] sm:$0xff]  ;;  %v180_v21 = vld [vmem:[%s6294_s25 + $0x70] sm:$0xff]  ;;  %s5682_s11 = sshll.u32 %s9707_s10, 5 }
  0x18   : > { %v181_v22 = vld [vmem:[%s6294_s25 + $0x78] sm:$0xff]  ;;  %v182_v23 = vld [vmem:[%s6294_s25 + $0x80] sm:$0xff]  ;;  %v183_v24 = vld [vmem:[%s6294_s25 + $0x88] sm:$0xff]  ;;  %s148_s14 = scalar_lea.vmem %s9485_s2, %s5682_s11 }
  0x19   : > { %5839 = vmatpush3.msk.msra.mxu0 %vm295_vm1, %v153_v6  ;;  %v184_v25 = vld [vmem:[%s6294_s25 + $0x90] sm:$0xff]  ;;  %v185_v26 = vld [vmem:[%s6294_s25 + $0x98] sm:$0xff]  ;;  %v186_v27 = vld [vmem:[%s6294_s25 + $0xa0] sm:$0xff] }
  0x1a   : > { %5841 = vmatmul.mubr.msk.f32.vlgmr.msra.gmra.mrb[0].mxu0 %vm198_vm0, %v167_v8  ;;  %v187_v28 = vld [vmem:[%s6294_s25 + $0xa8] sm:$0xff]  ;;  %v188_v29 = vld [vmem:[%s6294_s25 + $0xb0] sm:$0xff]  ;;  %v189_v30 = vld [vmem:[%s6294_s25 + $0xb8] sm:$0xff] }
  0x1b   : > { %5843 = vmatprep.mubr.msk.f32.mxu0 %vm198_vm0, %v168_v9  ;;  %v190_v31 = vld [vmem:[%s6294_s25 + $0xc0] sm:$0xff]  ;;  %v191_v32 = vld [vmem:[%s6294_s25 + $0xc8] sm:$0xff]  ;;  %v192_v33 = vld [vmem:[%s6294_s25 + $0xd0] sm:$0xff] }
  0x1c   : > { %v193_v34 = vld [vmem:[%s6294_s25 + $0xd8] sm:$0xff]  ;;  %v194_v35 = vld [vmem:[%s6294_s25 + $0xe0] sm:$0xff]  ;;  %v195_v36 = vld [vmem:[%s6294_s25 + $0xe8] sm:$0xff] }
  0x1d   : > { %v196_v37 = vld [vmem:[%s6294_s25 + $0xf0] sm:$0xff]  ;;  %v197_v38 = vld [vmem:[%s6294_s25 + $0xf8] sm:$0xff]  ;;  %s6244_s25 = smov 12  }
  0x1e   : > { %5844 = vmatmul.mubr.msk.f32.gmra.mrb[2].mxu0 %vm198_vm0, %v169_v10 }
  0x1f   : > { %5846 = vmatprep.mubr.msk.f32.mxu0 %vm198_vm0, %v170_v11 }
  0x22   : > { %5847 = vmatmul.mubr.msk.f32.gmra.mrb[4].mxu0 %vm198_vm0, %v171_v12 }
  0x23   : > { %5849 = vmatprep.mubr.msk.f32.mxu0 %vm198_vm0, %v172_v13 }
  0x26   : > { %5850 = vmatmul.mubr.msk.f32.gmra.mrb[6].mxu0 %vm198_vm0, %v173_v14 }
  0x27   : > { %5852 = vmatprep.mubr.msk.f32.mxu0 %vm198_vm0, %v174_v15 }
  0x2a   : > { %5853 = vmatmul.mubr.msk.f32.gmra.mrb[8].mxu0 %vm198_vm0, %v175_v16 }
  0x2b   : > { %5855 = vmatprep.mubr.msk.f32.mxu0 %vm198_vm0, %v176_v17 }
  0x2e   : > { %5856 = vmatmul.mubr.msk.f32.gmra.mrb[10].mxu0 %vm198_vm0, %v177_v18 }
  0x2f   : > { %5858 = vmatprep.mubr.msk.f32.mxu0 %vm198_vm0, %v178_v19 }
  0x32   : > { %5859 = vmatmul.mubr.msk.f32.gmra.mrb[12].mxu0 %vm198_vm0, %v179_v20 }
  0x33   : > { %5861 = vmatprep.mubr.msk.f32.mxu0 %vm198_vm0, %v180_v21 }
  0x36   : > { %5862 = vmatmul.mubr.msk.f32.gmra.mrb[14].mxu0 %vm198_vm0, %v181_v22 }
  0x37   : > { %5864 = vmatprep.mubr.msk.f32.mxu0 %vm198_vm0, %v182_v23 }
  0x3a   : > { %5865 = vmatmul.mubr.msk.f32.gmra.mrb[16].mxu0 %vm198_vm0, %v183_v24 }
  0x3b   : > { %5867 = vmatprep.mubr.msk.f32.mxu0 %vm198_vm0, %v184_v25 }
  0x3e   : > { %5868 = vmatmul.mubr.msk.f32.gmra.mrb[18].mxu0 %vm198_vm0, %v185_v26 }
  0x3f   : > { %5870 = vmatprep.mubr.msk.f32.mxu0 %vm198_vm0, %v186_v27 }
  0x42   : > { %5871 = vmatmul.mubr.msk.f32.gmra.mrb[20].mxu0 %vm198_vm0, %v187_v28 }
  0x43   : > { %5873 = vmatprep.mubr.msk.f32.mxu0 %vm198_vm0, %v188_v29 }
  0x46   : > { %5874 = vmatmul.mubr.msk.f32.gmra.mrb[22].mxu0 %vm198_vm0, %v189_v30 }
  0x47   : > { %5876 = vmatprep.mubr.msk.f32.mxu0 %vm198_vm0, %v190_v31 }
  0x4a   : > { %5877 = vmatmul.mubr.msk.f32.gmra.mrb[24].mxu0 %vm198_vm0, %v191_v32 }
  0x4b   : > { %5879 = vmatprep.mubr.msk.f32.mxu0 %vm198_vm0, %v192_v33 }
  0x4e   : > { %5880 = vmatmul.mubr.msk.f32.gmra.mrb[26].mxu0 %vm198_vm0, %v193_v34 }
  0x4f   : > { %5882 = vmatprep.mubr.msk.f32.mxu0 %vm198_vm0, %v194_v35 }
  0x52   : > { %5883 = vmatmul.mubr.msk.f32.gmra.mrb[28].mxu0 %vm198_vm0, %v195_v36 }
  0x53   : > { %5885 = vmatprep.mubr.msk.f32.mxu0 %vm198_vm0, %v196_v37 }
  0x56   : > { %5886 = vmatmul.mubr.msk.f32.gmra.mrb[30].mxu0 %vm198_vm0, %v197_v38 }
  0xed   : > { %v6373_v44 = vpop.f32.mrb[0].mxu0 }
  0xee   : > { %9568 = vst [vmem:[#allocation4_spill] sm:$0xff] %v6373_v44  ;;  %v6375_v45 = vpop.f32.mrb[1].mxu0  ;;  %v529_v46 = vmul.f32 %v6373_v44, %v6371_v43 }
  0xef   : > { %9569 = vst [vmem:[#allocation5_spill] sm:$0xff] %v6375_v45  ;;  %v528_v48 = vmul.f32 %v6371_v43, %v6375_v45 }
  0xf0   : > { %v564_v47 = vsel %vm560_vm2, %v529_v46, 0.0 }
  0xf1   : > { %565 = vadd.xlane.f32.xlu0 %v564_v47  ;;  %v6382_v49 = vpop.f32.mrb[2].mxu0  ;;  %v561_v52 = vsel %vm560_vm2, %v528_v48, 0.0 }
  0xf2   : > { %9570 = vst [vmem:[#allocation6_spill] sm:$0xff] %v6382_v49  ;;  %v6384_v50 = vpop.f32.mrb[3].mxu0  ;;  %v531_v51 = vmul.f32 %v6382_v49, %v6371_v43 }
  0xf3   : > { %9571 = vst [vmem:[#allocation7_spill] sm:$0xff] %v6384_v50  ;;  %v530_v54 = vmul.f32 %v6371_v43, %v6384_v50 }
  0xf4   : > { %v570_v53 = vsel %vm560_vm2, %v531_v51, 0.0 }
  0xf5   : > { %562 = vadd.xlane.f32.xlu0 %v561_v52  ;;  %571 = vadd.xlane.f32.xlu1 %v570_v53  ;;  %v6392_v55 = vpop.f32.mrb[4].mxu0  ;;  %v567_v58 = vsel %vm560_vm2, %v530_v54, 0.0 }
  0xf6   : > { %9572 = vst [vmem:[#allocation8_spill] sm:$0xff] %v6392_v55  ;;  %v6394_v56 = vpop.f32.mrb[5].mxu0  ;;  %v533_v57 = vmul.f32 %v6392_v55, %v6371_v43 }
  0xf7   : > { %9573 = vst [vmem:[#allocation9_spill] sm:$0xff] %v6394_v56  ;;  %v532_v60 = vmul.f32 %v6371_v43, %v6394_v56 }
  0xf8   : > { %v576_v59 = vsel %vm560_vm2, %v533_v57, 0.0 }
  0xf9   : > { %568 = vadd.xlane.f32.xlu0 %v567_v58  ;;  %577 = vadd.xlane.f32.xlu1 %v576_v59  ;;  %v6402_v61 = vpop.f32.mrb[6].mxu0  ;;  %v573_v63 = vsel %vm560_vm2, %v532_v60, 0.0 }
  0xfa   : > { %9574 = vst [vmem:[#allocation10_spill] sm:$0xff] %v6402_v61  ;;  %v6404_v62 = vpop.f32.mrb[7].mxu0  ;;  %v535_v58 = vmul.f32 %v6402_v61, %v6371_v43 }
  0xfb   : > { %9575 = vst [vmem:[#allocation11_spill] sm:$0xff] %v6404_v62  ;;  %v534_v0 = vmul.f32 %v6371_v43, %v6404_v62 }
  0xfd   : > { %574 = vadd.xlane.f32.xlu1 %v573_v63  ;;  %v6409_v1 = vpop.f32.mrb[8].mxu0  ;;  %v579_v3 = vsel %vm560_vm2, %v534_v0, 0.0 }
  0xfe   : > { %9576 = vst [vmem:[#allocation12_spill] sm:$0xff] %v6409_v1  ;;  %v6411_v2 = vpop.f32.mrb[9].mxu0  ;;  %v537_v4 = vmul.f32 %v6409_v1, %v6371_v43 }
  0xff   : > { %9577 = vst [vmem:[#allocation13_spill] sm:$0xff] %v6411_v2  ;;  %v536_v10 = vmul.f32 %v6371_v43, %v6411_v2 }
 0x100   : > { %v588_v8 = vsel %vm560_vm2, %v537_v4, 0.0 }
 0x101   : > { %580 = vadd.xlane.f32.xlu1 %v579_v3  ;;  %v6416_v5 = vpop.f32.mrb[10].mxu0  ;;  %v585_v14 = vsel %vm560_vm2, %v536_v10, 0.0  ;;  %v582_v3 = vsel %vm560_vm2, %v535_v58, 0.0 }
 0x102   : > { %9578 = vst [vmem:[#allocation14_spill] sm:$0xff] %v6416_v5  ;;  %v6418_v6 = vpop.f32.mrb[11].mxu0  ;;  %v539_v7 = vmul.f32 %v6416_v5, %v6371_v43 }
 0x103   : > { %9579 = vst [vmem:[#allocation15_spill] sm:$0xff] %v6418_v6  ;;  %v538_v16 = vmul.f32 %v6371_v43, %v6418_v6 }
 0x104   : > { %v594_v9 = vsel %vm560_vm2, %v539_v7, 0.0 }
 0x105   : > { %589 = vadd.xlane.f32.xlu1 %v588_v8  ;;  %595 = vadd.xlane.f32.xlu0 %v594_v9  ;;  %v6426_v11 = vpop.f32.mrb[12].mxu0  ;;  %v591_v22 = vsel %vm560_vm2, %v538_v16, 0.0 }
 0x106   : > { %9580 = vst [vmem:[#allocation16_spill] sm:$0xff] %v6426_v11  ;;  %v6428_v12 = vpop.f32.mrb[13].mxu0  ;;  %v541_v13 = vmul.f32 %v6426_v11, %v6371_v43 }
 0x107   : > { %9581 = vst [vmem:[#allocation17_spill] sm:$0xff] %v6428_v12  ;;  %v540_v17 = vmul.f32 %v6371_v43, %v6428_v12 }
 0x108   : > { %v600_v15 = vsel %vm560_vm2, %v541_v13, 0.0 }
 0x109   : > { %586 = vadd.xlane.f32.xlu1 %v585_v14  ;;  %601 = vadd.xlane.f32.xlu0 %v600_v15  ;;  %v6438_v18 = vpop.f32.mrb[14].mxu0  ;;  %v597_v23 = vsel %vm560_vm2, %v540_v17, 0.0 }
 0x10a   : > { %9582 = vst [vmem:[#allocation18_spill] sm:$0xff] %v6438_v18  ;;  %v6440_v19 = vpop.f32.mrb[15].mxu0  ;;  %v6444_v20 = vmul.f32 %v6438_v18, %v6371_v43 }
 0x10b   : > { %9583 = vst [vmem:[#allocation19_spill] sm:$0xff] %v6440_v19  ;;  %v542_v21 = vmul.f32 %v6371_v43, %v6440_v19 }
 0x10d   : > { %592 = vadd.xlane.f32.xlu1 %v591_v22  ;;  %598 = vadd.xlane.f32.xlu0 %v597_v23  ;;  %v6450_v24 = vpop.f32.mrb[16].mxu0  ;;  %v603_v26 = vsel %vm560_vm2, %v542_v21, 0.0 }
 0x10e   : > { %9584 = vst [vmem:[#allocation20_spill] sm:$0xff] %v6450_v24  ;;  %v6452_v25 = vpop.f32.mrb[17].mxu0  ;;  %v545_v27 = vmul.f32 %v6450_v24, %v6371_v43 }
 0x10f   : > { %9585 = vst [vmem:[#allocation21_spill] sm:$0xff] %v6452_v25  ;;  %v544_v28 = vmul.f32 %v6371_v43, %v6452_v25 }
 0x110   : > { %v612_v29 = vsel %vm560_vm2, %v545_v27, 0.0 }
 0x111   : > { %604 = vadd.xlane.f32.xlu0 %v603_v26  ;;  %613 = vadd.xlane.f32.xlu1 %v612_v29  ;;  %v6460_v30 = vpop.f32.mrb[18].mxu0  ;;  %v609_v31 = vsel %vm560_vm2, %v544_v28, 0.0  ;;  %v606_v29 = vsel %vm560_vm2, %v6444_v20, 0.0 }
 0x112   : > { %9586 = vst [vmem:[#allocation22_spill] sm:$0xff] %v6460_v30  ;;  %v6463_v32 = vpop.f32.mrb[19].mxu0  ;;  %v547_v33 = vmul.f32 %v6460_v30, %v6371_v43 }
 0x113   : > { %9587 = vst [vmem:[#allocation23_spill] sm:$0xff] %v6463_v32  ;;  %v546_v37 = vmul.f32 %v6371_v43, %v6463_v32 }
 0x114   : > { %v618_v35 = vsel %vm560_vm2, %v547_v33, 0.0 }
 0x115   : > { %610 = vadd.xlane.f32.xlu0 %v609_v31  ;;  %v6467_v34 = vpop.f32.mrb[20].mxu0  ;;  %v615_v46 = vsel %vm560_vm2, %v546_v37, 0.0  ;;  %v6234_v37 = vmov 0  }
 0x116   : > { %9588 = vst [vmem:[#allocation24_spill] sm:$0xff] %v6467_v34  ;;  %v6470_v36 = vpop.f32.mrb[21].mxu0  ;;  %v549_v47 = vmul.f32 %v6467_v34, %v6371_v43  ;;  %6113 = vset.pattern.permute.xlu1 %v6234_v37  ;;  %6112 = vset.pattern.permute.xlu0 %v6234_v37 }
 0x117   : > { %9589 = vst [vmem:[#allocation25_spill] sm:$0xff] %v6470_v36  ;;  %v548_v57 = vmul.f32 %v6371_v43, %v6470_v36 }
 0x118   : > { %v624_v53 = vsel %vm560_vm2, %v549_v47, 0.0 }
 0x119   : > { %619 = vadd.xlane.f32.xlu0 %v618_v35  ;;  %v6474_v38 = vpop.f32.mrb[22].mxu0  ;;  %v621_v0 = vsel %vm560_vm2, %v548_v57, 0.0 }
 0x11a   : > { %9590 = vst [vmem:[#allocation26_spill] sm:$0xff] %v6474_v38  ;;  %v6476_v39 = vpop.f32.mrb[23].mxu0  ;;  %v551_v41 = vmul.f32 %v6474_v38, %v6371_v43 }
 0x11b   : > { %9591 = vst [vmem:[#allocation27_spill] sm:$0xff] %v6476_v39  ;;  %v550_v16 = vmul.f32 %v6371_v43, %v6476_v39 }
 0x11c   : > { %v630_v33 = vsel %vm560_vm2, %v551_v41, 0.0  ;;  %v659_v41 = vsub.s32 5, %v6362_v40 }
 0x11d   : > { %616 = vadd.xlane.f32.xlu0 %v615_v46  ;;  %v6483_v48 = vpop.f32.mrb[24].mxu0  ;;  %v627_v27 = vsel %vm560_vm2, %v550_v16, 0.0 }
 0x11e   : > { %9592 = vst [vmem:[#allocation28_spill] sm:$0xff] %v6483_v48  ;;  %v553_v51 = vmul.f32 %v6483_v48, %v6371_v43  ;;  %v6487_v52 = vpop.f32.mrb[25].mxu0 }
 0x11f   : > { %9593 = vst [vmem:[#allocation29_spill] sm:$0xff] %v6487_v52  ;;  %v552_v4 = vmul.f32 %v6371_v43, %v6487_v52 }
 0x120   : > { %v636_v54 = vsel %vm560_vm2, %v553_v51, 0.0 }
 0x121   : > { %625 = vadd.xlane.f32.xlu0 %v624_v53  ;;  %637 = vadd.xlane.f32.xlu1 %v636_v54  ;;  %v6495_v59 = vpop.f32.mrb[26].mxu0  ;;  %v633_v15 = vsel %vm560_vm2, %v552_v4, 0.0 }
 0x122   : > { %9594 = vst [vmem:[#allocation30_spill] sm:$0xff] %v6495_v59  ;;  %v555_v60 = vmul.f32 %v6495_v59, %v6371_v43  ;;  %v6499_v63 = vpop.f32.mrb[27].mxu0 }
 0x123   : > { %9595 = vst [vmem:[#allocation31_spill] sm:$0xff] %v6499_v63  ;;  %v554_v9 = vmul.f32 %v6371_v43, %v6499_v63 }
 0x124   : > { %v642_v8 = vsel %vm560_vm2, %v555_v60, 0.0 }
 0x125   : > { %622 = vadd.xlane.f32.xlu0 %v621_v0  ;;  %583 = vadd.xlane.f32.xlu1 %v582_v3  ;;  %v6505_v7 = vpop.f32.mrb[28].mxu0  ;;  %v639_v21 = vsel %vm560_vm2, %v554_v9, 0.0  ;;  %v6538_v0 = vrot.slane %v6368_v42, %v659_v41 }
 0x126   : > { %9596 = vst [vmem:[#allocation32_spill] sm:$0xff] %v6505_v7  ;;  %v557_v10 = vmul.f32 %v6505_v7, %v6371_v43  ;;  %v6512_v13 = vpop.f32.mrb[29].mxu0 }
 0x127   : > { %9597 = vst [vmem:[#allocation33_spill] sm:$0xff] %v6512_v13  ;;  %v556_v14 = vmul.f32 %v6371_v43, %v6512_v13 }
 0x128   : > { %v648_v28 = vsel %vm560_vm2, %v557_v10, 0.0 }
 0x129   : > { %634 = vadd.xlane.f32.xlu0 %v633_v15  ;;  %643 = vadd.xlane.f32.xlu1 %v642_v8  ;;  %v6519_v17 = vpop.f32.mrb[30].mxu0  ;;  %v645_v31 = vsel %vm560_vm2, %v556_v14, 0.0 }
 0x12a   : > { %9598 = vst [vmem:[#allocation34_spill] sm:$0xff] %v6519_v17  ;;  %v6522_v22 = vpop.f32.mrb[31].mxu0  ;;  %v559_v23 = vmul.f32 %v6519_v17, %v6371_v43 }
 0x12b   : > { %9599 = vst [vmem:[#allocation35_spill] sm:$0xff] %v6522_v22  ;;  %v558_v26 = vmul.f32 %v6371_v43, %v6522_v22 }
 0x12c   : > { %v654_v43 = vsel %vm560_vm2, %v559_v23, 0.0 }
 0x12d   : > { %628 = vadd.xlane.f32.xlu0 %v627_v27  ;;  %640 = vadd.xlane.f32.xlu1 %v639_v21  ;;  %v651_v35 = vsel %vm560_vm2, %v558_v26, 0.0 }
 0x131   : > { %607 = vadd.xlane.f32.xlu0 %v606_v29  ;;  %649 = vadd.xlane.f32.xlu1 %v648_v28 }
 0x135   : > { %631 = vadd.xlane.f32.xlu0 %v630_v33  ;;  %646 = vadd.xlane.f32.xlu1 %v645_v31 }
 0x139   : > { %652 = vadd.xlane.f32.xlu1 %v651_v35 }
 0x13d   : > { %655 = vadd.xlane.f32.xlu1 %v654_v43 }
 0x17e   : > { %v566_v46 = vpop.xlane.xlu0 %565 }
 0x17f   : > { %v6544_v9 = vadd.f32 %v6538_v0, %v566_v46 }
 0x181   : > { %v695_v42 = vsel %vm693_vm3, %v6544_v9, -inf }
 0x182   : > { %v572_v47 = vpop.xlane.xlu1 %571  ;;  %v563_v20 = vpop.xlane.xlu0 %562 }
 0x183   : > { %v6541_v8 = vadd.f32 %v6538_v0, %v563_v20  ;;  %v6558_v27 = vadd.f32 %v6538_v0, %v572_v47 }
 0x185   : > { %v694_v15 = vsel %vm693_vm3, %v6541_v8, -inf  ;;  %v699_v35 = vsel %vm693_vm3, %v6558_v27, -inf }
 0x186   : > { %v578_v51 = vpop.xlane.xlu1 %577  ;;  %v569_v53 = vpop.xlane.xlu0 %568  ;;  %v696_v23 = vmax.f32 %v694_v15, %v695_v42 }
 0x187   : > { %v6547_v10 = vadd.f32 %v6538_v0, %v569_v53  ;;  %v6577_v41 = vadd.f32 %v6538_v0, %v578_v51 }
 0x189   : > { %v697_v21 = vsel %vm693_vm3, %v6547_v10, -inf }
 0x18a   : > { %v575_v54 = vpop.xlane.xlu1 %574  ;;  %v698_v28 = vmax.f32 %v696_v23, %v697_v21 }
 0x18b   : > { %v6561_v29 = vadd.f32 %v6538_v0, %v575_v54 }
 0x18c   : > { %v700_v37 = vmax.f32 %v698_v28, %v699_v35  ;;  %v703_v35 = vsel %vm693_vm3, %v6577_v41, -inf }
 0x18d   : > { %v701_v46 = vsel %vm693_vm3, %v6561_v29, -inf }
 0x18e   : > { %v581_v58 = vpop.xlane.xlu1 %580 }
 0x18f   : > { %v6582_v42 = vadd.f32 %v6538_v0, %v581_v58 }
 0x191   : > { %v705_v38 = vsel %vm693_vm3, %v6582_v42, -inf }
 0x192   : > { %v596_v57 = vpop.xlane.xlu0 %595  ;;  %v590_v3 = vpop.xlane.xlu1 %589 }
 0x193   : > { %v6571_v20 = vadd.f32 %v6538_v0, %v590_v3  ;;  %v6589_v23 = vadd.f32 %v6538_v0, %v596_v57 }
 0x195   : > { %v716_v21 = vsel %vm693_vm3, %v6571_v20, -inf }
 0x196   : > { %v602_v60 = vpop.xlane.xlu0 %601  ;;  %v587_v16 = vpop.xlane.xlu1 %586 }
 0x197   : > { %v6566_v43 = vadd.f32 %v6538_v0, %v587_v16  ;;  %v702_v16 = vmax.f32 %v700_v37, %v701_v46 }
 0x199   : > { %v715_v15 = vsel %vm693_vm3, %v6566_v43, -inf  ;;  %v704_v46 = vmax.f32 %v702_v16, %v703_v35 }
 0x19a   : > { %v599_v4 = vpop.xlane.xlu0 %598  ;;  %v593_v31 = vpop.xlane.xlu1 %592  ;;  %v717_v28 = vmax.f32 %v715_v15, %v716_v21  ;;  %v720_v15 = vsel %vm693_vm3, %v6589_v23, -inf }
 0x19b   : > { %v6574_v47 = vadd.f32 %v6538_v0, %v593_v31  ;;  %v6607_v18 = vadd.f32 %v6538_v0, %v599_v4  ;;  %v6621_v4 = vadd.f32 %v6538_v0, %v602_v60 }
 0x19d   : > { %v718_v3 = vsel %vm693_vm3, %v6574_v47, -inf  ;;  %v722_v59 = vsel %vm693_vm3, %v6607_v18, -inf }
 0x19e   : > { %v6549_v14 = vpop.xlane.xlu0 %604  ;;  %v614_v53 = vpop.xlane.xlu1 %613  ;;  %v719_v40 = vmax.f32 %v717_v28, %v718_v3  ;;  %v706_v3 = vmax.f32 %v704_v46, %v705_v38 }
 0x19f   : > { %v6594_v37 = vadd.f32 %v6538_v0, %v614_v53 }
 0x1a2   : > { %v611_v26 = vpop.xlane.xlu0 %610 }
 0x1a3   : > { %v6597_v58 = vadd.f32 %v6538_v0, %v611_v26  ;;  %v737_v26 = vsel %vm693_vm3, %v6594_v37, -inf }
 0x1a5   : > { %v736_v53 = vsel %vm693_vm3, %v6597_v58, -inf }
 0x1a6   : > { %v620_v33 = vpop.xlane.xlu0 %619  ;;  %v738_v22 = vmax.f32 %v736_v53, %v737_v26  ;;  %v724_v26 = vsel %vm693_vm3, %v6621_v4, -inf }
 0x1aa   : > { %v617_v54 = vpop.xlane.xlu0 %616 }
 0x1ab   : > { %v6602_v57 = vadd.f32 %v6538_v0, %v617_v54  ;;  %v721_v54 = vmax.f32 %v719_v40, %v720_v15 }
 0x1ad   : > { %v739_v28 = vsel %vm693_vm3, %v6602_v57, -inf  ;;  %v723_v38 = vmax.f32 %v721_v54, %v722_v59 }
 0x1ae   : > { %v626_v31 = vpop.xlane.xlu0 %625  ;;  %v638_v51 = vpop.xlane.xlu1 %637  ;;  %v740_v46 = vmax.f32 %v738_v22, %v739_v28 }
 0x1af   : > { %v6635_v60 = vadd.f32 %v6538_v0, %v638_v51  ;;  %v725_v51 = vmax.f32 %v723_v38, %v724_v26  ;;  %v6653_v28 = vadd.f32 %v6538_v0, %v626_v31 }
 0x1b2   : > { %v623_v21 = vpop.xlane.xlu0 %622  ;;  %v584_v17 = vpop.xlane.xlu1 %583 }
 0x1b3   : > { %v6614_v16 = vadd.f32 %v6538_v0, %v584_v17  ;;  %v6626_v17 = vadd.f32 %v6538_v0, %v620_v33  ;;  %v6629_v40 = vadd.f32 %v6538_v0, %v623_v21  ;;  %v6641_v33 = vadd.f32 %v6538_v0, %v6549_v14 }
 0x1b4   : > { %v758_v14 = vsel %vm693_vm3, %v6635_v60, -inf }
 0x1b5   : > { %v707_v35 = vsel %vm693_vm3, %v6614_v16, -inf  ;;  %v741_v59 = vsel %vm693_vm3, %v6626_v17, -inf  ;;  %v726_v31 = vsel %vm693_vm3, %v6641_v33, -inf }
 0x1b6   : > { %v708_v7 = vmax.f32 %v706_v3, %v707_v35  ;;  %v635_v39 = vpop.xlane.xlu0 %634  ;;  %v644_v13 = vpop.xlane.xlu1 %643  ;;  %v742_v21 = vmax.f32 %v740_v46, %v741_v59  ;;  %v727_v36 = vmax.f32 %v725_v51, %v726_v31 }
 0x1b7   : > { %v6632_v52 = vadd.f32 %v6538_v0, %v635_v39  ;;  %v743_v39 = vsel %vm693_vm3, %v6629_v40, -inf }
 0x1b8   : > { %v709_v15 = vrot.slane %v708_v7, 4  ;;  %v744_v63 = vmax.f32 %v742_v21, %v743_v39 }
 0x1ba   : > { %v710_v53 = vmax.f32 %v708_v7, %v709_v15  ;;  %v629_v3 = vpop.xlane.xlu0 %628  ;;  %v641_v35 = vpop.xlane.xlu1 %640  ;;  %v757_v7 = vsel %vm693_vm3, %v6632_v52, -inf }
 0x1bb   : > { %v6648_v22 = vadd.f32 %v6538_v0, %v641_v35  ;;  %v6658_v15 = vadd.f32 %v6538_v0, %v629_v3  ;;  %v6661_v35 = vadd.f32 %v6538_v0, %v644_v13  ;;  %v759_v59 = vmax.f32 %v757_v7, %v758_v14 }
 0x1bc   : > { %v711_v54 = vrot.slane %v710_v53, 2 }
 0x1bd   : > { %v760_v38 = vsel %vm693_vm3, %v6648_v22, -inf  ;;  %v747_v13 = vsel %vm693_vm3, %v6658_v15, -inf }
 0x1be   : > { %v712_v48 = vmax.f32 %v710_v53, %v711_v54  ;;  %v608_v46 = vpop.xlane.xlu0 %607  ;;  %v650_v26 = vpop.xlane.xlu1 %649  ;;  %v745_v53 = vsel %vm693_vm3, %v6653_v28, -inf  ;;  %v761_v39 = vmax.f32 %v759_v59, %v760_v38  ;;  %v762_v54 = vsel %vm693_vm3, %v6661_v35, -inf }
 0x1bf   : > { %v6668_v34 = vadd.f32 %v6538_v0, %v608_v46  ;;  %v746_v30 = vmax.f32 %v744_v63, %v745_v53  ;;  %v6679_v14 = vadd.f32 %v6538_v0, %v650_v26 }
 0x1c0   : > { %v713_v3 = vrot.slane %v712_v48, 1  ;;  %v763_v19 = vmax.f32 %v761_v39, %v762_v54 }
 0x1c1   : > { %v728_v21 = vsel %vm693_vm3, %v6668_v34, -inf  ;;  %v748_v59 = vmax.f32 %v746_v30, %v747_v13  ;;  %v766_v63 = vsel %vm693_vm3, %v6679_v14, -inf }
 0x1c2   : > { %v729_v7 = vmax.f32 %v727_v36, %v728_v21  ;;  %v632_v51 = vpop.xlane.xlu0 %631  ;;  %v647_v46 = vpop.xlane.xlu1 %646  ;;  %v714_v38 = vmax.f32 %v712_v48, %v713_v3 }
 0x1c3   : > { %v6682_v31 = vadd.f32 %v6538_v0, %v632_v51  ;;  %v6685_v32 = vadd.f32 %v6538_v0, %v647_v46 }
 0x1c4   : > { %v730_v24 = vrot.slane %v729_v7, 4  ;;  %v781_v46 = vsub.f32 %v6558_v27, %v714_v38  ;;  %v778_v30 = vsub.f32 %v6541_v8, %v714_v38  ;;  %v779_v54 = vsub.f32 %v6544_v9, %v714_v38 }
 0x1c5   : > { %v749_v25 = vsel %vm693_vm3, %v6682_v31, -inf  ;;  %v764_v36 = vsel %vm693_vm3, %v6685_v32, -inf }
 0x1c6   : > { %v750_v26 = vmax.f32 %v748_v59, %v749_v25  ;;  %v653_v53 = vpop.xlane.xlu1 %652  ;;  %v731_v21 = vmax.f32 %v729_v7, %v730_v24  ;;  %v765_v51 = vmax.f32 %v763_v19, %v764_v36  ;;  %v780_v25 = vsub.f32 %v6547_v10, %v714_v38 }
 0x1c7   : > { %v6695_v48 = vadd.f32 %v6538_v0, %v653_v53  ;;  %v782_v19 = vsub.f32 %v6561_v29, %v714_v38  ;;  %v783_v7 = vsub.f32 %v6577_v41, %v714_v38  ;;  %v810_v59 = vmul.f32 1.442695, %v778_v30 }
 0x1c8   : > { %v732_v3 = vrot.slane %v731_v21, 2  ;;  %v751_v13 = vrot.slane %v750_v26, 4  ;;  %v767_v39 = vmax.f32 %v765_v51, %v766_v63  ;;  %v812_v36 = vmul.f32 1.442695, %v779_v54 }
 0x1c9   : > { %v768_v11 = vsel %vm693_vm3, %v6695_v48, -inf  ;;  %v816_v63 = vmul.f32 1.442695, %v781_v46  ;;  %v814_v51 = vmul.f32 1.442695, %v780_v25  ;;  %6114 = vpow2.f32 %v810_v59 }
 0x1ca   : > { %v656_v12 = vpop.xlane.xlu1 %655  ;;  %v733_v24 = vmax.f32 %v731_v21, %v732_v3  ;;  %v769_v8 = vmax.f32 %v767_v39, %v768_v11  ;;  %v752_v53 = vmax.f32 %v750_v26, %v751_v13  ;;  %v784_v10 = vsub.f32 %v6582_v42, %v714_v38 }
 0x1cb   : > { %v6704_v27 = vadd.f32 %v6538_v0, %v656_v12  ;;  %v818_v29 = vmul.f32 1.442695, %v782_v19  ;;  %6116 = vpow2.f32 %v812_v36  ;;  %v785_v12 = vsub.f32 %v6614_v16, %v714_v38 }
 0x1cc   : > { %v734_v21 = vrot.slane %v733_v24, 1  ;;  %6118 = vpow2.f32 %v814_v51  ;;  %v820_v11 = vmul.f32 1.442695, %v783_v7  ;;  %v753_v41 = vrot.slane %v752_v53, 2 }
 0x1cd   : > { %v770_v9 = vsel %vm693_vm3, %v6704_v27, -inf  ;;  %6120 = vpow2.f32 %v816_v63  ;;  %v822_v26 = vmul.f32 1.442695, %v784_v10  ;;  %v824_v30 = vmul.f32 1.442695, %v785_v12 }
 0x1ce   : > { %v771_v5 = vmax.f32 %v769_v8, %v770_v9  ;;  %6122 = vpow2.f32 %v818_v29  ;;  %v735_v46 = vmax.f32 %v733_v24, %v734_v21  ;;  %v754_v13 = vmax.f32 %v752_v53, %v753_v41 }
 0x1cf   : > { %6124 = vpow2.f32 %v820_v11 }
 0x1d0   : > { %v772_v0 = vrot.slane %v771_v5, 4  ;;  %6126 = vpow2.f32 %v822_v26  ;;  %v790_v42 = vsub.f32 %v6607_v18, %v735_v46  ;;  %v786_v39 = vsub.f32 %v6566_v43, %v735_v46 }
 0x1d1   : > { %6128 = vpow2.f32 %v824_v30  ;;  %v787_v38 = vsub.f32 %v6571_v20, %v735_v46  ;;  %v789_v19 = vsub.f32 %v6589_v23, %v735_v46  ;;  %v791_v24 = vsub.f32 %v6621_v4, %v735_v46 }
 0x1d2   : > { %v773_v3 = vmax.f32 %v771_v5, %v772_v0  ;;  %v755_v5 = vrot.slane %v754_v13, 1  ;;  %v792_v18 = vsub.f32 %v6641_v33, %v735_v46  ;;  %v788_v20 = vsub.f32 %v6574_v47, %v735_v46 }
 0x1d3   : > { %v6713_v54 = vpop.eup %6114  ;;  %v793_v23 = vsub.f32 %v6668_v34, %v735_v46  ;;  %v834_v63 = vmul.f32 1.442695, %v790_v42  ;;  %v826_v53 = vmul.f32 1.442695, %v786_v39  ;;  %v828_v10 = vmul.f32 1.442695, %v787_v38 }
 0x1d4   : > { %v774_v16 = vrot.slane %v773_v3, 2  ;;  %v874_v7 = vsel %vm693_vm3, %v6713_v54, 0.0  ;;  %v830_v29 = vmul.f32 1.442695, %v788_v20  ;;  %v832_v21 = vmul.f32 1.442695, %v789_v19 }
 0x1d5   : > { %v6716_v25 = vpop.eup %6116  ;;  %v6735_v12 = vmax.f32 %v754_v13, %v755_v5  ;;  %6130 = vpow2.f32 %v826_v53  ;;  %v836_v47 = vmul.f32 1.442695, %v791_v24  ;;  %v838_v26 = vmul.f32 1.442695, %v792_v18 }
 0x1d6   : > { %v6722_v8 = vpop.eup %6118  ;;  %v775_v43 = vmax.f32 %v773_v3, %v774_v16  ;;  %v875_v59 = vsel %vm693_vm3, %v6716_v25, 0.0  ;;  %6132 = vpow2.f32 %v828_v10  ;;  %v840_v46 = vmul.f32 1.442695, %v793_v23 }
 0x1d7   : > { %v6728_v36 = vpop.eup %6120  ;;  %v876_v4 = vadd.f32 %v875_v59, %v874_v7  ;;  %v877_v51 = vsel %vm693_vm3, %v6722_v8, 0.0  ;;  %6134 = vpow2.f32 %v830_v29  ;;  %v797_v16 = vsub.f32 %v6626_v17, %v6735_v12 }
 0x1d8   : > { %v776_v9 = vrot.slane %v775_v43, 1  ;;  %v6733_v33 = vpop.eup %6122  ;;  %v879_v34 = vsel %vm693_vm3, %v6728_v36, 0.0  ;;  %6136 = vpow2.f32 %v834_v63  ;;  %v798_v38 = vsub.f32 %v6629_v40, %v6735_v12 }
 0x1d9   : > { %v878_v0 = vadd.f32 %v877_v51, %v876_v4  ;;  %v6741_v41 = vpop.eup %6124  ;;  %v881_v42 = vsel %vm693_vm3, %v6733_v33, 0.0  ;;  %6138 = vpow2.f32 %v832_v21  ;;  %v794_v59 = vsub.f32 %v6597_v58, %v6735_v12 }
 0x1da   : > { %v6737_v11 = vmax.f32 %v775_v43, %v776_v9  ;;  %v6749_v39 = vpop.eup %6126  ;;  %6140 = vpow2.f32 %v836_v47  ;;  %v795_v20 = vsub.f32 %v6594_v37, %v6735_v12 }
 0x1db   : > { %v880_v30 = vadd.f32 %v879_v34, %v878_v0  ;;  %v6755_v24 = vpop.eup %6128  ;;  %6142 = vpow2.f32 %v838_v26  ;;  %v885_v40 = vsel %vm693_vm3, %v6749_v39, 0.0  ;;  %v842_v10 = vmul.f32 1.442695, %v794_v59 }
 0x1dc   : > { %v806_v3 = vsub.f32 %v6685_v32, %v6737_v11  ;;  %v807_v13 = vsub.f32 %v6679_v14, %v6737_v11  ;;  %v883_v14 = vsel %vm693_vm3, %v6741_v41, 0.0  ;;  %v802_v5 = vsub.f32 %v6632_v52, %v6737_v11 }
 0x1dd   : > { %v882_v19 = vadd.f32 %v881_v42, %v880_v30  ;;  %v805_v7 = vsub.f32 %v6661_v35, %v6737_v11  ;;  %v803_v43 = vsub.f32 %v6635_v60, %v6737_v11  ;;  %6144 = vpow2.f32 %v840_v46 }
 0x1de   : > { %v866_v32 = vmul.f32 1.442695, %v806_v3  ;;  %v868_v17 = vmul.f32 1.442695, %v807_v13  ;;  %v804_v23 = vsub.f32 %v6648_v22, %v6737_v11  ;;  %v858_v35 = vmul.f32 1.442695, %v802_v5 }
 0x1df   : > { %v884_v18 = vadd.f32 %v883_v14, %v882_v19  ;;  %v887_v63 = vsel %vm693_vm3, %v6755_v24, 0.0  ;;  %v860_v4 = vmul.f32 1.442695, %v803_v43  ;;  %v796_v60 = vsub.f32 %v6602_v57, %v6735_v12  ;;  %v6777_v53 = vpop.eup %6130 }
 0x1e0   : > { %6146 = vpow2.f32 %v866_v32  ;;  %v864_v58 = vmul.f32 1.442695, %v805_v7  ;;  %v862_v37 = vmul.f32 1.442695, %v804_v23  ;;  %v6779_v51 = vpop.eup %6132  ;;  %v895_v22 = vsel %vm693_vm3, %v6777_v53, 0.0 }
 0x1e1   : > { %v886_v52 = vadd.f32 %v885_v40, %v884_v18  ;;  %6148 = vpow2.f32 %v868_v17  ;;  %v844_v29 = vmul.f32 1.442695, %v795_v20  ;;  %v6783_v21 = vpop.eup %6134  ;;  %v808_v0 = vsub.f32 %v6695_v48, %v6737_v11 }
 0x1e2   : > { %6150 = vpow2.f32 %v858_v35  ;;  %v896_v47 = vsel %vm693_vm3, %v6779_v51, 0.0  ;;  %v6789_v34 = vpop.eup %6136  ;;  %v799_v26 = vsub.f32 %v6653_v28, %v6735_v12  ;;  %v846_v30 = vmul.f32 1.442695, %v796_v60 }
 0x1e3   : > { %v888_v9 = vadd.f32 %v887_v63, %v886_v52  ;;  %6152 = vpow2.f32 %v860_v4  ;;  %v897_v46 = vadd.f32 %v896_v47, %v895_v22  ;;  %v6793_v3 = vpop.eup %6138  ;;  %v848_v13 = vmul.f32 1.442695, %v797_v16 }
 0x1e4   : > { %6154 = vpow2.f32 %v862_v37  ;;  %v898_v48 = vsel %vm693_vm3, %v6783_v21, 0.0  ;;  %v6797_v19 = vpop.eup %6140  ;;  %v850_v32 = vmul.f32 1.442695, %v798_v38  ;;  %v809_v14 = vsub.f32 %v6704_v27, %v6737_v11 }
 0x1e5   : > { %v889_v57 = vrot.slane %v888_v9, 4  ;;  %6156 = vpow2.f32 %v864_v58  ;;  %v899_v5 = vadd.f32 %v898_v48, %v897_v46  ;;  %v6801_v28 = vpop.eup %6142  ;;  %v870_v7 = vmul.f32 1.442695, %v808_v0 }
 0x1e6   : > { %6158 = vpow2.f32 %v842_v10  ;;  %v900_v16 = vsel %vm693_vm3, %v6793_v3, 0.0  ;;  %v800_v18 = vsub.f32 %v6658_v15, %v6735_v12  ;;  %v852_v38 = vmul.f32 1.442695, %v799_v26 }
 0x1e7   : > { %v890_v42 = vadd.f32 %v889_v57, %v888_v9  ;;  %6160 = vpow2.f32 %v844_v29  ;;  %v901_v40 = vadd.f32 %v900_v16, %v899_v5  ;;  %v6807_v43 = vpop.eup %6144  ;;  %v902_v27 = vsel %vm693_vm3, %v6789_v34, 0.0 }
 0x1e8   : > { %6162 = vpow2.f32 %v846_v30  ;;  %v801_v20 = vsub.f32 %v6682_v31, %v6735_v12  ;;  %v872_v52 = vmul.f32 1.442695, %v809_v14  ;;  %v904_v63 = vsel %vm693_vm3, %v6797_v19, 0.0 }
 0x1e9   : > { %v891_v17 = vrot.slane %v890_v42, 2  ;;  %6164 = vpow2.f32 %v848_v13  ;;  %v903_v23 = vadd.f32 %v902_v27, %v901_v40  ;;  %v854_v60 = vmul.f32 1.442695, %v800_v18 }
 0x1ea   : > { %v6811_v11 = vpop.eup %6146  ;;  %6166 = vpow2.f32 %v850_v32  ;;  %v906_v31 = vsel %vm693_vm3, %v6801_v28, 0.0  ;;  %v856_v10 = vmul.f32 1.442695, %v801_v20  ;;  %v908_v47 = vsel %vm693_vm3, %v6807_v43, 0.0 }
 0x1eb   : > { %v892_v59 = vadd.f32 %v891_v17, %v890_v42  ;;  %v6815_v35 = vpop.eup %6148  ;;  %6168 = vpow2.f32 %v870_v7  ;;  %v905_v58 = vadd.f32 %v904_v63, %v903_v23  ;;  %v944_v27 = vsel %vm693_vm3, %v6811_v11, 0.0 }
 0x1ec   : > { %v6819_v4 = vpop.eup %6150  ;;  %6170 = vpow2.f32 %v852_v38 }
 0x1ed   : > { %v893_v15 = vrot.slane %v892_v59, 1  ;;  %v6821_v9 = vpop.eup %6152  ;;  %v937_v12 = vsel %vm693_vm3, %v6819_v4, 0.0  ;;  %6172 = vpow2.f32 %v872_v52  ;;  %v907_v29 = vadd.f32 %v906_v31, %v905_v58 }
 0x1ee   : > { %v6827_v22 = vpop.eup %6154  ;;  %v938_v0 = vsel %vm693_vm3, %v6821_v9, 0.0 }
 0x1ef   : > { %v894_v37 = vadd.f32 %v893_v15, %v892_v59  ;;  %v6831_v57 = vpop.eup %6156  ;;  %v939_v26 = vadd.f32 %v938_v0, %v937_v12  ;;  %v909_v30 = vadd.f32 %v908_v47, %v907_v29  ;;  %v940_v13 = vsel %vm693_vm3, %v6827_v22, 0.0 }
 0x1f0   : > { %v6835_v46 = vpop.eup %6158  ;;  %v942_v7 = vsel %vm693_vm3, %v6831_v57, 0.0 }
 0x1f1   : > { %6174 = vrcp.f32 %v894_v37  ;;  %v6839_v42 = vpop.eup %6160  ;;  %v941_v48 = vadd.f32 %v940_v13, %v939_v26  ;;  %v916_v32 = vsel %vm693_vm3, %v6835_v46, 0.0  ;;  %v910_v5 = vrot.slane %v909_v30, 4 }
 0x1f2   : > { %6176 = vpow2.f32 %v854_v60  ;;  %v6843_v14 = vpop.eup %6162  ;;  %v917_v17 = vsel %vm693_vm3, %v6839_v42, 0.0  ;;  %v946_v60 = vsel %vm693_vm3, %v6815_v35, 0.0 }
 0x1f3   : > { %6178 = vpow2.f32 %v856_v10  ;;  %v6849_v16 = vpop.eup %6164  ;;  %v943_v18 = vadd.f32 %v942_v7, %v941_v48  ;;  %v918_v40 = vadd.f32 %v917_v17, %v916_v32  ;;  %v911_v59 = vadd.f32 %v910_v5, %v909_v30 }
 0x1f4   : > { %v6851_v38 = vpop.eup %6166  ;;  %v919_v20 = vsel %vm693_vm3, %v6843_v14, 0.0  ;;  %v921_v58 = vsel %vm693_vm3, %v6849_v16, 0.0 }
 0x1f5   : > { %v6857_v52 = vpop.eup %6168  ;;  %v945_v23 = vadd.f32 %v944_v27, %v943_v18  ;;  %v920_v15 = vadd.f32 %v919_v20, %v918_v40  ;;  %v912_v63 = vrot.slane %v911_v59, 2  ;;  %v923_v47 = vsel %vm693_vm3, %v6851_v38, 0.0 }
 0x1f6   : > { %v6863_v37 = vpop.eup %6170  ;;  %v948_v0 = vsel %vm693_vm3, %v6857_v52, 0.0 }
 0x1f7   : > { %v947_v31 = vadd.f32 %v946_v60, %v945_v23  ;;  %v922_v12 = vadd.f32 %v921_v58, %v920_v15  ;;  %v6865_v10 = vpop.eup %6172  ;;  %v913_v29 = vadd.f32 %v912_v63, %v911_v59  ;;  %v925_v18 = vsel %vm693_vm3, %v6863_v37, 0.0 }
 0x1f8   : > { %v950_v7 = vsel %vm693_vm3, %v6865_v10, 0.0 }
 0x1f9   : > { %v949_v30 = vadd.f32 %v948_v0, %v947_v31  ;;  %v924_v13 = vadd.f32 %v923_v47, %v922_v12  ;;  %v914_v17 = vrot.slane %v913_v29, 1 }
 0x1fb   : > { %v6175_v26 = vpop.eup %6174  ;;  %v951_v59 = vadd.f32 %v950_v7, %v949_v30  ;;  %v926_v27 = vadd.f32 %v925_v18, %v924_v13  ;;  %v915_v20 = vadd.f32 %v914_v17, %v913_v29 }
 0x1fc   : > { %v6871_v48 = vpop.eup %6176  ;;  %v959_v32 = vmul.f32 %v6175_v26, %v6713_v54  ;;  %v960_v5 = vmul.f32 %v6175_v26, %v6716_v25  ;;  %v962_v54 = vmul.f32 %v6175_v26, %v6728_v36  ;;  %v961_v25 = vmul.f32 %v6175_v26, %v6722_v8 }
 0x1fd   : > { %v6879_v40 = vpop.eup %6178  ;;  %v927_v23 = vsel %vm693_vm3, %v6871_v48, 0.0  ;;  %v952_v15 = vrot.slane %v951_v59, 4  ;;  %6180 = vrcp.f32 %v915_v20  ;;  %v963_v12 = vmul.f32 %v6175_v26, %v6733_v33 }
 0x1fe   : > { %996 = vperm.xlu0 %6112, %v959_v32   ;;  %1001 = vperm.xlu1 %6113, %v960_v5   ;;  %v928_v63 = vadd.f32 %v927_v23, %v926_v27  ;;  %v929_v60 = vsel %vm693_vm3, %v6879_v40, 0.0  ;;  %v964_v36 = vmul.f32 %v6175_v26, %v6741_v41  ;;  %v965_v17 = vmul.f32 %v6175_v26, %v6749_v39 }
 0x1ff   : > { %v953_v58 = vadd.f32 %v952_v15, %v951_v59  ;;  %v966_v27 = vmul.f32 %v6175_v26, %v6755_v24  ;;  %v9531_v15 = vmov 0.0   ;;  %vm4083_vm3 = vcmask 228352  }
 0x200   : > { %v930_v31 = vadd.f32 %v929_v60, %v928_v63  ;;  %5892 = vmatprep.mubr.msk.f32.mxu1 %vm6236_vm4, %v9531_v15 }
 0x201   : > { %v954_v29 = vrot.slane %v953_v58, 2 }
 0x202   : > { %1011 = vperm.xlu0 %6112, %v962_v54   ;;  %1006 = vperm.xlu1 %6113, %v961_v25   ;;  %v931_v0 = vrot.slane %v930_v31, 4 }
 0x203   : > { %v955_v47 = vadd.f32 %v954_v29, %v953_v58 }
 0x204   : > { %v932_v30 = vadd.f32 %v931_v0, %v930_v31 }
 0x205   : > { %v956_v8 = vrot.slane %v955_v47, 1 }
 0x206   : > { %1016 = vperm.xlu0 %6112, %v963_v12   ;;  %v933_v5 = vrot.slane %v932_v30, 2 }
 0x207   : > { %v957_v13 = vadd.f32 %v956_v8, %v955_v47  ;;  %v6181_v32 = vpop.eup %6180 }
 0x208   : > { %v968_v7 = vmul.f32 %v6181_v32, %v6777_v53  ;;  %v975_v33 = vmul.f32 %v6181_v32, %v6807_v43  ;;  %v934_v18 = vadd.f32 %v933_v5, %v932_v30  ;;  %v969_v59 = vmul.f32 %v6181_v32, %v6779_v51 }
 0x209   : > { %6182 = vrcp.f32 %v957_v13  ;;  %v970_v20 = vmul.f32 %v6181_v32, %v6783_v21  ;;  %v971_v39 = vmul.f32 %v6181_v32, %v6793_v3  ;;  %v972_v43 = vmul.f32 %v6181_v32, %v6789_v34 }
 0x20a   : > { %1021 = vperm.xlu0 %6112, %v964_v36   ;;  %1036 = vperm.xlu1 %6113, %v968_v7   ;;  %v935_v41 = vrot.slane %v934_v18, 1  ;;  %v973_v24 = vmul.f32 %v6181_v32, %v6797_v19  ;;  %v974_v26 = vmul.f32 %v6181_v32, %v6801_v28 }
 0x20c   : > { %v936_v53 = vadd.f32 %v935_v41, %v934_v18 }
 0x20e   : > { %1026 = vperm.xlu0 %6112, %v965_v17   ;;  %1041 = vperm.xlu1 %6113, %v969_v59   ;;  %6184 = vrcp.f32 %v936_v53 }
 0x212   : > { %1031 = vperm.xlu0 %6112, %v966_v27   ;;  %1046 = vperm.xlu1 %6113, %v970_v20  }
 0x213   : > { %v6183_v23 = vpop.eup %6182 }
 0x214   : > { %v987_v54 = vmul.f32 %v6183_v23, %v6821_v9  ;;  %v988_v51 = vmul.f32 %v6183_v23, %v6827_v22  ;;  %v989_v21 = vmul.f32 %v6183_v23, %v6831_v57  ;;  %v990_v3 = vmul.f32 %v6183_v23, %v6811_v11 }
 0x215   : > { %v991_v34 = vmul.f32 %v6183_v23, %v6815_v35  ;;  %v992_v19 = vmul.f32 %v6183_v23, %v6857_v52  ;;  %v993_v28 = vmul.f32 %v6183_v23, %v6865_v10 }
 0x216   : > { %1051 = vperm.xlu1 %6113, %v971_v39   ;;  %1121 = vperm.xlu0 %6112, %v987_v54  }
 0x218   : > { %v6185_v9 = vpop.eup %6184 }
 0x219   : > { %v977_v25 = vmul.f32 %v6185_v9, %v6835_v46  ;;  %v978_v22 = vmul.f32 %v6185_v9, %v6839_v42  ;;  %v979_v57 = vmul.f32 %v6185_v9, %v6843_v14  ;;  %v980_v11 = vmul.f32 %v6185_v9, %v6849_v16  ;;  %v6212_v16 = vld [vmem:[%s9484_s1 + $0x20] sm:$0xff] }
 0x21a   : > { %1056 = vperm.xlu1 %6113, %v972_v43   ;;  %1126 = vperm.xlu0 %6112, %v988_v51   ;;  %v981_v46 = vmul.f32 %v6185_v9, %v6851_v38  ;;  %v982_v35 = vmul.f32 %v6185_v9, %v6863_v37  ;;  %v986_v42 = vmul.f32 %v6183_v23, %v6819_v4  ;;  %v1286_v10 = vrot.slane %v6212_v16, 4  ;;  %v154_v38 = vld [vmem:[%s9484_s1 + $0x28] sm:$0xff]  ;;  %v6924_v4 = vld [vmem:[%s9484_s1 + $0x30] sm:$0xff] }
 0x21b   : > { %v983_v52 = vmul.f32 %v6185_v9, %v6871_v48  ;;  %v984_v14 = vmul.f32 %v6185_v9, %v6879_v40  ;;  %v6235_v37 = vmov 0.0|0.0   ;;  %v1287_v48 = vrot.slane %v154_v38, 4 }
 0x21c   : > { %6070 = vmatprep.subr.bf16.mxu1 %v6235_v37  ;;  %v1289_v40 = vrot.slane %v6924_v4, 4 }
 0x21d   : > { %v1288_v63 = vsel %vm295_vm1, %v1286_v10, %v1287_v48  ;;  %v9600_v10 = vld [vmem:[#allocation14_spill] sm:$0xff] }
 0x21e   : > { %1061 = vperm.xlu1 %6113, %v973_v24   ;;  %1131 = vperm.xlu0 %6112, %v989_v21   ;;  %v1290_v60 = vsel %vm295_vm1, %v1287_v48, %v1289_v40 }
 0x21f   : > { %v6071_v58 = vpack.c.bf16 %v1290_v60, %v1288_v63  ;;  %v9601_v60 = vld [vmem:[#allocation17_spill] sm:$0xff] }
 0x221   : > { %6072 = vmatpush3.bf16.msra.mxu1 %v6071_v58 }
 0x222   : > { %1066 = vperm.xlu1 %6113, %v974_v26   ;;  %1136 = vperm.xlu0 %6112, %v990_v3  }
 0x223   : > { %6073 = vmatprep.subr.bf16.mxu1 %v6235_v37 }
 0x226   : > { %1076 = vperm.xlu1 %6113, %v977_v25   ;;  %1141 = vperm.xlu0 %6112, %v991_v34  }
 0x22a   : > { %1081 = vperm.xlu1 %6113, %v978_v22   ;;  %1146 = vperm.xlu0 %6112, %v992_v19  }
 0x22e   : > { %1086 = vperm.xlu1 %6113, %v979_v57   ;;  %1151 = vperm.xlu0 %6112, %v993_v28  }
 0x232   : > { %1091 = vperm.xlu1 %6113, %v980_v11  }
 0x236   : > { %1096 = vperm.xlu1 %6113, %v981_v46  }
 0x23a   : > { %1101 = vperm.xlu1 %6113, %v982_v35  }
 0x23e   : > { %1116 = vperm.xlu1 %6113, %v986_v42  }
 0x242   : > { %1106 = vperm.xlu1 %6113, %v983_v52  }
 0x246   : > { %1071 = vperm.xlu1 %6113, %v975_v33  }
 0x24a   : > { %1111 = vperm.xlu1 %6113, %v984_v14  }
 0x27d   : > { %v997_v31 = vpop.permute.xlu0 %996  ;;  %v1002_v12 = vpop.permute.xlu1 %1001 }
 0x27e   : > { %v1154_v29 = vmul.f32 %v997_v31, %v6375_v45  ;;  %v1155_v0 = vmul.f32 %v6373_v44, %v1002_v12 }
 0x280   : > { %v1186_v47 = vsel %vm560_vm2, %v1154_v29, 0.0  ;;  %v1187_v30 = vsel %vm560_vm2, %v1155_v0, 0.0  ;;  %v9602_v0 = vld [vmem:[#allocation16_spill] sm:$0xff] }
 0x281   : > { %v1188_v36 = vadd.f32 %v1187_v30, %v1186_v47  ;;  %v1012_v8 = vpop.permute.xlu0 %1011  ;;  %v1007_v13 = vpop.permute.xlu1 %1006 }
 0x282   : > { %v1157_v32 = vmul.f32 %v6382_v49, %v1012_v8  ;;  %v1156_v5 = vmul.f32 %v1007_v13, %v6384_v50 }
 0x284   : > { %v1189_v7 = vsel %vm560_vm2, %v1156_v5, 0.0  ;;  %v1191_v18 = vsel %vm560_vm2, %v1157_v32, 0.0  ;;  %v9603_v32 = vld [vmem:[#allocation19_spill] sm:$0xff] }
 0x285   : > { %v1190_v17 = vadd.f32 %v1189_v7, %v1188_v36  ;;  %v1017_v33 = vpop.permute.xlu0 %1016 }
 0x286   : > { %v1158_v59 = vmul.f32 %v1017_v33, %v6394_v56 }
 0x287   : > { %v1192_v27 = vadd.f32 %v1191_v18, %v1190_v17 }
 0x288   : > { %v1193_v41 = vsel %vm560_vm2, %v1158_v59, 0.0  ;;  %v9604_v59 = vld [vmem:[#allocation21_spill] sm:$0xff] }
 0x289   : > { %v1194_v20 = vadd.f32 %v1193_v41, %v1192_v27  ;;  %v1022_v23 = vpop.permute.xlu0 %1021  ;;  %v1037_v43 = vpop.permute.xlu1 %1036 }
 0x28a   : > { %v1159_v53 = vmul.f32 %v6392_v55, %v1022_v23  ;;  %v1162_v21 = vmul.f32 %v1037_v43, %v6411_v2 }
 0x28c   : > { %v1195_v39 = vsel %vm560_vm2, %v1159_v53, 0.0  ;;  %v1207_v19 = vsel %vm560_vm2, %v1162_v21, 0.0 }
 0x28d   : > { %v1196_v54 = vadd.f32 %v1195_v39, %v1194_v20  ;;  %v1027_v51 = vpop.permute.xlu0 %1026  ;;  %v1042_v9 = vpop.permute.xlu1 %1041  ;;  %v9605_v20 = vld [vmem:[#allocation20_spill] sm:$0xff] }
 0x28e   : > { %v1160_v24 = vmul.f32 %v1027_v51, %v6404_v62  ;;  %v1163_v34 = vmul.f32 %v6409_v1, %v1042_v9 }
 0x290   : > { %v1197_v26 = vsel %vm560_vm2, %v1160_v24, 0.0  ;;  %v1208_v57 = vsel %vm560_vm2, %v1163_v34, 0.0  ;;  %v9606_v24 = vld [vmem:[#allocation23_spill] sm:$0xff] }
 0x291   : > { %v1198_v3 = vadd.f32 %v1197_v26, %v1196_v54  ;;  %v1032_v25 = vpop.permute.xlu0 %1031  ;;  %v1209_v11 = vadd.f32 %v1208_v57, %v1207_v19  ;;  %v1047_v35 = vpop.permute.xlu1 %1046 }
 0x292   : > { %v1161_v22 = vmul.f32 %v6402_v61, %v1032_v25  ;;  %v1164_v42 = vmul.f32 %v1047_v35, %v6418_v6  ;;  %v9607_v25 = vld [vmem:[#allocation22_spill] sm:$0xff] }
 0x294   : > { %v1199_v28 = vsel %vm560_vm2, %v1161_v22, 0.0  ;;  %v1210_v52 = vsel %vm560_vm2, %v1164_v42, 0.0 }
 0x295   : > { %v6953_v46 = vadd.f32 %v1199_v28, %v1198_v3  ;;  %v1211_v14 = vadd.f32 %v1210_v52, %v1209_v11  ;;  %v1052_v16 = vpop.permute.xlu1 %1051  ;;  %v1122_v36 = vpop.permute.xlu0 %1121  ;;  %v9608_v11 = vld [vmem:[#allocation25_spill] sm:$0xff] }
 0x296   : > { %v1165_v38 = vmul.f32 %v9600_v10, %v1052_v16 }
 0x298   : > { %v1212_v37 = vsel %vm560_vm2, %v1165_v38, 0.0  ;;  %v9609_v38 = vld [vmem:[#allocation24_spill] sm:$0xff] }
 0x299   : > { %v1213_v48 = vadd.f32 %v1212_v37, %v1211_v14  ;;  %v1057_v63 = vpop.permute.xlu1 %1056  ;;  %v1127_v18 = vpop.permute.xlu0 %1126 }
 0x29a   : > { %v1166_v58 = vmul.f32 %v1057_v63, %v9601_v60 }
 0x29c   : > { %v1214_v31 = vsel %vm560_vm2, %v1166_v58, 0.0 }
 0x29d   : > { %v1215_v12 = vadd.f32 %v1214_v31, %v1213_v48  ;;  %v1062_v29 = vpop.permute.xlu1 %1061  ;;  %v1132_v54 = vpop.permute.xlu0 %1131  ;;  %v9610_v48 = vld [vmem:[#allocation28_spill] sm:$0xff] }
 0x29e   : > { %v1167_v47 = vmul.f32 %v9602_v0, %v1062_v29  ;;  %v1179_v63 = vmul.f32 %v9610_v48, %v1122_v36  ;;  %v9611_v29 = vld [vmem:[#allocation31_spill] sm:$0xff] }
 0x2a0   : > { %v1216_v30 = vsel %vm560_vm2, %v1167_v47, 0.0  ;;  %v1180_v47 = vmul.f32 %v1127_v18, %v9611_v29 }
 0x2a1   : > { %v1217_v8 = vadd.f32 %v1216_v30, %v1215_v12  ;;  %v1067_v13 = vpop.permute.xlu1 %1066  ;;  %v1137_v22 = vpop.permute.xlu0 %1136  ;;  %v9612_v30 = vld [vmem:[#allocation29_spill] sm:$0xff] }
 0x2a2   : > { %v1168_v5 = vmul.f32 %v1067_v13, %v9603_v32  ;;  %v1252_v36 = vsel %vm560_vm2, %v1180_v47, 0.0 }
 0x2a4   : > { %v1218_v7 = vsel %vm560_vm2, %v1168_v5, 0.0  ;;  %v1250_v5 = vsel %vm560_vm2, %v1179_v63, 0.0 }
 0x2a5   : > { %v1219_v17 = vadd.f32 %v1218_v7, %v1217_v8  ;;  %v1077_v33 = vpop.permute.xlu1 %1076  ;;  %v1142_v52 = vpop.permute.xlu0 %1141  ;;  %v9613_v7 = vld [vmem:[#allocation30_spill] sm:$0xff] }
 0x2a6   : > { %v1170_v27 = vmul.f32 %v1077_v33, %v9604_v59  ;;  %v1181_v33 = vmul.f32 %v9613_v7, %v1132_v54 }
 0x2a8   : > { %v1228_v53 = vsel %vm560_vm2, %v1170_v27, 0.0 }
 0x2a9   : > { %v1082_v41 = vpop.permute.xlu1 %1081  ;;  %v1147_v13 = vpop.permute.xlu0 %1146 }
 0x2aa   : > { %v1171_v23 = vmul.f32 %v9605_v20, %v1082_v41  ;;  %v1201_v41 = vrot.slane %v6953_v46, 4 }
 0x2ac   : > { %v1229_v39 = vsel %vm560_vm2, %v1171_v23, 0.0  ;;  %v1202_v54 = vadd.f32 %v1201_v41, %v6953_v46 }
 0x2ad   : > { %v1230_v43 = vadd.f32 %v1229_v39, %v1228_v53  ;;  %v1087_v51 = vpop.permute.xlu1 %1086  ;;  %v9614_v39 = vld [vmem:[#allocation33_spill] sm:$0xff] }
 0x2ae   : > { %v1172_v21 = vmul.f32 %v1087_v51, %v9606_v24  ;;  %v9615_v51 = vld [vmem:[#allocation27_spill] sm:$0xff] }
 0x2b0   : > { %v1231_v26 = vsel %vm560_vm2, %v1172_v21, 0.0 }
 0x2b1   : > { %v1232_v3 = vadd.f32 %v1231_v26, %v1230_v43  ;;  %v1092_v9 = vpop.permute.xlu1 %1091  ;;  %v1182_v43 = vmul.f32 %v1137_v22, %v9614_v39  ;;  %v1254_v26 = vsel %vm560_vm2, %v1181_v33, 0.0  ;;  %v9618_v22 = vld [vmem:[#allocation18_spill] sm:$0xff] }
 0x2b2   : > { %v1173_v34 = vmul.f32 %v9607_v25, %v1092_v9 }
 0x2b4   : > { %v1233_v19 = vsel %vm560_vm2, %v1173_v34, 0.0 }
 0x2b5   : > { %v1234_v57 = vadd.f32 %v1233_v19, %v1232_v3  ;;  %v1097_v28 = vpop.permute.xlu1 %1096  ;;  %v9616_v3 = vld [vmem:[#allocation32_spill] sm:$0xff]  ;;  %v1152_v19 = vpop.permute.xlu0 %1151 }
 0x2b6   : > { %v1174_v35 = vmul.f32 %v1097_v28, %v9608_v11  ;;  %v1183_v9 = vmul.f32 %v9616_v3, %v1142_v52 }
 0x2b8   : > { %v1235_v42 = vsel %vm560_vm2, %v1174_v35, 0.0 }
 0x2b9   : > { %v1236_v14 = vadd.f32 %v1235_v42, %v1234_v57  ;;  %v1102_v16 = vpop.permute.xlu1 %1101  ;;  %v1256_v42 = vsel %vm560_vm2, %v1182_v43, 0.0 }
 0x2ba   : > { %v1175_v37 = vmul.f32 %v9609_v38, %v1102_v16 }
 0x2bc   : > { %v1237_v58 = vsel %vm560_vm2, %v1175_v37, 0.0 }
 0x2bd   : > { %v1238_v31 = vadd.f32 %v1237_v58, %v1236_v14  ;;  %v1117_v12 = vpop.permute.xlu1 %1116  ;;  %v9617_v14 = vld [vmem:[#allocation35_spill] sm:$0xff]  ;;  %v1258_v58 = vsel %vm560_vm2, %v1183_v9, 0.0 }
 0x2be   : > { %v1178_v8 = vmul.f32 %v1117_v12, %v9612_v30  ;;  %v1184_v16 = vmul.f32 %v1147_v13, %v9617_v14  ;;  %v9619_v12 = vld [vmem:[#allocation34_spill] sm:$0xff] }
 0x2bf   : > { %v1185_v47 = vmul.f32 %v9619_v12, %v1152_v19 }
 0x2c0   : > { %v1249_v27 = vsel %vm560_vm2, %v1178_v8, 0.0  ;;  %v1203_v8 = vrot.slane %v1202_v54, 2 }
 0x2c1   : > { %v1251_v23 = vadd.f32 %v1250_v5, %v1249_v27  ;;  %v1107_v53 = vpop.permute.xlu1 %1106  ;;  %v9620_v27 = vld [vmem:[#allocation26_spill] sm:$0xff]  ;;  %v1262_v13 = vsel %vm560_vm2, %v1185_v47, 0.0 }
 0x2c2   : > { %v1176_v21 = vmul.f32 %v1107_v53, %v9615_v51  ;;  %v1204_v43 = vadd.f32 %v1203_v8, %v1202_v54 }
 0x2c3   : > { %v1253_v18 = vadd.f32 %v1252_v36, %v1251_v23 }
 0x2c4   : > { %v1239_v34 = vsel %vm560_vm2, %v1176_v21, 0.0 }
 0x2c5   : > { %v1255_v57 = vadd.f32 %v1254_v26, %v1253_v18  ;;  %v1240_v28 = vadd.f32 %v1239_v34, %v1238_v31  ;;  %v1072_v35 = vpop.permute.xlu1 %1071  ;;  %v1260_v31 = vsel %vm560_vm2, %v1184_v16, 0.0 }
 0x2c6   : > { %v1169_v37 = vmul.f32 %v9618_v22, %v1072_v35 }
 0x2c7   : > { %v1257_v63 = vadd.f32 %v1256_v42, %v1255_v57  ;;  %v1205_v57 = vrot.slane %v1204_v43, 1 }
 0x2c8   : > { %v1220_v52 = vsel %vm560_vm2, %v1169_v37, 0.0 }
 0x2c9   : > { %v1259_v5 = vadd.f32 %v1258_v58, %v1257_v63  ;;  %v1221_v46 = vadd.f32 %v1220_v52, %v1219_v17  ;;  %v1112_v33 = vpop.permute.xlu1 %1111  ;;  %v1206_v58 = vadd.f32 %v1205_v57, %v1204_v43 }
 0x2ca   : > { %v1177_v41 = vmul.f32 %v9620_v27, %v1112_v33 }
 0x2cb   : > { %v1261_v23 = vadd.f32 %v1260_v31, %v1259_v5  ;;  %v1222_v53 = vrot.slane %v1221_v46, 4 }
 0x2cc   : > { %v1241_v36 = vsel %vm560_vm2, %v1177_v41, 0.0 }
 0x2cd   : > { %v1223_v21 = vadd.f32 %v1222_v53, %v1221_v46  ;;  %v1242_v18 = vadd.f32 %v1241_v36, %v1240_v28  ;;  %v1263_v26 = vadd.f32 %v1262_v13, %v1261_v23  ;;  %v9621_v23 = vld [vmem:[#allocation3_spill] sm:$0xff]  ;;  %v7008_v13 = vld [vmem:[%s9484_s1 + $0x78] sm:$0xff] }
 0x2ce   : > { %v1272_v53 = vsub.s32 6, %v9621_v23 }
 0x2cf   : > { %v1224_v9 = vrot.slane %v1223_v21, 2  ;;  %v1243_v34 = vrot.slane %v1242_v18, 4  ;;  %v1264_v19 = vrot.slane %v1263_v26, 4 }
 0x2d0   : > { %v1273_v36 = vrot.slane %v7008_v13, %v1272_v53 }
 0x2d1   : > { %v1225_v17 = vadd.f32 %v1224_v9, %v1223_v21  ;;  %v1244_v35 = vadd.f32 %v1243_v34, %v1242_v18  ;;  %v1265_v42 = vadd.f32 %v1264_v19, %v1263_v26 }
 0x2d3   : > { %v1226_v16 = vrot.slane %v1225_v17, 1  ;;  %v1245_v37 = vrot.slane %v1244_v35, 2  ;;  %v1266_v63 = vrot.slane %v1265_v42, 2 }
 0x2d5   : > { %v1227_v52 = vadd.f32 %v1226_v16, %v1225_v17  ;;  %v1246_v47 = vadd.f32 %v1245_v37, %v1244_v35  ;;  %v1267_v5 = vadd.f32 %v1266_v63, %v1265_v42  ;;  %v156_v35 = vld [vmem:[%s9484_s1 + $0x38] sm:$0xff]  ;;  %v157_v42 = vld [vmem:[%s9484_s1 + $0x40] sm:$0xff] }
 0x2d6   : > { %v1397_v16 = vrot.slane %v156_v35, 4  ;;  %v1399_v37 = vrot.slane %v157_v42, 4  ;;  %v1393_v35 = vsub.s32 1, %v9621_v23 }
 0x2d7   : > { %v1247_v33 = vrot.slane %v1246_v47, 1  ;;  %v1268_v54 = vrot.slane %v1267_v5, 1  ;;  %v1279_v8 = vsel %vm1278_vm5, %v1227_v52, %v1206_v58 }
 0x2d8   : > { %v1398_v63 = vsel %vm295_vm1, %v1289_v40, %v1397_v16  ;;  %v1400_v58 = vsel %vm295_vm1, %v1397_v16, %v1399_v37 }
 0x2d9   : > { %v1248_v28 = vadd.f32 %v1247_v33, %v1246_v47  ;;  %v1269_v46 = vadd.f32 %v1268_v54, %v1267_v5  ;;  %v6074_v52 = vpack.c.bf16 %v1400_v58, %v1398_v63  ;;  %v1382_v54 = vsub.s32 7, %v9621_v23 }
 0x2db   : > { %v1281_v31 = vsel %vm1280_vm6, %v1248_v28, %v1279_v8  ;;  %v1387_v8 = vsub.s32 0, %v9621_v23  ;;  %v165_v28 = vld [vmem:[%s9484_s1 + $0x80] sm:$0x3]  ;;  %v1383_v4 = vrot.slane %v7008_v13, %v1382_v54 }
 0x2dc   : > { %v1283_v41 = vsel %vm1282_vm7, %v1269_v46, %v1281_v31  ;;  %v1394_v16 = vrot.slane %v165_v28, %v1393_v35 }
 0x2dd   : > { %5893 = vmatmul.mubr.msk.f32.vlgmr.msra.gmra.mrb[0].mxu1 %vm560_vm2, %v1283_v41  ;;  %v1388_v31 = vrot.slane %v165_v28, %v1387_v8 }
 0x2de   : > { %5899 = vmatprep.mubr.msk.f32.mxu1 %vm6236_vm4, %v9531_v15  ;;  %6075 = vmatpush3.bf16.msra.mxu1 %v6074_v52  ;;  %vm4116_vm4 = vcmask 261120  }
 0x3b0   : > { %v1361_v43 = vpop.f32.mrb[0].mxu1 }
 0x3b1   : > { %v1362_v21 = vadd.f32 %v1361_v43, %v1273_v36  ;;  %v5894_v18 = vpop.f32.mrb[1].mxu1  ;;  %v158_v43 = vld [vmem:[%s9484_s1 + $0x48] sm:$0xff] }
 0x3b2   : > { %v1868_v18 = vrot.slane %v158_v43, 4 }
 0x3b3   : > { %v1366_v26 = vsel %vm1365_vm8, %v1362_v21, 0.0 }
 0x3b4   : > { %1367 = vadd.xlane.f32.xlu1 %v1366_v26 }
 0x441   : > { %v1368_v9 = vpop.xlane.xlu1 %1367 }
 0x442   : > { %v1370_v34 = vmul.f32 0.0625, %v1368_v9  ;;  %v1869_v9 = vsel %vm295_vm1, %v1399_v37, %v1868_v18 }
 0x444   : > { %v1371_v19 = vsub.f32 %v1362_v21, %v1370_v34  ;;  %v7034_v21 = vld [vmem:[%s9484_s1 + $0x50] sm:$0xff] }
 0x445   : > { %v9530_v26 = vrot.slane %v7034_v21, 4 }
 0x446   : > { %v1372_v57 = vmul.f32 %v1371_v19, %v1371_v19 }
 0x447   : > { %v1871_v34 = vsel %vm295_vm1, %v1868_v18, %v9530_v26 }
 0x448   : > { %v1373_v17 = vsel %vm1365_vm8, %v1372_v57, 0.0  ;;  %v6238_v57 = vmov 1966171168  }
 0x449   : > { %1374 = vadd.xlane.f32.xlu0 %v1373_v17  ;;  %v1478_v17 = vunpack.c.l.s4 %v6238_v57 }
 0x44b   : > { %v1479_v42 = vunpack.c.0.s8 %v1478_v17 }
 0x44d   : > { %v1482_v63 = vsub.s32 %v1479_v42, %v9621_v23 }
 0x4d6   : > { %v1375_v47 = vpop.xlane.xlu0 %1374 }
 0x4d7   : > { %v1376_v5 = vmul.f32 0.0625, %v1375_v47 }
 0x4d9   : > { %v1377_v33 = vadd.f32 1e-05, %v1376_v5 }
 0x4db   : > { %6186 = vrsqrt.f32 %v1377_v33 }
 0x4e5   : > { %v6187_v46 = vpop.eup %6186 }
 0x4e6   : > { %v1379_v40 = vmul.f32 %v6187_v46, %v1371_v19  ;;  %v6076_v19 = vpack.c.bf16 %v1871_v34, %v1869_v9 }
 0x4e8   : > { %v1384_v41 = vmul.f32 %v1383_v4, %v1379_v40  ;;  %6077 = vmatprep.subr.bf16.mxu1 %v6076_v19 }
 0x4ea   : > { %v1389_v53 = vadd.f32 %v1388_v31, %v1384_v41 }
 0x4ec   : > { %v1390_v36 = vmax.f32 %v1389_v53, 0.0 }
 0x4ee   : > { %5900 = vmatmul.mubr.msk.f32.vlgmr.msra.gmra.mrb[2].mxu1 %vm560_vm2, %v1390_v36 }
 0x4ef   : > { %6079 = vmatpush3.bf16.msra.mxu1 %v6076_v19 }
 0x4f0   : > { %6012 = vmatprep.subr.msk.mxu1 %vm295_vm1, %v7008_v13 }
 0x5c1   : > { %v1472_v58 = vpop.f32.mrb[2].mxu1 }
 0x5c2   : > { %v1473_v37 = vadd.f32 %v1472_v58, %v1394_v16  ;;  %v5901_v52 = vpop.f32.mrb[3].mxu1 }
 0x5c4   : > { %v1483_v47 = vrot.slane %v1473_v37, %v1482_v63 }
 0x5c6   : > { %v1484_v5 = vcombine.high %v1483_v47, %v1483_v47  ;;  %v1491_v33 = vrot.slane %v1483_v47, %v1482_v63 }
 0x5c8   : > { %v1498_v54 = vrot.slane %v1484_v5, %v1482_v63  ;;  %v1504_v4 = vrot.slane %v1491_v33, %v1387_v8  ;;  %v1499_v46 = vcombine.high %v1491_v33, %v1491_v33 }
 0x5ca   : > { %v1500_v40 = vcombine.high %v1498_v54, %v1498_v54  ;;  %v1508_v31 = vrot.slane %v1498_v54, %v1387_v8  ;;  %v7046_v41 = vadd.f32 %v1504_v4, %v6375_v45  ;;  %v7049_v53 = vadd.f32 %v6373_v44, %v1504_v4 }
 0x5cb   : > { %v7052_v28 = vadd.f32 %v1504_v4, %v6384_v50  ;;  %v7055_v36 = vadd.f32 %v6382_v49, %v1504_v4  ;;  %v7058_v43 = vadd.f32 %v1504_v4, %v6394_v56  ;;  %v7061_v18 = vadd.f32 %v6392_v55, %v1504_v4 }
 0x5cc   : > { %v7064_v9 = vadd.f32 %v1504_v4, %v6404_v62  ;;  %v7067_v34 = vadd.f32 %v6402_v61, %v1504_v4  ;;  %v1553_v19 = vsel %vm560_vm2, %v7046_v41, 0.0  ;;  %v1554_v57 = vsel %vm560_vm2, %v7049_v53, 0.0 }
 0x5cd   : > { %v1512_v17 = vrot.slane %v1499_v46, %v1387_v8  ;;  %v1516_v35 = vrot.slane %v1500_v40, %v1387_v8  ;;  %v1555_v42 = vadd.f32 %v1554_v57, %v1553_v19  ;;  %v1556_v16 = vsel %vm560_vm2, %v7052_v28, 0.0 }
 0x5ce   : > { %v1558_v63 = vsel %vm560_vm2, %v7055_v36, 0.0  ;;  %v7078_v58 = vadd.f32 %v1508_v31, %v6411_v2  ;;  %v7081_v37 = vadd.f32 %v6409_v1, %v1508_v31  ;;  %v7084_v52 = vadd.f32 %v1508_v31, %v6418_v6 }
 0x5cf   : > { %v1557_v47 = vadd.f32 %v1556_v16, %v1555_v42  ;;  %v7087_v5 = vadd.f32 %v9600_v10, %v1508_v31  ;;  %v7090_v8 = vadd.f32 %v1508_v31, %v9601_v60  ;;  %v7093_v33 = vadd.f32 %v9602_v0, %v1508_v31 }
 0x5d0   : > { %v7096_v54 = vadd.f32 %v1508_v31, %v9603_v32  ;;  %v7099_v4 = vadd.f32 %v9618_v22, %v1508_v31  ;;  %v1574_v46 = vsel %vm560_vm2, %v7078_v58, 0.0  ;;  %v1575_v40 = vsel %vm560_vm2, %v7081_v37, 0.0 }
 0x5d1   : > { %v1559_v19 = vadd.f32 %v1558_v63, %v1557_v47  ;;  %v1560_v57 = vsel %vm560_vm2, %v7058_v43, 0.0  ;;  %v1562_v42 = vsel %vm560_vm2, %v7061_v18, 0.0  ;;  %v1576_v16 = vadd.f32 %v1575_v40, %v1574_v46 }
 0x5d2   : > { %v1564_v26 = vsel %vm560_vm2, %v7064_v9, 0.0  ;;  %v1566_v31 = vsel %vm560_vm2, %v7067_v34, 0.0  ;;  %v1577_v15 = vsel %vm560_vm2, %v7084_v52, 0.0  ;;  %v1579_v23 = vsel %vm560_vm2, %v7087_v5, 0.0 }
 0x5d3   : > { %v1561_v63 = vadd.f32 %v1560_v57, %v1559_v19  ;;  %v1578_v47 = vadd.f32 %v1577_v15, %v1576_v16  ;;  %v7118_v32 = vadd.f32 %v1512_v17, %v9604_v59  ;;  %v7121_v22 = vadd.f32 %v9605_v20, %v1512_v17 }
 0x5d4   : > { %v7124_v46 = vadd.f32 %v1512_v17, %v9606_v24  ;;  %v7127_v40 = vadd.f32 %v9607_v25, %v1512_v17  ;;  %v7130_v60 = vadd.f32 %v1512_v17, %v9608_v11  ;;  %v7133_v0 = vadd.f32 %v9609_v38, %v1512_v17 }
 0x5d5   : > { %v1563_v19 = vadd.f32 %v1562_v42, %v1561_v63  ;;  %v1580_v15 = vadd.f32 %v1579_v23, %v1578_v47  ;;  %v7136_v57 = vadd.f32 %v1512_v17, %v9615_v51  ;;  %v7139_v16 = vadd.f32 %v9620_v27, %v1512_v17 }
 0x5d6   : > { %v1581_v24 = vsel %vm560_vm2, %v7090_v8, 0.0  ;;  %v1583_v25 = vsel %vm560_vm2, %v7093_v33, 0.0  ;;  %v1595_v11 = vsel %vm560_vm2, %v7118_v32, 0.0  ;;  %v1596_v38 = vsel %vm560_vm2, %v7121_v22, 0.0 }
 0x5d7   : > { %v1565_v42 = vadd.f32 %v1564_v26, %v1563_v19  ;;  %v1582_v23 = vadd.f32 %v1581_v24, %v1580_v15  ;;  %v1585_v63 = vsel %vm560_vm2, %v7096_v54, 0.0  ;;  %v1597_v47 = vadd.f32 %v1596_v38, %v1595_v11 }
 0x5d8   : > { %v1587_v17 = vsel %vm560_vm2, %v7099_v4, 0.0  ;;  %v1598_v51 = vsel %vm560_vm2, %v7124_v46, 0.0  ;;  %v1600_v27 = vsel %vm560_vm2, %v7127_v40, 0.0  ;;  %v7158_v59 = vadd.f32 %v1516_v35, %v9612_v30 }
 0x5d9   : > { %v1567_v20 = vadd.f32 %v1566_v31, %v1565_v42  ;;  %v1584_v6 = vadd.f32 %v1583_v25, %v1582_v23  ;;  %v1599_v26 = vadd.f32 %v1598_v51, %v1597_v47  ;;  %v7161_v24 = vadd.f32 %v9610_v48, %v1516_v35 }
 0x5da   : > { %v7164_v11 = vadd.f32 %v1516_v35, %v9611_v29  ;;  %v7167_v38 = vadd.f32 %v9613_v7, %v1516_v35  ;;  %v7170_v19 = vadd.f32 %v1516_v35, %v9614_v39  ;;  %v7173_v15 = vadd.f32 %v9616_v3, %v1516_v35 }
 0x5db   : > { %v1568_v30 = vrot.slane %v1567_v20, 4  ;;  %v1586_v10 = vadd.f32 %v1585_v63, %v1584_v6  ;;  %v1601_v31 = vadd.f32 %v1600_v27, %v1599_v26  ;;  %v7176_v25 = vadd.f32 %v1516_v35, %v9617_v14 }
 0x5dc   : > { %v1602_v51 = vsel %vm560_vm2, %v7130_v60, 0.0  ;;  %v7181_v42 = vadd.f32 %v9619_v12, %v1516_v35  ;;  %v1616_v23 = vsel %vm560_vm2, %v7158_v59, 0.0  ;;  %v1617_v47 = vsel %vm560_vm2, %v7161_v24, 0.0 }
 0x5dd   : > { %v1569_v39 = vadd.f32 %v1568_v30, %v1567_v20  ;;  %v1588_v3 = vadd.f32 %v1587_v17, %v1586_v10  ;;  %v1603_v29 = vadd.f32 %v1602_v51, %v1601_v31  ;;  %v1618_v6 = vadd.f32 %v1617_v47, %v1616_v23 }
 0x5de   : > { %v1604_v27 = vsel %vm560_vm2, %v7133_v0, 0.0  ;;  %v1619_v63 = vsel %vm560_vm2, %v7164_v11, 0.0  ;;  %v1606_v7 = vsel %vm560_vm2, %v7136_v57, 0.0  ;;  %v1621_v48 = vsel %vm560_vm2, %v7167_v38, 0.0 }
 0x5df   : > { %v1570_v26 = vrot.slane %v1569_v39, 2  ;;  %v1589_v14 = vrot.slane %v1588_v3, 4  ;;  %v1605_v35 = vadd.f32 %v1604_v27, %v1603_v29  ;;  %v1620_v12 = vadd.f32 %v1619_v63, %v1618_v6 }
 0x5e0   : > { %v1608_v31 = vsel %vm560_vm2, %v7139_v16, 0.0  ;;  %v1623_v51 = vsel %vm560_vm2, %v7170_v19, 0.0  ;;  %v1625_v27 = vsel %vm560_vm2, %v7173_v15, 0.0 }
 0x5e1   : > { %v1571_v20 = vadd.f32 %v1570_v26, %v1569_v39  ;;  %v1590_v10 = vadd.f32 %v1589_v14, %v1588_v3  ;;  %v1607_v30 = vadd.f32 %v1606_v7, %v1605_v35  ;;  %v1622_v17 = vadd.f32 %v1621_v48, %v1620_v12 }
 0x5e2   : > { %v1627_v39 = vsel %vm560_vm2, %v7176_v25, 0.0 }
 0x5e3   : > { %v1572_v23 = vrot.slane %v1571_v20, 1  ;;  %v1591_v47 = vrot.slane %v1590_v10, 2  ;;  %v1609_v29 = vadd.f32 %v1608_v31, %v1607_v30  ;;  %v1624_v6 = vadd.f32 %v1623_v51, %v1622_v17 }
 0x5e5   : > { %v1573_v63 = vadd.f32 %v1572_v23, %v1571_v20  ;;  %v1626_v2 = vadd.f32 %v1625_v27, %v1624_v6  ;;  %v1592_v48 = vadd.f32 %v1591_v47, %v1590_v10  ;;  %v1610_v14 = vrot.slane %v1609_v29, 4 }
 0x5e7   : > { %v1638_v7 = vmul.f32 0.015625, %v1573_v63  ;;  %v1628_v3 = vadd.f32 %v1627_v39, %v1626_v2  ;;  %v1611_v47 = vadd.f32 %v1610_v14, %v1609_v29 }
 0x5e9   : > { %v7204_v12 = vsub.f32 %v7046_v41, %v1638_v7  ;;  %v7207_v26 = vsub.f32 %v7049_v53, %v1638_v7  ;;  %v7210_v35 = vsub.f32 %v7052_v28, %v1638_v7  ;;  %v7213_v30 = vsub.f32 %v7055_v36, %v1638_v7 }
 0x5ea   : > { %v7216_v20 = vsub.f32 %v7058_v43, %v1638_v7  ;;  %v7219_v17 = vsub.f32 %v7061_v18, %v1638_v7  ;;  %v7222_v2 = vsub.f32 %v7064_v9, %v1638_v7  ;;  %v7225_v41 = vsub.f32 %v7067_v34, %v1638_v7 }
 0x5eb   : > { %v1674_v53 = vmul.f32 %v7204_v12, %v7204_v12  ;;  %v1675_v28 = vmul.f32 %v7207_v26, %v7207_v26  ;;  %v1676_v36 = vmul.f32 %v7210_v35, %v7210_v35  ;;  %v1593_v43 = vrot.slane %v1592_v48, 1 }
 0x5ec   : > { %v1677_v18 = vmul.f32 %v7213_v30, %v7213_v30  ;;  %v1629_v34 = vsel %vm560_vm2, %v7181_v42, 0.0  ;;  %v1678_v31 = vmul.f32 %v7216_v20, %v7216_v20  ;;  %v1679_v51 = vmul.f32 %v7219_v17, %v7219_v17 }
 0x5ed   : > { %v1706_v10 = vsel %vm560_vm2, %v1674_v53, 0.0  ;;  %v1707_v9 = vsel %vm560_vm2, %v1675_v28, 0.0  ;;  %v1709_v6 = vsel %vm560_vm2, %v1676_v36, 0.0  ;;  %v1594_v27 = vadd.f32 %v1593_v43, %v1592_v48 }
 0x5ee   : > { %v1708_v23 = vadd.f32 %v1707_v9, %v1706_v10  ;;  %v1630_v63 = vadd.f32 %v1629_v34, %v1628_v3  ;;  %v1680_v7 = vmul.f32 %v7222_v2, %v7222_v2  ;;  %v1681_v53 = vmul.f32 %v7225_v41, %v7225_v41 }
 0x5ef   : > { %v1711_v28 = vsel %vm560_vm2, %v1677_v18, 0.0  ;;  %v1639_v1 = vmul.f32 0.015625, %v1594_v27  ;;  %v1713_v61 = vsel %vm560_vm2, %v1678_v31, 0.0  ;;  %v1715_v10 = vsel %vm560_vm2, %v1679_v51, 0.0 }
 0x5f0   : > { %v1710_v39 = vadd.f32 %v1709_v6, %v1708_v23  ;;  %v1612_v29 = vrot.slane %v1611_v47, 2  ;;  %v1719_v23 = vsel %vm560_vm2, %v1681_v53, 0.0 }
 0x5f1   : > { %v7252_v14 = vsub.f32 %v7078_v58, %v1639_v1  ;;  %v7255_v48 = vsub.f32 %v7081_v37, %v1639_v1  ;;  %v7258_v3 = vsub.f32 %v7084_v52, %v1639_v1  ;;  %v7261_v36 = vsub.f32 %v7087_v5, %v1639_v1 }
 0x5f2   : > { %v1712_v62 = vadd.f32 %v1711_v28, %v1710_v39  ;;  %v7264_v18 = vsub.f32 %v7090_v8, %v1639_v1  ;;  %v7267_v9 = vsub.f32 %v7093_v33, %v1639_v1  ;;  %v7270_v34 = vsub.f32 %v7096_v54, %v1639_v1 }
 0x5f3   : > { %v7273_v58 = vsub.f32 %v7099_v4, %v1639_v1  ;;  %v1682_v37 = vmul.f32 %v7252_v14, %v7252_v14  ;;  %v1683_v52 = vmul.f32 %v7255_v48, %v7255_v48  ;;  %v1717_v5 = vsel %vm560_vm2, %v1680_v7, 0.0 }
 0x5f4   : > { %v1714_v43 = vadd.f32 %v1713_v61, %v1712_v62  ;;  %v1684_v61 = vmul.f32 %v7258_v3, %v7258_v3  ;;  %v1613_v8 = vadd.f32 %v1612_v29, %v1611_v47  ;;  %v1685_v33 = vmul.f32 %v7261_v36, %v7261_v36 }
 0x5f5   : > { %v1727_v54 = vsel %vm560_vm2, %v1682_v37, 0.0  ;;  %v1728_v1 = vsel %vm560_vm2, %v1683_v52, 0.0  ;;  %v1631_v4 = vrot.slane %v1630_v63, 4  ;;  %v1686_v6 = vmul.f32 %v7264_v18, %v7264_v18 }
 0x5f6   : > { %v1716_v62 = vadd.f32 %v1715_v10, %v1714_v43  ;;  %v1729_v51 = vadd.f32 %v1728_v1, %v1727_v54  ;;  %v1730_v27 = vsel %vm560_vm2, %v1684_v61, 0.0  ;;  %v1614_v47 = vrot.slane %v1613_v8, 1 }
 0x5f7   : > { %v1687_v28 = vmul.f32 %v7267_v9, %v7267_v9  ;;  %v1688_v10 = vmul.f32 %v7270_v34, %v7270_v34  ;;  %v1732_v29 = vsel %vm560_vm2, %v1685_v33, 0.0  ;;  %v1632_v43 = vadd.f32 %v1631_v4, %v1630_v63 }
 0x5f8   : > { %v1718_v31 = vadd.f32 %v1717_v5, %v1716_v62  ;;  %v1731_v7 = vadd.f32 %v1730_v27, %v1729_v51  ;;  %v1615_v53 = vadd.f32 %v1614_v47, %v1613_v8  ;;  %v1734_v62 = vsel %vm560_vm2, %v1686_v6, 0.0 }
 0x5f9   : > { %v1689_v1 = vmul.f32 %v7273_v58, %v7273_v58  ;;  %v1738_v51 = vsel %vm560_vm2, %v1688_v10, 0.0 }
 0x5fa   : > { %v1720_v39 = vadd.f32 %v1719_v23, %v1718_v31  ;;  %v1733_v52 = vadd.f32 %v1732_v29, %v1731_v7  ;;  %v1640_v61 = vmul.f32 0.015625, %v1615_v53  ;;  %v1736_v31 = vsel %vm560_vm2, %v1687_v28, 0.0 }
 0x5fb   : > { %v1633_v23 = vrot.slane %v1632_v43, 2 }
 0x5fc   : > { %v1721_v37 = vrot.slane %v1720_v39, 4  ;;  %v1735_v54 = vadd.f32 %v1734_v62, %v1733_v52  ;;  %v7301_v63 = vsub.f32 %v7118_v32, %v1640_v61  ;;  %v7304_v8 = vsub.f32 %v7121_v22, %v1640_v61 }
 0x5fd   : > { %v7307_v33 = vsub.f32 %v7124_v46, %v1640_v61  ;;  %v7310_v4 = vsub.f32 %v7127_v40, %v1640_v61  ;;  %v7313_v6 = vsub.f32 %v7130_v60, %v1640_v61  ;;  %v7319_v32 = vsub.f32 %v7136_v57, %v1640_v61 }
 0x5fe   : > { %v1722_v5 = vadd.f32 %v1721_v37, %v1720_v39  ;;  %v1737_v56 = vadd.f32 %v1736_v31, %v1735_v54  ;;  %v7316_v39 = vsub.f32 %v7133_v0, %v1640_v61  ;;  %v7322_v22 = vsub.f32 %v7139_v16, %v1640_v61 }
 0x5ff   : > { %v1740_v46 = vsel %vm560_vm2, %v1689_v1, 0.0  ;;  %v1690_v40 = vmul.f32 %v7301_v63, %v7301_v63  ;;  %v1691_v60 = vmul.f32 %v7304_v8, %v7304_v8  ;;  %v1692_v0 = vmul.f32 %v7307_v33, %v7307_v33 }
 0x600   : > { %v1723_v27 = vrot.slane %v1722_v5, 2  ;;  %v1739_v47 = vadd.f32 %v1738_v51, %v1737_v56  ;;  %v1693_v56 = vmul.f32 %v7310_v4, %v7310_v4  ;;  %v1634_v29 = vadd.f32 %v1633_v23, %v1632_v43 }
 0x601   : > { %v1748_v57 = vsel %vm560_vm2, %v1690_v40, 0.0  ;;  %v1749_v16 = vsel %vm560_vm2, %v1691_v60, 0.0  ;;  %v1694_v62 = vmul.f32 %v7313_v6, %v7313_v6  ;;  %v1695_v31 = vmul.f32 %v7316_v39, %v7316_v39 }
 0x602   : > { %v1724_v7 = vadd.f32 %v1723_v27, %v1722_v5  ;;  %v1741_v10 = vadd.f32 %v1740_v46, %v1739_v47  ;;  %v1750_v53 = vadd.f32 %v1749_v16, %v1748_v57  ;;  %v1751_v5 = vsel %vm560_vm2, %v1692_v0, 0.0 }
 0x603   : > { %v1696_v51 = vmul.f32 %v7319_v32, %v7319_v32  ;;  %v1753_v27 = vsel %vm560_vm2, %v1693_v56, 0.0  ;;  %v1635_v43 = vrot.slane %v1634_v29, 1  ;;  %v1697_v47 = vmul.f32 %v7322_v22, %v7322_v22 }
 0x604   : > { %v1725_v28 = vrot.slane %v1724_v7, 1  ;;  %v1742_v52 = vrot.slane %v1741_v10, 4  ;;  %v1752_v1 = vadd.f32 %v1751_v5, %v1750_v53  ;;  %v1755_v40 = vsel %vm560_vm2, %v1694_v62, 0.0 }
 0x605   : > { %v1636_v60 = vadd.f32 %v1635_v43, %v1634_v29  ;;  %v1759_v56 = vsel %vm560_vm2, %v1696_v51, 0.0 }
 0x606   : > { %v1726_v37 = vadd.f32 %v1725_v28, %v1724_v7  ;;  %v1743_v61 = vadd.f32 %v1742_v52, %v1741_v10  ;;  %v1754_v46 = vadd.f32 %v1753_v27, %v1752_v1  ;;  %v1757_v10 = vsel %vm560_vm2, %v1695_v31, 0.0 }
 0x607   : > { %v1641_v57 = vmul.f32 0.015625, %v1636_v60  ;;  %v1761_v52 = vsel %vm560_vm2, %v1697_v47, 0.0 }
 0x608   : > { %v1790_v54 = vmul.f32 0.015625, %v1726_v37  ;;  %v1744_v7 = vrot.slane %v1743_v61, 2  ;;  %v1756_v28 = vadd.f32 %v1755_v40, %v1754_v46 }
 0x609   : > { %v7350_v53 = vsub.f32 %v7158_v59, %v1641_v57  ;;  %v7353_v5 = vsub.f32 %v7161_v24, %v1641_v57  ;;  %v7356_v29 = vsub.f32 %v7164_v11, %v1641_v57  ;;  %v7359_v62 = vsub.f32 %v7167_v38, %v1641_v57 }
 0x60a   : > { %v1794_v23 = vadd.f32 1e-05, %v1790_v54  ;;  %v1745_v0 = vadd.f32 %v1744_v7, %v1743_v61  ;;  %v1758_v37 = vadd.f32 %v1757_v10, %v1756_v28  ;;  %v7362_v1 = vsub.f32 %v7170_v19, %v1641_v57 }
 0x60b   : > { %v7365_v31 = vsub.f32 %v7173_v15, %v1641_v57  ;;  %v7368_v59 = vsub.f32 %v7176_v25, %v1641_v57  ;;  %v7371_v24 = vsub.f32 %v7181_v42, %v1641_v57  ;;  %v1698_v11 = vmul.f32 %v7350_v53, %v7350_v53 }
 0x60c   : > { %6188 = vrsqrt.f32 %v1794_v23  ;;  %v1746_v16 = vrot.slane %v1745_v0, 1  ;;  %v1760_v61 = vadd.f32 %v1759_v56, %v1758_v37  ;;  %v1699_v38 = vmul.f32 %v7353_v5, %v7353_v5 }
 0x60d   : > { %v1769_v23 = vsel %vm560_vm2, %v1698_v11, 0.0  ;;  %v1700_v42 = vmul.f32 %v7356_v29, %v7356_v29  ;;  %v1701_v46 = vmul.f32 %v7359_v62, %v7359_v62 }
 0x60e   : > { %v1747_v54 = vadd.f32 %v1746_v16, %v1745_v0  ;;  %v1762_v27 = vadd.f32 %v1761_v52, %v1760_v61  ;;  %v1770_v15 = vsel %vm560_vm2, %v1699_v38, 0.0 }
 0x60f   : > { %v1771_v7 = vadd.f32 %v1770_v15, %v1769_v23  ;;  %v1704_v23 = vmul.f32 %v7368_v59, %v7368_v59 }
 0x610   : > { %v1791_v51 = vmul.f32 0.015625, %v1747_v54  ;;  %v1763_v19 = vrot.slane %v1762_v27, 4  ;;  %v1702_v54 = vmul.f32 %v7362_v1, %v7362_v1 }
 0x612   : > { %v1795_v43 = vadd.f32 1e-05, %v1791_v51  ;;  %v1764_v47 = vadd.f32 %v1763_v19, %v1762_v27  ;;  %v1776_v61 = vsel %vm560_vm2, %v1702_v54, 0.0  ;;  %v1703_v19 = vmul.f32 %v7365_v31, %v7365_v31 }
 0x614   : > { %6190 = vrsqrt.f32 %v1795_v43 }
 0x616   : > { %v6189_v25 = vpop.eup %6188 }
 0x617   : > { %v1802_v40 = vmul.f32 %v6189_v25, %v7204_v12  ;;  %v1803_v60 = vmul.f32 %v6189_v25, %v7207_v26  ;;  %v1804_v0 = vmul.f32 %v6189_v25, %v7210_v35  ;;  %v1805_v28 = vmul.f32 %v6189_v25, %v7213_v30 }
 0x618   : > { %v1806_v10 = vmul.f32 %v6189_v25, %v7216_v20  ;;  %v1807_v57 = vmul.f32 %v6189_v25, %v7219_v17  ;;  %v1808_v16 = vmul.f32 %v6189_v25, %v7222_v2  ;;  %v1809_v37 = vmul.f32 %v6189_v25, %v7225_v41 }
 0x619   : > { %v1834_v56 = vmax.f32 %v1802_v40, 0.0  ;;  %v1835_v52 = vmax.f32 %v1803_v60, 0.0  ;;  %v1772_v12 = vsel %vm560_vm2, %v1700_v42, 0.0  ;;  %v1836_v26 = vmax.f32 %v1804_v0, 0.0 }
 0x61a   : > { %v1765_v35 = vrot.slane %v1764_v47, 2  ;;  %v1773_v30 = vadd.f32 %v1772_v12, %v1771_v7  ;;  %v1774_v20 = vsel %vm560_vm2, %v1701_v46, 0.0  ;;  %v1837_v41 = vmax.f32 %v1805_v28, 0.0 }
 0x61b   : > { %5906 = vmatprep.mubr.msk.f32.mxu1 %vm560_vm2, %v1834_v56  ;;  %v1838_v11 = vmax.f32 %v1806_v10, 0.0  ;;  %v1839_v27 = vmax.f32 %v1807_v57, 0.0  ;;  %v1840_v60 = vmax.f32 %v1808_v16, 0.0  ;;  %v1841_v0 = vmax.f32 %v1809_v37, 0.0 }
 0x61c   : > { %5907 = vmatmul.mubr.msk.f32.vlgmr.msra.gmra.mrb[4].mxu1 %vm560_vm2, %v1835_v52  ;;  %v1766_v17 = vadd.f32 %v1765_v35, %v1764_v47  ;;  %v1775_v2 = vadd.f32 %v1774_v20, %v1773_v30 }
 0x61d   : > { %5909 = vmatprep.mubr.msk.f32.mxu1 %vm560_vm2, %v1836_v26  ;;  %6013 = vmatpush3.msk.msra.mxu1 %vm295_vm1, %v7008_v13 }
 0x61e   : > { %v1777_v38 = vadd.f32 %v1776_v61, %v1775_v2  ;;  %v6191_v51 = vpop.eup %6190  ;;  %v1767_v43 = vrot.slane %v1766_v17, 1 }
 0x61f   : > { %v1810_v13 = vmul.f32 %v6191_v51, %v7252_v14  ;;  %v1811_v15 = vmul.f32 %v6191_v51, %v7255_v48  ;;  %v1812_v7 = vmul.f32 %v6191_v51, %v7258_v3  ;;  %v1813_v25 = vmul.f32 %v6191_v51, %v7261_v36 }
 0x620   : > { %5910 = vmatmul.mubr.msk.f32.gmra.mrb[6].mxu1 %vm560_vm2, %v1837_v41  ;;  %v1814_v47 = vmul.f32 %v6191_v51, %v7264_v18  ;;  %v1815_v42 = vmul.f32 %v6191_v51, %v7267_v9  ;;  %v1816_v46 = vmul.f32 %v6191_v51, %v7270_v34  ;;  %v1817_v40 = vmul.f32 %v6191_v51, %v7273_v58 }
 0x621   : > { %5912 = vmatprep.mubr.msk.f32.mxu1 %vm560_vm2, %v1838_v11  ;;  %v1705_v14 = vmul.f32 %v7371_v24, %v7371_v24  ;;  %v1778_v48 = vsel %vm560_vm2, %v1703_v19, 0.0  ;;  %v1768_v3 = vadd.f32 %v1767_v43, %v1766_v17  ;;  %v1780_v18 = vsel %vm560_vm2, %v1704_v23, 0.0 }
 0x622   : > { %v1779_v36 = vadd.f32 %v1778_v48, %v1777_v38  ;;  %v1842_v9 = vmax.f32 %v1810_v13, 0.0  ;;  %v1843_v16 = vmax.f32 %v1811_v15, 0.0  ;;  %v1844_v56 = vmax.f32 %v1812_v7, 0.0 }
 0x623   : > { %v1792_v28 = vmul.f32 0.015625, %v1768_v3  ;;  %v1782_v58 = vsel %vm560_vm2, %v1705_v14, 0.0  ;;  %v1845_v54 = vmax.f32 %v1813_v25, 0.0  ;;  %v1846_v12 = vmax.f32 %v1814_v47, 0.0 }
 0x624   : > { %5913 = vmatmul.mubr.msk.f32.gmra.mrb[8].mxu1 %vm560_vm2, %v1839_v27  ;;  %v1781_v34 = vadd.f32 %v1780_v18, %v1779_v36  ;;  %v1847_v30 = vmax.f32 %v1815_v42, 0.0  ;;  %v1848_v20 = vmax.f32 %v1816_v46, 0.0  ;;  %v1849_v41 = vmax.f32 %v1817_v40, 0.0 }
 0x625   : > { %5915 = vmatprep.mubr.msk.f32.mxu1 %vm560_vm2, %v1840_v60  ;;  %v1796_v10 = vadd.f32 1e-05, %v1792_v28 }
 0x626   : > { %v1783_v57 = vadd.f32 %v1782_v58, %v1781_v34 }
 0x627   : > { %6192 = vrsqrt.f32 %v1796_v10 }
 0x628   : > { %5916 = vmatmul.mubr.msk.f32.gmra.mrb[10].mxu1 %vm560_vm2, %v1841_v0  ;;  %v1784_v52 = vrot.slane %v1783_v57, 4 }
 0x629   : > { %5918 = vmatprep.mubr.msk.f32.mxu1 %vm560_vm2, %v1842_v9 }
 0x62a   : > { %v1785_v37 = vadd.f32 %v1784_v52, %v1783_v57 }
 0x62c   : > { %5919 = vmatmul.mubr.msk.f32.gmra.mrb[12].mxu1 %vm560_vm2, %v1843_v16  ;;  %v1786_v26 = vrot.slane %v1785_v37, 2 }
 0x62d   : > { %5921 = vmatprep.mubr.msk.f32.mxu1 %vm560_vm2, %v1844_v56 }
 0x62e   : > { %v1787_v35 = vadd.f32 %v1786_v26, %v1785_v37 }
 0x630   : > { %5922 = vmatmul.mubr.msk.f32.gmra.mrb[14].mxu1 %vm560_vm2, %v1845_v54  ;;  %v1788_v17 = vrot.slane %v1787_v35, 1 }
 0x631   : > { %5924 = vmatprep.mubr.msk.f32.mxu1 %vm560_vm2, %v1846_v12  ;;  %v6193_v2 = vpop.eup %6192 }
 0x632   : > { %v1789_v61 = vadd.f32 %v1788_v17, %v1787_v35  ;;  %v1818_v11 = vmul.f32 %v6193_v2, %v7301_v63  ;;  %v1819_v38 = vmul.f32 %v6193_v2, %v7304_v8  ;;  %v1820_v51 = vmul.f32 %v6193_v2, %v7307_v33 }
 0x633   : > { %v1821_v27 = vmul.f32 %v6193_v2, %v7310_v4  ;;  %v1822_v43 = vmul.f32 %v6193_v2, %v7313_v6  ;;  %v1823_v19 = vmul.f32 %v6193_v2, %v7316_v39  ;;  %v1824_v23 = vmul.f32 %v6193_v2, %v7319_v32 }
 0x634   : > { %5925 = vmatmul.mubr.msk.f32.gmra.mrb[16].mxu1 %vm560_vm2, %v1847_v30  ;;  %v1825_v13 = vmul.f32 %v6193_v2, %v7322_v22  ;;  %v1850_v15 = vmax.f32 %v1818_v11, 0.0  ;;  %v1851_v63 = vmax.f32 %v1819_v38, 0.0  ;;  %v1793_v7 = vmul.f32 0.015625, %v1789_v61 }
 0x635   : > { %5927 = vmatprep.mubr.msk.f32.mxu1 %vm560_vm2, %v1848_v20  ;;  %v1852_v8 = vmax.f32 %v1820_v51, 0.0  ;;  %v1853_v4 = vmax.f32 %v1821_v27, 0.0  ;;  %v1854_v6 = vmax.f32 %v1822_v43, 0.0  ;;  %v1855_v39 = vmax.f32 %v1823_v19, 0.0 }
 0x636   : > { %v1797_v33 = vadd.f32 1e-05, %v1793_v7  ;;  %v1856_v32 = vmax.f32 %v1824_v23, 0.0  ;;  %v1857_v22 = vmax.f32 %v1825_v13, 0.0 }
 0x638   : > { %5928 = vmatmul.mubr.msk.f32.gmra.mrb[18].mxu1 %vm560_vm2, %v1849_v41  ;;  %6194 = vrsqrt.f32 %v1797_v33 }
 0x639   : > { %5930 = vmatprep.mubr.msk.f32.mxu1 %vm560_vm2, %v1850_v15 }
 0x63c   : > { %5931 = vmatmul.mubr.msk.f32.gmra.mrb[20].mxu1 %vm560_vm2, %v1851_v63 }
 0x63d   : > { %5933 = vmatprep.mubr.msk.f32.mxu1 %vm560_vm2, %v1852_v8 }
 0x640   : > { %5934 = vmatmul.mubr.msk.f32.gmra.mrb[22].mxu1 %vm560_vm2, %v1853_v4 }
 0x641   : > { %5936 = vmatprep.mubr.msk.f32.mxu1 %vm560_vm2, %v1854_v6 }
 0x642   : > { %v6195_v25 = vpop.eup %6194 }
 0x643   : > { %v1826_v47 = vmul.f32 %v6195_v25, %v7350_v53  ;;  %v1827_v42 = vmul.f32 %v6195_v25, %v7353_v5  ;;  %v1828_v46 = vmul.f32 %v6195_v25, %v7356_v29  ;;  %v1829_v40 = vmul.f32 %v6195_v25, %v7359_v62 }
 0x644   : > { %5937 = vmatmul.mubr.msk.f32.gmra.mrb[24].mxu1 %vm560_vm2, %v1855_v39  ;;  %v1830_v60 = vmul.f32 %v6195_v25, %v7362_v1  ;;  %v1831_v14 = vmul.f32 %v6195_v25, %v7365_v31  ;;  %v1832_v48 = vmul.f32 %v6195_v25, %v7368_v59  ;;  %v1833_v3 = vmul.f32 %v6195_v25, %v7371_v24 }
 0x645   : > { %5939 = vmatprep.mubr.msk.f32.mxu1 %vm560_vm2, %v1856_v32  ;;  %v1858_v36 = vmax.f32 %v1826_v47, 0.0  ;;  %v1859_v0 = vmax.f32 %v1827_v42, 0.0  ;;  %v1860_v18 = vmax.f32 %v1828_v46, 0.0  ;;  %v1861_v53 = vmax.f32 %v1829_v40, 0.0 }
 0x646   : > { %v1862_v5 = vmax.f32 %v1830_v60, 0.0  ;;  %v1863_v29 = vmax.f32 %v1831_v14, 0.0  ;;  %v1864_v62 = vmax.f32 %v1832_v48, 0.0  ;;  %v1865_v1 = vmax.f32 %v1833_v3, 0.0 }
 0x647   : > { %v9622_v31 = vmov 0.0  }
 0x648   : > { %5940 = vmatmul.mubr.msk.f32.gmra.mrb[26].mxu1 %vm560_vm2, %v1857_v22  ;;  %2508 = vst.msk [vmem:[#allocation2] sm:$0xff] %vm2195_vm9, %v9622_v31  ;;  %2511 = vst.msk [vmem:[#allocation2 + $0x10] sm:$0xff] %vm2195_vm9, %v9622_v31 }
 0x649   : > { %5942 = vmatprep.mubr.msk.f32.mxu1 %vm560_vm2, %v1858_v36  ;;  %2513 = vst.msk [vmem:[#allocation2 + $0x20] sm:$0xff] %vm2195_vm9, %v9622_v31  ;;  %2515 = vst.msk [vmem:[#allocation2 + $0x30] sm:$0xff] %vm2195_vm9, %v9622_v31 }
 0x64a   : > { %2517 = vst.msk [vmem:[#allocation2 + $0x40] sm:$0xff] %vm2195_vm9, %v9622_v31  ;;  %2519 = vst.msk [vmem:[#allocation2 + $0x50] sm:$0xff] %vm2195_vm9, %v9622_v31 }
 0x64b   : > { %2521 = vst.msk [vmem:[#allocation2 + $0x60] sm:$0xff] %vm2195_vm9, %v9622_v31  ;;  %2523 = vst.msk [vmem:[#allocation2 + $0x70] sm:$0xff] %vm2195_vm9, %v9622_v31 }
 0x64c   : > { %5943 = vmatmul.mubr.msk.f32.gmra.mrb[28].mxu1 %vm560_vm2, %v1859_v0  ;;  %2525 = vst.msk [vmem:[#allocation2 + $0x80] sm:$0xff] %vm2195_vm9, %v9622_v31  ;;  %2527 = vst.msk [vmem:[#allocation2 + $0x90] sm:$0xff] %vm2195_vm9, %v9622_v31 }
 0x64d   : > { %5945 = vmatprep.mubr.msk.f32.mxu1 %vm560_vm2, %v1860_v18  ;;  %2529 = vst.msk [vmem:[#allocation2 + $0xa0] sm:$0xff] %vm2195_vm9, %v9622_v31  ;;  %2531 = vst.msk [vmem:[#allocation2 + $0xb0] sm:$0xff] %vm2195_vm9, %v9622_v31 }
 0x64e   : > { %2533 = vst.msk [vmem:[#allocation2 + $0xc0] sm:$0xff] %vm2195_vm9, %v9622_v31  ;;  %2535 = vst.msk [vmem:[#allocation2 + $0xd0] sm:$0xff] %vm2195_vm9, %v9622_v31 }
 0x64f   : > { %2537 = vst.msk [vmem:[#allocation2 + $0xe0] sm:$0xff] %vm2195_vm9, %v9622_v31  ;;  %2539 = vst.msk [vmem:[#allocation2 + $0xf0] sm:$0xff] %vm2195_vm9, %v9622_v31  ;;  %v2640_v59 = vld [vmem:[#allocation2 + $0x10] sm:$0xff]  ;;  %v2638_v24 = vld [vmem:[#allocation2] sm:$0xff] }
 0x650   : > { %5946 = vmatmul.mubr.msk.f32.gmra.mrb[30].mxu1 %vm560_vm2, %v1861_v53  ;;  %2541 = vst.msk [vmem:[#allocation2 + $0x100] sm:$0xff] %vm2195_vm9, %v9622_v31  ;;  %2543 = vst.msk [vmem:[#allocation2 + $0x110] sm:$0xff] %vm2195_vm9, %v9622_v31  ;;  %v2802_v9 = vrot.slane %v2640_v59, 2  ;;  %v2799_v28 = vrot.slane %v2638_v24, 2  ;;  %v2895_v52 = vrot.slane %v2638_v24, 4  ;;  %v2898_v54 = vrot.slane %v2640_v59, 4 }
 0x651   : > { %5948 = vmatprep.mubr.msk.f32.mxu1 %vm560_vm2, %v1862_v5  ;;  %2545 = vst.msk [vmem:[#allocation2 + $0x120] sm:$0xff] %vm2195_vm9, %v9622_v31  ;;  %2547 = vst.msk [vmem:[#allocation2 + $0x130] sm:$0xff] %vm2195_vm9, %v9622_v31 }
 0x652   : > { %2549 = vst.msk [vmem:[#allocation2 + $0x140] sm:$0xff] %vm2195_vm9, %v9622_v31  ;;  %2551 = vst.msk [vmem:[#allocation2 + $0x150] sm:$0xff] %vm2195_vm9, %v9622_v31 }
 0x653   : > { %2553 = vst.msk [vmem:[#allocation2 + $0x160] sm:$0xff] %vm2195_vm9, %v9622_v31  ;;  %2555 = vst.msk [vmem:[#allocation2 + $0x170] sm:$0xff] %vm2195_vm9, %v9622_v31 }
 0x654   : > { %5949 = vmatmul.mubr.msk.f32.gmra.mrb[32].mxu1 %vm560_vm2, %v1863_v29  ;;  %2557 = vst.msk [vmem:[#allocation2 + $0x180] sm:$0xff] %vm2195_vm9, %v9622_v31  ;;  %2559 = vst.msk [vmem:[#allocation2 + $0x190] sm:$0xff] %vm2195_vm9, %v9622_v31  ;;  %v2658_v63 = vld [vmem:[#allocation2 + $0xa0] sm:$0xff]  ;;  %v2660_v39 = vld [vmem:[#allocation2 + $0xb0] sm:$0xff] }
 0x655   : > { %5951 = vmatprep.mubr.msk.f32.mxu1 %vm560_vm2, %v1864_v62  ;;  %2561 = vst.msk [vmem:[#allocation2 + $0x1a0] sm:$0xff] %vm2195_vm9, %v9622_v31  ;;  %2563 = vst.msk [vmem:[#allocation2 + $0x1b0] sm:$0xff] %vm2195_vm9, %v9622_v31  ;;  %v2662_v30 = vld [vmem:[#allocation2 + $0xc0] sm:$0xff]  ;;  %v2664_v38 = vld [vmem:[#allocation2 + $0xd0] sm:$0xff]  ;;  %v3071_v33 = vrot.slane %v2658_v63, 2  ;;  %v3095_v32 = vrot.slane %v2658_v63, 4 }
 0x656   : > { %2565 = vst.msk [vmem:[#allocation2 + $0x1c0] sm:$0xff] %vm2195_vm9, %v9622_v31  ;;  %2567 = vst.msk [vmem:[#allocation2 + $0x1d0] sm:$0xff] %vm2195_vm9, %v9622_v31  ;;  %v2823_v17 = vrot.slane %v2662_v30, 2  ;;  %v2919_v61 = vrot.slane %v2662_v30, 4  ;;  %v2826_v27 = vrot.slane %v2664_v38, 2  ;;  %v2922_v13 = vrot.slane %v2664_v38, 4 }
 0x657   : > { %2569 = vst.msk [vmem:[#allocation2 + $0x1e0] sm:$0xff] %vm2195_vm9, %v9622_v31  ;;  %2571 = vst.msk [vmem:[#allocation2 + $0x1f0] sm:$0xff] %vm2195_vm9, %v9622_v31  ;;  %v3074_v47 = vrot.slane %v2660_v39, 2  ;;  %v3098_v60 = vrot.slane %v2660_v39, 4 }
 0x658   : > { %5952 = vmatmul.mubr.msk.f32.gmra.mrb[34].mxu1 %vm560_vm2, %v1865_v1  ;;  %2573 = vst.msk [vmem:[#allocation2 + $0x200] sm:$0xff] %vm2195_vm9, %v9622_v31  ;;  %2575 = vst.msk [vmem:[#allocation2 + $0x210] sm:$0xff] %vm2195_vm9, %v9622_v31 }
 0x659   : > { %2577 = vst.msk [vmem:[#allocation2 + $0x220] sm:$0xff] %vm2195_vm9, %v9622_v31  ;;  %2579 = vst.msk [vmem:[#allocation2 + $0x230] sm:$0xff] %vm2195_vm9, %v9622_v31 }
 0x65a   : > { %2581 = vst.msk [vmem:[#allocation2 + $0x240] sm:$0xff] %vm2195_vm9, %v9622_v31  ;;  %2583 = vst.msk [vmem:[#allocation2 + $0x250] sm:$0xff] %vm2195_vm9, %v9622_v31 }
 0x65b   : > { %2585 = vst.msk [vmem:[#allocation2 + $0x260] sm:$0xff] %vm2195_vm9, %v9622_v31  ;;  %2587 = vst.msk [vmem:[#allocation2 + $0x270] sm:$0xff] %vm2195_vm9, %v9622_v31  ;;  %v2686_v48 = vld [vmem:[#allocation2 + $0x180] sm:$0xff]  ;;  %v2688_v62 = vld [vmem:[#allocation2 + $0x190] sm:$0xff] }
 0x65c   : > { %2589 = vst.msk [vmem:[#allocation2 + $0x280] sm:$0xff] %vm2195_vm9, %v9622_v31  ;;  %2591 = vst.msk [vmem:[#allocation2 + $0x290] sm:$0xff] %vm2195_vm9, %v9622_v31  ;;  %v2847_v36 = vrot.slane %v2686_v48, 2  ;;  %v2943_v5 = vrot.slane %v2686_v48, 4  ;;  %v2850_v59 = vrot.slane %v2688_v62, 2 }
 0x65d   : > { %2593 = vst.msk [vmem:[#allocation2 + $0x2a0] sm:$0xff] %vm2195_vm9, %v9622_v31  ;;  %2595 = vst.msk [vmem:[#allocation2 + $0x2b0] sm:$0xff] %vm2195_vm9, %v9622_v31 }
 0x65e   : > { %2597 = vst.msk [vmem:[#allocation2 + $0x2c0] sm:$0xff] %vm2195_vm9, %v9622_v31  ;;  %2599 = vst.msk [vmem:[#allocation2 + $0x2d0] sm:$0xff] %vm2195_vm9, %v9622_v31 }
 0x65f   : > { %2601 = vst.msk [vmem:[#allocation2 + $0x2e0] sm:$0xff] %vm2195_vm9, %v9622_v31  ;;  %2603 = vst.msk [vmem:[#allocation2 + $0x2f0] sm:$0xff] %vm2195_vm9, %v9622_v31 }
 0x660   : > { %2512 = vst.msk [vmem:[#allocation2 + $0x18] sm:$0xf] %vm2509_vm10, %v9622_v31  ;;  %2510 = vst.msk [vmem:[#allocation2 + $0x8] sm:$0xf] %vm2509_vm10, %v9622_v31 }
 0x661   : > { %2514 = vst.msk [vmem:[#allocation2 + $0x28] sm:$0xf] %vm2509_vm10, %v9622_v31  ;;  %2516 = vst.msk [vmem:[#allocation2 + $0x38] sm:$0xf] %vm2509_vm10, %v9622_v31 }
 0x662   : > { %2518 = vst.msk [vmem:[#allocation2 + $0x48] sm:$0xf] %vm2509_vm10, %v9622_v31  ;;  %2520 = vst.msk [vmem:[#allocation2 + $0x58] sm:$0xf] %vm2509_vm10, %v9622_v31 }
 0x663   : > { %2522 = vst.msk [vmem:[#allocation2 + $0x68] sm:$0xf] %vm2509_vm10, %v9622_v31  ;;  %2524 = vst.msk [vmem:[#allocation2 + $0x78] sm:$0xf] %vm2509_vm10, %v9622_v31 }
 0x664   : > { %2526 = vst.msk [vmem:[#allocation2 + $0x88] sm:$0xf] %vm2509_vm10, %v9622_v31  ;;  %2528 = vst.msk [vmem:[#allocation2 + $0x98] sm:$0xf] %vm2509_vm10, %v9622_v31 }
 0x665   : > { %2530 = vst.msk [vmem:[#allocation2 + $0xa8] sm:$0xf] %vm2509_vm10, %v9622_v31  ;;  %2532 = vst.msk [vmem:[#allocation2 + $0xb8] sm:$0xf] %vm2509_vm10, %v9622_v31 }
 0x666   : > { %2534 = vst.msk [vmem:[#allocation2 + $0xc8] sm:$0xf] %vm2509_vm10, %v9622_v31  ;;  %2536 = vst.msk [vmem:[#allocation2 + $0xd8] sm:$0xf] %vm2509_vm10, %v9622_v31 }
 0x667   : > { %2538 = vst.msk [vmem:[#allocation2 + $0xe8] sm:$0xf] %vm2509_vm10, %v9622_v31  ;;  %2540 = vst.msk [vmem:[#allocation2 + $0xf8] sm:$0xf] %vm2509_vm10, %v9622_v31  ;;  %v2641_v34 = vld [vmem:[#allocation2 + $0x18] sm:$0xf] }
 0x668   : > { %2542 = vst.msk [vmem:[#allocation2 + $0x108] sm:$0xf] %vm2509_vm10, %v9622_v31  ;;  %2544 = vst.msk [vmem:[#allocation2 + $0x118] sm:$0xf] %vm2509_vm10, %v9622_v31  ;;  %v2639_v58 = vld [vmem:[#allocation2 + $0x8] sm:$0xf] }
 0x669   : > { %2546 = vst.msk [vmem:[#allocation2 + $0x128] sm:$0xf] %vm2509_vm10, %v9622_v31  ;;  %2548 = vst.msk [vmem:[#allocation2 + $0x138] sm:$0xf] %vm2509_vm10, %v9622_v31  ;;  %v2803_v10 = vrot.slane %v2641_v34, 2  ;;  %v2800_v57 = vrot.slane %v2639_v58, 2 }
 0x66a   : > { %2550 = vst.msk [vmem:[#allocation2 + $0x148] sm:$0xf] %vm2509_vm10, %v9622_v31  ;;  %2552 = vst.msk [vmem:[#allocation2 + $0x158] sm:$0xf] %vm2509_vm10, %v9622_v31  ;;  %v2896_v37 = vrot.slane %v2639_v58, 4  ;;  %v2899_v12 = vrot.slane %v2641_v34, 4 }
 0x66b   : > { %2554 = vst.msk [vmem:[#allocation2 + $0x168] sm:$0xf] %vm2509_vm10, %v9622_v31  ;;  %2556 = vst.msk [vmem:[#allocation2 + $0x178] sm:$0xf] %vm2509_vm10, %v9622_v31  ;;  %v2804_v16 = vsel %vm2798_vm11, %v2802_v9, %v2803_v10  ;;  %v2801_v56 = vsel %vm2798_vm11, %v2799_v28, %v2800_v57  ;;  %v2946_v34 = vrot.slane %v2688_v62, 4  ;;  %v2682_v10 = vld [vmem:[#allocation2 + $0x160] sm:$0xff] }
 0x66c   : > { %2558 = vst.msk [vmem:[#allocation2 + $0x188] sm:$0xf] %vm2509_vm10, %v9622_v31  ;;  %2560 = vst.msk [vmem:[#allocation2 + $0x198] sm:$0xf] %vm2509_vm10, %v9622_v31  ;;  %3121 = vrot.lane.b32.xlu1 %v2804_v16, %s6239_s20  ;;  %3119 = vrot.lane.b32.xlu0 %v2801_v56, %s6239_s20  ;;  %v2897_v26 = vsel %vm295_vm1, %v2895_v52, %v2896_v37  ;;  %v2900_v35 = vsel %vm295_vm1, %v2898_v54, %v2899_v12  ;;  %v2659_v8 = vld [vmem:[#allocation2 + $0xa8] sm:$0xf] }
 0x66d   : > { %2562 = vst.msk [vmem:[#allocation2 + $0x1a8] sm:$0xf] %vm2509_vm10, %v9622_v31  ;;  %2564 = vst.msk [vmem:[#allocation2 + $0x1b8] sm:$0xf] %vm2509_vm10, %v9622_v31  ;;  %v2663_v20 = vld [vmem:[#allocation2 + $0xc8] sm:$0xf] }
 0x66e   : > { %2566 = vst.msk [vmem:[#allocation2 + $0x1c8] sm:$0xf] %vm2509_vm10, %v9622_v31  ;;  %2568 = vst.msk [vmem:[#allocation2 + $0x1d8] sm:$0xf] %vm2509_vm10, %v9622_v31  ;;  %v2824_v2 = vrot.slane %v2663_v20, 2  ;;  %v2920_v11 = vrot.slane %v2663_v20, 4 }
 0x66f   : > { %2570 = vst.msk [vmem:[#allocation2 + $0x1e8] sm:$0xf] %vm2509_vm10, %v9622_v31  ;;  %2572 = vst.msk [vmem:[#allocation2 + $0x1f8] sm:$0xf] %vm2509_vm10, %v9622_v31  ;;  %v2665_v51 = vld [vmem:[#allocation2 + $0xd8] sm:$0xf] }
 0x670   : > { %2574 = vst.msk [vmem:[#allocation2 + $0x208] sm:$0xf] %vm2509_vm10, %v9622_v31  ;;  %2576 = vst.msk [vmem:[#allocation2 + $0x218] sm:$0xf] %vm2509_vm10, %v9622_v31  ;;  %3215 = vrot.lane.b32.xlu1 %v2897_v26, %s6240_s21  ;;  %3217 = vrot.lane.b32.xlu0 %v2900_v35, %s6240_s21  ;;  %v2825_v41 = vsel %vm2798_vm11, %v2823_v17, %v2824_v2  ;;  %v2827_v43 = vrot.slane %v2665_v51, 2  ;;  %v2921_v19 = vsel %vm295_vm1, %v2919_v61, %v2920_v11  ;;  %v2684_v54 = vld [vmem:[#allocation2 + $0x170] sm:$0xff] }
 0x671   : > { %2578 = vst.msk [vmem:[#allocation2 + $0x228] sm:$0xf] %vm2509_vm10, %v9622_v31  ;;  %2580 = vst.msk [vmem:[#allocation2 + $0x238] sm:$0xf] %vm2509_vm10, %v9622_v31  ;;  %v2923_v15 = vrot.slane %v2665_v51, 4  ;;  %v3072_v4 = vrot.slane %v2659_v8, 2 }
 0x672   : > { %2582 = vst.msk [vmem:[#allocation2 + $0x248] sm:$0xf] %vm2509_vm10, %v9622_v31  ;;  %2584 = vst.msk [vmem:[#allocation2 + $0x258] sm:$0xf] %vm2509_vm10, %v9622_v31  ;;  %v2828_v23 = vsel %vm2798_vm11, %v2826_v27, %v2827_v43  ;;  %v3096_v22 = vrot.slane %v2659_v8, 4  ;;  %v3077_v56 = vrot.slane %v2682_v10, 2 }
 0x673   : > { %2586 = vst.msk [vmem:[#allocation2 + $0x268] sm:$0xf] %vm2509_vm10, %v9622_v31  ;;  %2588 = vst.msk [vmem:[#allocation2 + $0x278] sm:$0xf] %vm2509_vm10, %v9622_v31  ;;  %v2924_v7 = vsel %vm295_vm1, %v2922_v13, %v2923_v15  ;;  %v3073_v6 = vsel %vm2798_vm11, %v3071_v33, %v3072_v4  ;;  %v2661_v25 = vld [vmem:[#allocation2 + $0xb8] sm:$0xf] }
 0x674   : > { %2590 = vst.msk [vmem:[#allocation2 + $0x288] sm:$0xf] %vm2509_vm10, %v9622_v31  ;;  %2592 = vst.msk [vmem:[#allocation2 + $0x298] sm:$0xf] %vm2509_vm10, %v9622_v31  ;;  %3135 = vrot.lane.b32.xlu1 %v2825_v41, %s6239_s20  ;;  %3231 = vrot.lane.b32.xlu0 %v2921_v19, %s6240_s21  ;;  %v3075_v42 = vrot.slane %v2661_v25, 2  ;;  %v3097_v46 = vsel %vm295_vm1, %v3095_v32, %v3096_v22  ;;  %v3099_v14 = vrot.slane %v2661_v25, 4 }
 0x675   : > { %2594 = vst.msk [vmem:[#allocation2 + $0x2a8] sm:$0xf] %vm2509_vm10, %v9622_v31  ;;  %2596 = vst.msk [vmem:[#allocation2 + $0x2b8] sm:$0xf] %vm2509_vm10, %v9622_v31  ;;  %v2687_v3 = vld [vmem:[#allocation2 + $0x188] sm:$0xf] }
 0x676   : > { %2598 = vst.msk [vmem:[#allocation2 + $0x2c8] sm:$0xf] %vm2509_vm10, %v9622_v31  ;;  %2600 = vst.msk [vmem:[#allocation2 + $0x2d8] sm:$0xf] %vm2509_vm10, %v9622_v31  ;;  %v3076_v40 = vsel %vm2798_vm11, %v3074_v47, %v3075_v42  ;;  %v2848_v0 = vrot.slane %v2687_v3, 2  ;;  %v3100_v18 = vsel %vm295_vm1, %v3098_v60, %v3099_v14  ;;  %v2944_v29 = vrot.slane %v2687_v3, 4 }
 0x677   : > { %2602 = vst.msk [vmem:[#allocation2 + $0x2e8] sm:$0xf] %vm2509_vm10, %v9622_v31  ;;  %2604 = vst.msk [vmem:[#allocation2 + $0x2f8] sm:$0xf] %vm2509_vm10, %v9622_v31  ;;  %v2689_v1 = vld [vmem:[#allocation2 + $0x198] sm:$0xf] }
 0x678   : > { %3137 = vrot.lane.b32.xlu1 %v2828_v23, %s6239_s20  ;;  %3611 = vrot.lane.b32.xlu0 %v2658_v63, %s6241_s22  ;;  %v2849_v53 = vsel %vm2798_vm11, %v2847_v36, %v2848_v0  ;;  %v2851_v24 = vrot.slane %v2689_v1, 2  ;;  %v2945_v9 = vsel %vm295_vm1, %v2943_v5, %v2944_v29  ;;  %v2947_v58 = vrot.slane %v2689_v1, 4  ;;  %v2683_v16 = vld [vmem:[#allocation2 + $0x168] sm:$0xf]  ;;  %v2685_v35 = vld [vmem:[#allocation2 + $0x178] sm:$0xf] }
 0x679   : > { %v3078_v52 = vrot.slane %v2683_v16, 2  ;;  %v3101_v12 = vrot.slane %v2682_v10, 4  ;;  %v3102_v26 = vrot.slane %v2683_v16, 4  ;;  %v3080_v30 = vrot.slane %v2684_v54, 2  ;;  %v2710_v11 = vld [vmem:[#allocation2 + $0x240] sm:$0xff]  ;;  %v2712_v15 = vld [vmem:[#allocation2 + $0x250] sm:$0xff] }
 0x67a   : > { %v2852_v28 = vsel %vm2798_vm11, %v2850_v59, %v2851_v24  ;;  %v2948_v57 = vsel %vm295_vm1, %v2946_v34, %v2947_v58  ;;  %v3081_v20 = vrot.slane %v2685_v35, 2  ;;  %v3104_v41 = vrot.slane %v2684_v54, 4  ;;  %v2711_v38 = vld [vmem:[#allocation2 + $0x248] sm:$0xf]  ;;  %v2713_v63 = vld [vmem:[#allocation2 + $0x258] sm:$0xf] }
 0x67b   : > { %v3079_v37 = vsel %vm2798_vm11, %v3077_v56, %v3078_v52  ;;  %v3103_v17 = vsel %vm295_vm1, %v3101_v12, %v3102_v26  ;;  %v3105_v61 = vrot.slane %v2685_v35, 4  ;;  %v2871_v51 = vrot.slane %v2710_v11, 2  ;;  %v2706_v32 = vld [vmem:[#allocation2 + $0x220] sm:$0xff]  ;;  %v2707_v25 = vld [vmem:[#allocation2 + $0x228] sm:$0xf]  ;;  %v2708_v14 = vld [vmem:[#allocation2 + $0x230] sm:$0xff] }
 0x67c   : > { %3233 = vrot.lane.b32.xlu1 %v2924_v7, %s6240_s21  ;;  %3707 = vrot.lane.b32.xlu0 %v3073_v6, %s6242_s23  ;;  %v3082_v2 = vsel %vm2798_vm11, %v3080_v30, %v3081_v20  ;;  %v2872_v27 = vrot.slane %v2711_v38, 2  ;;  %v2967_v23 = vrot.slane %v2710_v11, 4  ;;  %v2968_v13 = vrot.slane %v2711_v38, 4  ;;  %v2709_v3 = vld [vmem:[#allocation2 + $0x238] sm:$0xf]  ;;  %v2730_v24 = vld [vmem:[#allocation2 + $0x2e0] sm:$0xff] }
 0x67d   : > { %v3106_v43 = vsel %vm295_vm1, %v3104_v41, %v3105_v61  ;;  %v2874_v7 = vrot.slane %v2712_v15, 2  ;;  %v2875_v8 = vrot.slane %v2713_v63, 2  ;;  %v2970_v6 = vrot.slane %v2712_v15, 4 }
 0x67e   : > { %v2873_v19 = vsel %vm2798_vm11, %v2871_v51, %v2872_v27  ;;  %v2969_v33 = vsel %vm295_vm1, %v2967_v23, %v2968_v13  ;;  %v3083_v47 = vrot.slane %v2706_v32, 2  ;;  %v3084_v42 = vrot.slane %v2707_v25, 2  ;;  %v2731_v34 = vld [vmem:[#allocation2 + $0x2e8] sm:$0xf]  ;;  %v2733_v58 = vld [vmem:[#allocation2 + $0x2f8] sm:$0xf] }
 0x67f   : > { %v2876_v4 = vsel %vm2798_vm11, %v2874_v7, %v2875_v8  ;;  %v3108_v60 = vrot.slane %v2707_v25, 4  ;;  %v3086_v36 = vrot.slane %v2708_v14, 2  ;;  %v3110_v0 = vrot.slane %v2708_v14, 4 }
 0x680   : > { %3613 = vrot.lane.b32.xlu1 %v2660_v39, %s6241_s22  ;;  %3803 = vrot.lane.b32.xlu0 %v3097_v46, %s6243_s24  ;;  %v2971_v39 = vrot.slane %v2713_v63, 4  ;;  %v3085_v46 = vsel %vm2798_vm11, %v3083_v47, %v3084_v42  ;;  %v3090_v56 = vrot.slane %v2731_v34, 2 }
 0x682   : > { %v2972_v22 = vsel %vm295_vm1, %v2970_v6, %v2971_v39 }
 0x684   : > { %3709 = vrot.lane.b32.xlu1 %v3076_v40, %s6242_s23  ;;  %3805 = vrot.lane.b32.xlu0 %v3100_v18, %s6243_s24  ;;  %v3107_v40 = vrot.slane %v2706_v32, 4  ;;  %v3087_v18 = vrot.slane %v2709_v3, 2 }
 0x686   : > { %v3109_v48 = vsel %vm295_vm1, %v3107_v40, %v3108_v60  ;;  %v3088_v5 = vsel %vm2798_vm11, %v3086_v36, %v3087_v18 }
 0x688   : > { %3151 = vrot.lane.b32.xlu1 %v2849_v53, %s6239_s20  ;;  %3247 = vrot.lane.b32.xlu0 %v2945_v9, %s6240_s21  ;;  %v3111_v53 = vrot.slane %v2709_v3, 4  ;;  %v2732_v9 = vld [vmem:[#allocation2 + $0x2f0] sm:$0xff] }
 0x689   : > { %v3092_v16 = vrot.slane %v2732_v9, 2 }
 0x68a   : > { %v3112_v29 = vsel %vm295_vm1, %v3110_v0, %v3111_v53 }
 0x68c   : > { %3153 = vrot.lane.b32.xlu1 %v2852_v28, %s6239_s20  ;;  %3627 = vrot.lane.b32.xlu0 %v2682_v10, %s6241_s22 }
 0x690   : > { %3249 = vrot.lane.b32.xlu1 %v2948_v57, %s6240_s21  ;;  %3723 = vrot.lane.b32.xlu0 %v3079_v37, %s6242_s23  ;;  %v3089_v57 = vrot.slane %v2730_v24, 2  ;;  %v3093_v37 = vrot.slane %v2733_v58, 2 }
 0x692   : > { %v3091_v12 = vsel %vm2798_vm11, %v3089_v57, %v3090_v56  ;;  %v3094_v35 = vsel %vm2798_vm11, %v3092_v16, %v3093_v37 }
 0x694   : > { %3629 = vrot.lane.b32.xlu1 %v2684_v54, %s6241_s22  ;;  %3819 = vrot.lane.b32.xlu0 %v3103_v17, %s6243_s24 }
 0x698   : > { %3725 = vrot.lane.b32.xlu1 %v3082_v2, %s6242_s23  ;;  %3821 = vrot.lane.b32.xlu0 %v3106_v43, %s6243_s24 }
 0x69c   : > { %3167 = vrot.lane.b32.xlu1 %v2873_v19, %s6239_s20  ;;  %3263 = vrot.lane.b32.xlu0 %v2969_v33, %s6240_s21 }
 0x6a0   : > { %3169 = vrot.lane.b32.xlu1 %v2876_v4, %s6239_s20  ;;  %3643 = vrot.lane.b32.xlu0 %v2706_v32, %s6241_s22 }
 0x6a4   : > { %3265 = vrot.lane.b32.xlu1 %v2972_v22, %s6240_s21  ;;  %3739 = vrot.lane.b32.xlu0 %v3085_v46, %s6242_s23 }
 0x6a8   : > { %3645 = vrot.lane.b32.xlu1 %v2708_v14, %s6241_s22  ;;  %3835 = vrot.lane.b32.xlu0 %v3109_v48, %s6243_s24 }
 0x6ac   : > { %3741 = vrot.lane.b32.xlu1 %v3088_v5, %s6242_s23  ;;  %3837 = vrot.lane.b32.xlu0 %v3112_v29, %s6243_s24 }
 0x6b0   : > { %3659 = vrot.lane.b32.xlu1 %v2730_v24, %s6241_s22  ;;  %3661 = vrot.lane.b32.xlu0 %v2732_v9, %s6241_s22 }
 0x6b4   : > { %3755 = vrot.lane.b32.xlu1 %v3091_v12, %s6242_s23  ;;  %3757 = vrot.lane.b32.xlu0 %v3094_v35, %s6242_s23 }
 0x6ef   : > { %v7717_v62 = vpop.f32.mrb[4].mxu1 }
 0x6f0   : > { %v2197_v1 = vsel %vm2195_vm9, %v7717_v62, 0.0  ;;  %v7721_v59 = vpop.f32.mrb[5].mxu1 }
 0x6f1   : > { %v2196_v28 = vsel %vm2195_vm9, %v7721_v59, 0.0 }
 0x6f2   : > { %v2198_v10 = vadd.f32 %v2197_v1, %v2196_v28 }
 0x6f3   : > { %v5911_v52 = vpop.f32.mrb[6].mxu1 }
 0x6f4   : > { %v2046_v54 = vpop.f32.mrb[7].mxu1  ;;  %v2201_v20 = vsel %vm2195_vm9, %v5911_v52, 0.0 }
 0x6f5   : > { %v2199_v26 = vsel %vm2195_vm9, %v2046_v54, 0.0 }
 0x6f6   : > { %v2200_v30 = vadd.f32 %v2199_v26, %v2198_v10 }
 0x6f7   : > { %v5914_v17 = vpop.f32.mrb[8].mxu1 }
 0x6f8   : > { %v2056_v2 = vpop.f32.mrb[9].mxu1  ;;  %v2202_v41 = vadd.f32 %v2201_v20, %v2200_v30  ;;  %v2205_v38 = vsel %vm2195_vm9, %v5914_v17, 0.0 }
 0x6f9   : > { %v2203_v61 = vsel %vm2195_vm9, %v2056_v2, 0.0 }
 0x6fa   : > { %v2204_v11 = vadd.f32 %v2203_v61, %v2202_v41 }
 0x6fb   : > { %v5917_v51 = vpop.f32.mrb[10].mxu1 }
 0x6fc   : > { %v2066_v27 = vpop.f32.mrb[11].mxu1  ;;  %v2206_v43 = vadd.f32 %v2205_v38, %v2204_v11  ;;  %v2209_v13 = vsel %vm2195_vm9, %v5917_v51, 0.0 }
 0x6fd   : > { %v2207_v19 = vsel %vm2195_vm9, %v2066_v27, 0.0 }
 0x6fe   : > { %v2208_v23 = vadd.f32 %v2207_v19, %v2206_v43 }
 0x6ff   : > { %v7737_v15 = vpop.f32.mrb[12].mxu1 }
 0x700   : > { %v2210_v63 = vadd.f32 %v2209_v13, %v2208_v23  ;;  %v2218_v7 = vsel %vm2195_vm9, %v7737_v15, 0.0  ;;  %v7741_v8 = vpop.f32.mrb[13].mxu1 }
 0x701   : > { %v2217_v33 = vsel %vm2195_vm9, %v7741_v8, 0.0 }
 0x702   : > { %v2211_v4 = vrot.slane %v2210_v63, 4  ;;  %v2219_v6 = vadd.f32 %v2218_v7, %v2217_v33 }
 0x703   : > { %v7745_v39 = vpop.f32.mrb[14].mxu1 }
 0x704   : > { %v2212_v32 = vadd.f32 %v2211_v4, %v2210_v63  ;;  %v7747_v22 = vpop.f32.mrb[15].mxu1  ;;  %v2222_v46 = vsel %vm2195_vm9, %v7745_v39, 0.0 }
 0x705   : > { %v2220_v25 = vsel %vm2195_vm9, %v7747_v22, 0.0 }
 0x706   : > { %v2213_v47 = vrot.slane %v2212_v32, 2  ;;  %v2221_v42 = vadd.f32 %v2220_v25, %v2219_v6 }
 0x707   : > { %v7753_v40 = vpop.f32.mrb[16].mxu1 }
 0x708   : > { %v2214_v60 = vadd.f32 %v2213_v47, %v2212_v32  ;;  %v7755_v14 = vpop.f32.mrb[17].mxu1  ;;  %v2223_v48 = vadd.f32 %v2222_v46, %v2221_v42  ;;  %v2226_v18 = vsel %vm2195_vm9, %v7753_v40, 0.0 }
 0x709   : > { %v2224_v3 = vsel %vm2195_vm9, %v7755_v14, 0.0 }
 0x70a   : > { %v2215_v36 = vrot.slane %v2214_v60, 1  ;;  %v2225_v0 = vadd.f32 %v2224_v3, %v2223_v48 }
 0x70b   : > { %v7761_v53 = vpop.f32.mrb[18].mxu1 }
 0x70c   : > { %v2216_v5 = vadd.f32 %v2215_v36, %v2214_v60  ;;  %v7763_v29 = vpop.f32.mrb[19].mxu1  ;;  %v2227_v1 = vadd.f32 %v2226_v18, %v2225_v0  ;;  %v2230_v11 = vsel %vm2195_vm9, %v7761_v53, 0.0 }
 0x70d   : > { %v2228_v24 = vsel %vm2195_vm9, %v7763_v29, 0.0 }
 0x70e   : > { %v2280_v9 = vmul.f32 0.015625, %v2216_v5  ;;  %v2229_v28 = vadd.f32 %v2228_v24, %v2227_v1 }
 0x70f   : > { %v7767_v34 = vpop.f32.mrb[20].mxu1 }
 0x710   : > { %v7770_v58 = vsub.f32 %v7721_v59, %v2280_v9  ;;  %v7773_v10 = vsub.f32 %v7717_v62, %v2280_v9  ;;  %v7775_v57 = vsub.f32 %v2046_v54, %v2280_v9  ;;  %v7777_v16 = vsub.f32 %v5911_v52, %v2280_v9  ;;  %v7779_v56 = vpop.f32.mrb[21].mxu1 }
 0x711   : > { %v7781_v37 = vsub.f32 %v2056_v2, %v2280_v9  ;;  %v7783_v12 = vsub.f32 %v5914_v17, %v2280_v9  ;;  %v7785_v26 = vsub.f32 %v2066_v27, %v2280_v9  ;;  %v7787_v35 = vsub.f32 %v5917_v51, %v2280_v9 }
 0x712   : > { %v2316_v59 = vmul.f32 %v7770_v58, %v7770_v58  ;;  %v2317_v62 = vmul.f32 %v7773_v10, %v7773_v10  ;;  %v2318_v52 = vmul.f32 %v7775_v57, %v7775_v57  ;;  %v2319_v30 = vmul.f32 %v7777_v16, %v7777_v16 }
 0x713   : > { %v7795_v54 = vpop.f32.mrb[22].mxu1  ;;  %v2320_v41 = vmul.f32 %v7781_v37, %v7781_v37  ;;  %v2231_v51 = vadd.f32 %v2230_v11, %v2229_v28  ;;  %v2239_v27 = vsel %vm2195_vm9, %v7767_v34, 0.0  ;;  %v2238_v43 = vsel %vm2195_vm9, %v7779_v56, 0.0 }
 0x714   : > { %v2348_v20 = vsel %vm2195_vm9, %v2316_v59, 0.0  ;;  %v2349_v17 = vsel %vm2195_vm9, %v2317_v62, 0.0  ;;  %v7801_v2 = vpop.f32.mrb[23].mxu1  ;;  %v2351_v38 = vsel %vm2195_vm9, %v2318_v52, 0.0  ;;  %v2240_v23 = vadd.f32 %v2239_v27, %v2238_v43 }
 0x715   : > { %v2350_v61 = vadd.f32 %v2349_v17, %v2348_v20  ;;  %v2241_v13 = vsel %vm2195_vm9, %v7801_v2, 0.0  ;;  %v2321_v7 = vmul.f32 %v7783_v12, %v7783_v12  ;;  %v2353_v33 = vsel %vm2195_vm9, %v2319_v30, 0.0 }
 0x716   : > { %v2232_v4 = vrot.slane %v2231_v51, 4  ;;  %v2322_v32 = vmul.f32 %v7785_v26, %v7785_v26  ;;  %v2242_v47 = vadd.f32 %v2241_v13, %v2240_v23  ;;  %v2355_v42 = vsel %vm2195_vm9, %v2320_v41, 0.0 }
 0x717   : > { %v2352_v19 = vadd.f32 %v2351_v38, %v2350_v61  ;;  %v7814_v63 = vpop.f32.mrb[24].mxu1  ;;  %v2243_v60 = vsel %vm2195_vm9, %v7795_v54, 0.0  ;;  %v2323_v18 = vmul.f32 %v7787_v35, %v7787_v35  ;;  %v2357_v5 = vsel %vm2195_vm9, %v2321_v7, 0.0 }
 0x718   : > { %v7819_v6 = vpop.f32.mrb[25].mxu1  ;;  %v2233_v46 = vadd.f32 %v2232_v4, %v2231_v51  ;;  %v2244_v36 = vadd.f32 %v2243_v60, %v2242_v47  ;;  %v2359_v59 = vsel %vm2195_vm9, %v2322_v32, 0.0  ;;  %v2247_v52 = vsel %vm2195_vm9, %v7814_v63, 0.0 }
 0x719   : > { %v2354_v25 = vadd.f32 %v2353_v33, %v2352_v19  ;;  %v2245_v48 = vsel %vm2195_vm9, %v7819_v6, 0.0  ;;  %v2361_v41 = vsel %vm2195_vm9, %v2323_v18, 0.0 }
 0x71a   : > { %v2234_v1 = vrot.slane %v2233_v46, 2  ;;  %v2246_v28 = vadd.f32 %v2245_v48, %v2244_v36 }
 0x71b   : > { %v2356_v3 = vadd.f32 %v2355_v42, %v2354_v25  ;;  %v7828_v0 = vpop.f32.mrb[26].mxu1 }
 0x71c   : > { %v7833_v24 = vpop.f32.mrb[27].mxu1  ;;  %v2235_v62 = vadd.f32 %v2234_v1, %v2233_v46  ;;  %v2248_v17 = vadd.f32 %v2247_v52, %v2246_v28  ;;  %v2251_v43 = vsel %vm2195_vm9, %v7828_v0, 0.0 }
 0x71d   : > { %v2358_v9 = vadd.f32 %v2357_v5, %v2356_v3  ;;  %v2249_v30 = vsel %vm2195_vm9, %v7833_v24, 0.0 }
 0x71e   : > { %v2236_v61 = vrot.slane %v2235_v62, 1  ;;  %v2250_v38 = vadd.f32 %v2249_v30, %v2248_v17 }
 0x71f   : > { %v2360_v20 = vadd.f32 %v2359_v59, %v2358_v9  ;;  %v7841_v51 = vpop.f32.mrb[28].mxu1 }
 0x720   : > { %v2237_v27 = vadd.f32 %v2236_v61, %v2235_v62  ;;  %v2260_v19 = vsel %vm2195_vm9, %v7841_v51, 0.0  ;;  %v7847_v23 = vpop.f32.mrb[29].mxu1  ;;  %v2252_v7 = vadd.f32 %v2251_v43, %v2250_v38 }
 0x721   : > { %v2362_v11 = vadd.f32 %v2361_v41, %v2360_v20  ;;  %v2259_v33 = vsel %vm2195_vm9, %v7847_v23, 0.0 }
 0x722   : > { %v2281_v4 = vmul.f32 0.015625, %v2237_v27  ;;  %v2261_v32 = vadd.f32 %v2260_v19, %v2259_v33  ;;  %v2253_v9 = vrot.slane %v2252_v7, 4 }
 0x723   : > { %v2363_v13 = vrot.slane %v2362_v11, 4  ;;  %v7851_v47 = vpop.f32.mrb[30].mxu1 }
 0x724   : > { %v7854_v42 = vsub.f32 %v7741_v8, %v2281_v4  ;;  %v7857_v46 = vsub.f32 %v7737_v15, %v2281_v4  ;;  %v7860_v60 = vsub.f32 %v7747_v22, %v2281_v4  ;;  %v7863_v48 = vsub.f32 %v7745_v39, %v2281_v4  ;;  %v7865_v3 = vpop.f32.mrb[31].mxu1 }
 0x725   : > { %v2364_v25 = vadd.f32 %v2363_v13, %v2362_v11  ;;  %v7868_v18 = vsub.f32 %v7755_v14, %v2281_v4  ;;  %v7871_v5 = vsub.f32 %v7753_v40, %v2281_v4  ;;  %v7874_v8 = vsub.f32 %v7763_v29, %v2281_v4 }
 0x726   : > { %v7877_v15 = vsub.f32 %v7761_v53, %v2281_v4  ;;  %v2324_v22 = vmul.f32 %v7854_v42, %v7854_v42  ;;  %v2325_v39 = vmul.f32 %v7857_v46, %v7857_v46  ;;  %v2326_v1 = vmul.f32 %v7860_v60, %v7860_v60 }
 0x727   : > { %v2365_v36 = vrot.slane %v2364_v25, 2  ;;  %v7885_v28 = vpop.f32.mrb[32].mxu1  ;;  %v2327_v40 = vmul.f32 %v7863_v48, %v7863_v48  ;;  %v2328_v30 = vmul.f32 %v7868_v18, %v7868_v18  ;;  %v2254_v61 = vadd.f32 %v2253_v9, %v2252_v7 }
 0x728   : > { %v2369_v29 = vsel %vm2195_vm9, %v2324_v22, 0.0  ;;  %v2370_v53 = vsel %vm2195_vm9, %v2325_v39, 0.0  ;;  %v7891_v59 = vpop.f32.mrb[33].mxu1  ;;  %v2372_v20 = vsel %vm2195_vm9, %v2326_v1, 0.0  ;;  %v2329_v38 = vmul.f32 %v7871_v5, %v7871_v5 }
 0x729   : > { %v2366_v14 = vadd.f32 %v2365_v36, %v2364_v25  ;;  %v2371_v52 = vadd.f32 %v2370_v53, %v2369_v29  ;;  %v2374_v27 = vsel %vm2195_vm9, %v2327_v40, 0.0  ;;  %v2262_v43 = vsel %vm2195_vm9, %v7865_v3, 0.0 }
 0x72a   : > { %v2255_v4 = vrot.slane %v2254_v61, 2  ;;  %v2263_v25 = vadd.f32 %v2262_v43, %v2261_v32  ;;  %v2330_v36 = vmul.f32 %v7874_v8, %v7874_v8  ;;  %v2376_v7 = vsel %vm2195_vm9, %v2328_v30, 0.0 }
 0x72b   : > { %v2367_v62 = vrot.slane %v2366_v14, 1  ;;  %v2373_v41 = vadd.f32 %v2372_v20, %v2371_v52  ;;  %v7896_v11 = vpop.f32.mrb[34].mxu1  ;;  %v2264_v22 = vsel %vm2195_vm9, %v7851_v47, 0.0  ;;  %v2266_v39 = vsel %vm2195_vm9, %v7891_v59, 0.0 }
 0x72c   : > { %v7903_v19 = vpop.f32.mrb[35].mxu1  ;;  %v2256_v9 = vadd.f32 %v2255_v4, %v2254_v61  ;;  %v2265_v40 = vadd.f32 %v2264_v22, %v2263_v25  ;;  %v2331_v29 = vmul.f32 %v7877_v15, %v7877_v15  ;;  %v2378_v32 = vsel %vm2195_vm9, %v2329_v38, 0.0 }
 0x72d   : > { %v2368_v17 = vadd.f32 %v2367_v62, %v2366_v14  ;;  %v2375_v33 = vadd.f32 %v2374_v27, %v2373_v41  ;;  %v2380_v30 = vsel %vm2195_vm9, %v2330_v36, 0.0  ;;  %v2268_v20 = vsel %vm2195_vm9, %v7885_v28, 0.0 }
 0x72e   : > { %v2257_v62 = vrot.slane %v2256_v9, 1  ;;  %v2267_v52 = vadd.f32 %v2266_v39, %v2265_v40  ;;  %v2382_v43 = vsel %vm2195_vm9, %v2331_v29, 0.0 }
 0x72f   : > { %v2432_v13 = vmul.f32 0.015625, %v2368_v17  ;;  %v2377_v14 = vadd.f32 %v2376_v7, %v2375_v33  ;;  %v2270_v17 = vsel %vm2195_vm9, %v7903_v19, 0.0 }
 0x730   : > { %v2258_v61 = vadd.f32 %v2257_v62, %v2256_v9  ;;  %v2269_v27 = vadd.f32 %v2268_v20, %v2267_v52 }
 0x731   : > { %v2436_v1 = vadd.f32 1e-05, %v2432_v13  ;;  %v2379_v53 = vadd.f32 %v2378_v32, %v2377_v14 }
 0x732   : > { %v2282_v33 = vmul.f32 0.015625, %v2258_v61  ;;  %v2271_v38 = vadd.f32 %v2270_v17, %v2269_v27 }
 0x733   : > { %6196 = vrsqrt.f32 %v2436_v1  ;;  %v2381_v41 = vadd.f32 %v2380_v30, %v2379_v53 }
 0x734   : > { %v7922_v25 = vsub.f32 %v7779_v56, %v2282_v33  ;;  %v7925_v36 = vsub.f32 %v7767_v34, %v2282_v33  ;;  %v7928_v7 = vsub.f32 %v7801_v2, %v2282_v33  ;;  %v7931_v22 = vsub.f32 %v7795_v54, %v2282_v33 }
 0x735   : > { %v2383_v13 = vadd.f32 %v2382_v43, %v2381_v41  ;;  %v7934_v39 = vsub.f32 %v7819_v6, %v2282_v33  ;;  %v7937_v1 = vsub.f32 %v7814_v63, %v2282_v33  ;;  %v7940_v14 = vsub.f32 %v7833_v24, %v2282_v33 }
 0x736   : > { %v7943_v9 = vsub.f32 %v7828_v0, %v2282_v33  ;;  %v2332_v34 = vmul.f32 %v7922_v25, %v7922_v25  ;;  %v2333_v54 = vmul.f32 %v7925_v36, %v7925_v36  ;;  %v2334_v6 = vmul.f32 %v7928_v7, %v7928_v7 }
 0x737   : > { %v2384_v4 = vrot.slane %v2383_v13, 4 }
 0x738   : > { %v2390_v63 = vsel %vm2195_vm9, %v2332_v34, 0.0  ;;  %v2393_v33 = vsel %vm2195_vm9, %v2334_v6, 0.0 }
 0x739   : > { %v2385_v56 = vadd.f32 %v2384_v4, %v2383_v13  ;;  %v2336_v13 = vmul.f32 %v7934_v39, %v7934_v39 }
 0x73b   : > { %v2386_v40 = vrot.slane %v2385_v56, 2 }
 0x73d   : > { %v6197_v2 = vpop.eup %6196 }
 0x73e   : > { %v2444_v24 = vmul.f32 %v6197_v2, %v7770_v58  ;;  %v2445_v29 = vmul.f32 %v6197_v2, %v7773_v10  ;;  %v2446_v0 = vmul.f32 %v6197_v2, %v7775_v57  ;;  %v2447_v32 = vmul.f32 %v6197_v2, %v7777_v16 }
 0x73f   : > { %v2448_v53 = vmul.f32 %v6197_v2, %v7781_v37  ;;  %v2449_v62 = vmul.f32 %v6197_v2, %v7783_v12  ;;  %v2450_v52 = vmul.f32 %v6197_v2, %v7785_v26  ;;  %v2451_v30 = vmul.f32 %v6197_v2, %v7787_v35 }
 0x740   : > { %v2476_v20 = vmax.f32 %v2444_v24, 0.0  ;;  %v2477_v17 = vmax.f32 %v2445_v29, 0.0  ;;  %v2478_v41 = vmax.f32 %v2446_v0, 0.0  ;;  %v2479_v61 = vmax.f32 %v2447_v32, 0.0 }
 0x741   : > { %v2480_v27 = vmax.f32 %v2448_v53, 0.0  ;;  %v2481_v58 = vmax.f32 %v2449_v62, 0.0  ;;  %v2482_v43 = vmax.f32 %v2450_v52, 0.0  ;;  %v2483_v10 = vmax.f32 %v2451_v30, 0.0 }
 0x742   : > { %2606 = vst.msk [vmem:[#allocation2 + $0x22] sm:$0xff] %vm2195_vm9, %v2476_v20  ;;  %2607 = vst.msk [vmem:[#allocation2 + $0x32] sm:$0xff] %vm2195_vm9, %v2477_v17  ;;  %v2387_v57 = vadd.f32 %v2386_v40, %v2385_v56  ;;  %v2335_v16 = vmul.f32 %v7931_v22, %v7931_v22  ;;  %v2391_v37 = vsel %vm2195_vm9, %v2333_v54, 0.0  ;;  %v2272_v26 = vsel %vm2195_vm9, %v7896_v11, 0.0 }
 0x743   : > { %2608 = vst.msk [vmem:[#allocation2 + $0x42] sm:$0xff] %vm2195_vm9, %v2478_v41  ;;  %2609 = vst.msk [vmem:[#allocation2 + $0x52] sm:$0xff] %vm2195_vm9, %v2479_v61  ;;  %v2392_v12 = vadd.f32 %v2391_v37, %v2390_v63  ;;  %v2273_v4 = vadd.f32 %v2272_v26, %v2271_v38  ;;  %v2337_v2 = vmul.f32 %v7937_v1, %v7937_v1  ;;  %v2397_v0 = vsel %vm2195_vm9, %v2336_v13, 0.0 }
 0x744   : > { %2610 = vst.msk [vmem:[#allocation2 + $0x62] sm:$0xff] %vm2195_vm9, %v2480_v27  ;;  %2611 = vst.msk [vmem:[#allocation2 + $0x72] sm:$0xff] %vm2195_vm9, %v2481_v58  ;;  %v2388_v35 = vrot.slane %v2387_v57, 1  ;;  %v2395_v40 = vsel %vm2195_vm9, %v2335_v16, 0.0  ;;  %v2338_v29 = vmul.f32 %v7940_v14, %v7940_v14  ;;  %v2339_v52 = vmul.f32 %v7943_v9, %v7943_v9  ;;  %v7994_v27 = vpop.permute.xlu0 %3119  ;;  %v7996_v58 = vpop.permute.xlu1 %3121 }
 0x745   : > { %2612 = vst.msk [vmem:[#allocation2 + $0x82] sm:$0xff] %vm2195_vm9, %v2482_v43  ;;  %2613 = vst.msk [vmem:[#allocation2 + $0x92] sm:$0xff] %vm2195_vm9, %v2483_v10  ;;  %v2394_v56 = vadd.f32 %v2393_v33, %v2392_v12  ;;  %v2274_v54 = vrot.slane %v2273_v4, 4  ;;  %v2399_v30 = vsel %vm2195_vm9, %v2337_v2, 0.0 }
 0x746   : > { %v2389_v34 = vadd.f32 %v2388_v35, %v2387_v57  ;;  %v2401_v41 = vsel %vm2195_vm9, %v2338_v29, 0.0  ;;  %v2403_v16 = vsel %vm2195_vm9, %v2339_v52, 0.0 }
 0x747   : > { %v2396_v24 = vadd.f32 %v2395_v40, %v2394_v56  ;;  %v2275_v32 = vadd.f32 %v2274_v54, %v2273_v4 }
 0x748   : > { %v2433_v63 = vmul.f32 0.015625, %v2389_v34  ;;  %v8011_v33 = vpop.permute.xlu0 %3217  ;;  %v8013_v4 = vpop.permute.xlu1 %3215 }
 0x749   : > { %v2398_v53 = vadd.f32 %v2397_v0, %v2396_v24  ;;  %v7982_v62 = vld [vmem:[#allocation2 + $0x30] sm:$0xff]  ;;  %v7984_v38 = vld [vmem:[#allocation2 + $0x20] sm:$0xff]  ;;  %v2276_v20 = vrot.slane %v2275_v32, 2 }
 0x74a   : > { %v2437_v6 = vadd.f32 1e-05, %v2433_v63  ;;  %3313 = vrot.lane.b32.xlu0 %v7982_v62, %s6244_s25  ;;  %3311 = vrot.lane.b32.xlu1 %v7984_v38, %s6244_s25  ;;  %v7998_v10 = vld [vmem:[#allocation2 + $0x40] sm:$0xff]  ;;  %v8000_v57 = vld [vmem:[#allocation2 + $0x50] sm:$0xff] }
 0x74b   : > { %v2400_v17 = vadd.f32 %v2399_v30, %v2398_v53  ;;  %v2277_v61 = vadd.f32 %v2276_v20, %v2275_v32 }
 0x74c   : > { %6198 = vrsqrt.f32 %v2437_v6 }
 0x74d   : > { %v2402_v43 = vadd.f32 %v2401_v41, %v2400_v17  ;;  %v2278_v37 = vrot.slane %v2277_v61, 1 }
 0x74e   : > { %3599 = vrot.lane.b32.xlu0 %v7998_v10, %s6241_s22  ;;  %3601 = vrot.lane.b32.xlu1 %v8000_v57, %s6241_s22 }
 0x74f   : > { %v2404_v12 = vadd.f32 %v2403_v16, %v2402_v43  ;;  %v2279_v26 = vadd.f32 %v2278_v37, %v2277_v61  ;;  %v8063_v61 = vpop.permute.xlu1 %3135 }
 0x751   : > { %v2405_v35 = vrot.slane %v2404_v12, 4  ;;  %v2283_v13 = vmul.f32 0.015625, %v2279_v26 }
 0x752   : > { %3315 = vrot.lane.b32.xlu0 %v7998_v10, %s6244_s25  ;;  %3317 = vrot.lane.b32.xlu1 %v8000_v57, %s6244_s25 }
 0x753   : > { %v2406_v56 = vadd.f32 %v2405_v35, %v2404_v12  ;;  %v8016_v34 = vsub.f32 %v7847_v23, %v2283_v13  ;;  %v8019_v2 = vsub.f32 %v7841_v51, %v2283_v13  ;;  %v8022_v40 = vsub.f32 %v7865_v3, %v2283_v13  ;;  %v8036_v23 = vld [vmem:[#allocation2 + $0x60] sm:$0xff] }
 0x754   : > { %v8025_v54 = vsub.f32 %v7851_v47, %v2283_v13  ;;  %v8028_v63 = vsub.f32 %v7891_v59, %v2283_v13  ;;  %v8031_v29 = vsub.f32 %v7885_v28, %v2283_v13  ;;  %v8034_v0 = vsub.f32 %v7903_v19, %v2283_v13  ;;  %v8049_v28 = vld [vmem:[#allocation2 + $0x70] sm:$0xff]  ;;  %v8051_v19 = vpop.permute.xlu0 %3231 }
 0x755   : > { %v2407_v24 = vrot.slane %v2406_v56, 2  ;;  %v8039_v32 = vsub.f32 %v7896_v11, %v2283_v13  ;;  %v2340_v47 = vmul.f32 %v8016_v34, %v8016_v34  ;;  %v2341_v3 = vmul.f32 %v8019_v2, %v8019_v2 }
 0x756   : > { %v6199_v51 = vpop.eup %6198  ;;  %v2342_v59 = vmul.f32 %v8022_v40, %v8022_v40  ;;  %3603 = vrot.lane.b32.xlu0 %v8036_v23, %s6241_s22  ;;  %3605 = vrot.lane.b32.xlu1 %v8049_v28, %s6241_s22 }
 0x757   : > { %v2452_v53 = vmul.f32 %v6199_v51, %v7854_v42  ;;  %v2453_v11 = vmul.f32 %v6199_v51, %v7857_v46  ;;  %v2454_v6 = vmul.f32 %v6199_v51, %v7860_v60  ;;  %v2455_v52 = vmul.f32 %v6199_v51, %v7863_v48 }
 0x758   : > { %v2456_v30 = vmul.f32 %v6199_v51, %v7868_v18  ;;  %v2457_v20 = vmul.f32 %v6199_v51, %v7871_v5  ;;  %v2458_v17 = vmul.f32 %v6199_v51, %v7874_v8  ;;  %v2459_v41 = vmul.f32 %v6199_v51, %v7877_v15  ;;  %v8081_v26 = vpop.permute.xlu0 %3611 }
 0x759   : > { %v2484_v42 = vmax.f32 %v2452_v53, 0.0  ;;  %v2485_v43 = vmax.f32 %v2453_v11, 0.0  ;;  %v2486_v46 = vmax.f32 %v2454_v6, 0.0  ;;  %v2487_v16 = vmax.f32 %v2455_v52, 0.0  ;;  %v8090_v53 = vld [vmem:[#allocation2 + $0x90] sm:$0xff] }
 0x75a   : > { %v2488_v60 = vmax.f32 %v2456_v30, 0.0  ;;  %v2489_v37 = vmax.f32 %v2457_v20, 0.0  ;;  %v2490_v48 = vmax.f32 %v2458_v17, 0.0  ;;  %v2491_v12 = vmax.f32 %v2459_v41, 0.0  ;;  %3319 = vrot.lane.b32.xlu0 %v8036_v23, %s6244_s25  ;;  %3321 = vrot.lane.b32.xlu1 %v8049_v28, %s6244_s25  ;;  %v2643_v11 = vld [vmem:[#allocation2 + $0x28] sm:$0xf] }
 0x75b   : > { %2614 = vst.msk [vmem:[#allocation2 + $0xe2] sm:$0xff] %vm2195_vm9, %v2484_v42  ;;  %2615 = vst.msk [vmem:[#allocation2 + $0xf2] sm:$0xff] %vm2195_vm9, %v2485_v43  ;;  %v2408_v18 = vadd.f32 %v2407_v24, %v2406_v56  ;;  %v2343_v5 = vmul.f32 %v8025_v54, %v8025_v54  ;;  %v2411_v8 = vsel %vm2195_vm9, %v2340_v47, 0.0  ;;  %v2412_v15 = vsel %vm2195_vm9, %v2341_v3, 0.0  ;;  %v8083_v56 = vld [vmem:[#allocation2 + $0x80] sm:$0xff]  ;;  %v8092_v47 = vpop.permute.xlu1 %3137 }
 0x75c   : > { %2616 = vst.msk [vmem:[#allocation2 + $0x102] sm:$0xff] %vm2195_vm9, %v2486_v46  ;;  %2617 = vst.msk [vmem:[#allocation2 + $0x112] sm:$0xff] %vm2195_vm9, %v2487_v16  ;;  %v2413_v13 = vadd.f32 %v2412_v15, %v2411_v8  ;;  %v2344_v24 = vmul.f32 %v8028_v63, %v8028_v63  ;;  %v2414_v51 = vsel %vm2195_vm9, %v2342_v59, 0.0  ;;  %v2345_v52 = vmul.f32 %v8031_v29, %v8031_v29  ;;  %v8105_v46 = vpop.permute.xlu0 %3707 }
 0x75d   : > { %2618 = vst.msk [vmem:[#allocation2 + $0x122] sm:$0xff] %vm2195_vm9, %v2488_v60  ;;  %2619 = vst.msk [vmem:[#allocation2 + $0x132] sm:$0xff] %vm2195_vm9, %v2489_v37  ;;  %v2409_v35 = vrot.slane %v2408_v18, 1  ;;  %v2416_v30 = vsel %vm2195_vm9, %v2343_v5, 0.0  ;;  %v2805_v17 = vrot.slane %v7984_v38, 2  ;;  %v2806_v41 = vrot.slane %v2643_v11, 2 }
 0x75e   : > { %2620 = vst.msk [vmem:[#allocation2 + $0x142] sm:$0xff] %vm2195_vm9, %v2490_v48  ;;  %2621 = vst.msk [vmem:[#allocation2 + $0x152] sm:$0xff] %vm2195_vm9, %v2491_v12  ;;  %3607 = vrot.lane.b32.xlu0 %v8083_v56, %s6241_s22  ;;  %v2415_v6 = vadd.f32 %v2414_v51, %v2413_v13  ;;  %3609 = vrot.lane.b32.xlu1 %v8090_v53, %s6241_s22  ;;  %v2346_v42 = vmul.f32 %v8034_v0, %v8034_v0  ;;  %v2418_v43 = vsel %vm2195_vm9, %v2344_v24, 0.0  ;;  %v2645_v37 = vld [vmem:[#allocation2 + $0x38] sm:$0xf] }
 0x75f   : > { %v2410_v3 = vadd.f32 %v2409_v35, %v2408_v18  ;;  %v2347_v48 = vmul.f32 %v8039_v32, %v8039_v32  ;;  %v2420_v12 = vsel %vm2195_vm9, %v2345_v52, 0.0  ;;  %v2901_v18 = vrot.slane %v7984_v38, 4  ;;  %v8113_v5 = vpop.permute.xlu1 %3233  ;;  %v8121_v52 = vld [vmem:[#allocation2 + $0x48] sm:$0xf] }
 0x760   : > { %v2417_v59 = vadd.f32 %v2416_v30, %v2415_v6  ;;  %v2807_v15 = vsel %vm2798_vm11, %v2805_v17, %v2806_v41  ;;  %v2902_v35 = vrot.slane %v2643_v11, 4  ;;  %v2422_v13 = vsel %vm2195_vm9, %v2346_v42, 0.0  ;;  %v8123_v30 = vpop.permute.xlu0 %3803 }
 0x761   : > { %v2434_v20 = vmul.f32 0.015625, %v2410_v3  ;;  %v2808_v24 = vrot.slane %v7982_v62, 2  ;;  %v2809_v51 = vrot.slane %v2645_v37, 2  ;;  %v2424_v6 = vsel %vm2195_vm9, %v2347_v48, 0.0  ;;  %v160_v48 = vld [vmem:[%s9484_s1 + $0x58] sm:$0xff] }
 0x762   : > { %3323 = vrot.lane.b32.xlu0 %v8083_v56, %s6244_s25  ;;  %v2419_v60 = vadd.f32 %v2418_v43, %v2417_v59  ;;  %3325 = vrot.lane.b32.xlu1 %v8090_v53, %s6244_s25  ;;  %v2903_v11 = vsel %vm295_vm1, %v2901_v18, %v2902_v35  ;;  %v2904_v59 = vrot.slane %v7982_v62, 4  ;;  %v2905_v41 = vrot.slane %v2645_v37, 4  ;;  %v2667_v50 = vld [vmem:[#allocation2 + $0xe8] sm:$0xf] }
 0x763   : > { %v2438_v16 = vadd.f32 1e-05, %v2434_v20  ;;  %v2810_v17 = vsel %vm2798_vm11, %v2808_v24, %v2809_v51  ;;  %v8129_v42 = vpop.permute.xlu1 %3613  ;;  %v4153_v24 = vrot.slane %v160_v48, 4 }
 0x764   : > { %v2421_v8 = vadd.f32 %v2420_v12, %v2419_v60  ;;  %v2812_v60 = vrot.slane %v8121_v52, 2  ;;  %v161_v12 = vld [vmem:[%s9484_s1 + $0x60] sm:$0xff]  ;;  %v2906_v37 = vsel %vm295_vm1, %v2904_v59, %v2905_v41 }
 0x765   : > { %6200 = vrsqrt.f32 %v2438_v16  ;;  %v2811_v16 = vrot.slane %v7998_v10, 2  ;;  %v4155_v51 = vrot.slane %v161_v12, 4  ;;  %v8352_v31 = vld [vmem:[#allocation2 + $0x140] sm:$0xff]  ;;  %v8354_v55 = vld [vmem:[#allocation2 + $0x150] sm:$0xff] }
 0x766   : > { %3123 = vrot.lane.b32.xlu0 %v2807_v15, %s6239_s20  ;;  %v2423_v3 = vadd.f32 %v2422_v13, %v2421_v8  ;;  %3407 = vrot.lane.b32.xlu1 %v2807_v15, %s6245_s26  ;;  %v8142_v8 = vpop.permute.xlu0 %3805 }
 0x767   : > { %v8146_v13 = vsel %vm2798_vm11, %v2811_v16, %v2812_v60  ;;  %v8152_v59 = vpop.permute.xlu1 %3709 }
 0x768   : > { %v2425_v20 = vadd.f32 %v2424_v6, %v2423_v3 }
 0x76a   : > { %3503 = vrot.lane.b32.xlu0 %v2903_v11, %s6246_s27  ;;  %v2426_v43 = vrot.slane %v2425_v20, 4  ;;  %3409 = vrot.lane.b32.xlu1 %v2810_v17, %s6245_s26 }
 0x76c   : > { %v2427_v18 = vadd.f32 %v2426_v43, %v2425_v20 }
 0x76e   : > { %3219 = vrot.lane.b32.xlu0 %v2903_v11, %s6240_s21  ;;  %v2428_v35 = vrot.slane %v2427_v18, 2  ;;  %3125 = vrot.lane.b32.xlu1 %v2810_v17, %s6239_s20 }
 0x76f   : > { %v6201_v15 = vpop.eup %6200 }
 0x770   : > { %v2460_v3 = vmul.f32 %v6201_v15, %v7922_v25  ;;  %v2461_v6 = vmul.f32 %v6201_v15, %v7925_v36  ;;  %v2462_v20 = vmul.f32 %v6201_v15, %v7928_v7  ;;  %v2463_v11 = vmul.f32 %v6201_v15, %v7931_v22  ;;  %v162_v36 = vld [vmem:[%s9484_s1 + $0x68] sm:$0xff]  ;;  %v163_v7 = vld [vmem:[%s9484_s1 + $0x70] sm:$0xff] }
 0x771   : > { %v2464_v41 = vmul.f32 %v6201_v15, %v7934_v39  ;;  %v2465_v43 = vmul.f32 %v6201_v15, %v7937_v1  ;;  %v2466_v17 = vmul.f32 %v6201_v15, %v7940_v14  ;;  %v2467_v16 = vmul.f32 %v6201_v15, %v7943_v9  ;;  %v2649_v9 = vld [vmem:[#allocation2 + $0x58] sm:$0xf] }
 0x772   : > { %v2492_v60 = vmax.f32 %v2460_v3, 0.0  ;;  %v2493_v48 = vmax.f32 %v2461_v6, 0.0  ;;  %v2494_v12 = vmax.f32 %v2462_v20, 0.0  ;;  %v2495_v25 = vmax.f32 %v2463_v11, 0.0  ;;  %3695 = vrot.lane.b32.xlu0 %v8146_v13, %s6242_s23  ;;  %3505 = vrot.lane.b32.xlu1 %v2906_v37, %s6246_s27  ;;  %v8172_v6 = vpop.permute.xlu0 %3247 }
 0x773   : > { %v2496_v22 = vmax.f32 %v2464_v41, 0.0  ;;  %v2497_v39 = vmax.f32 %v2465_v43, 0.0  ;;  %v2498_v1 = vmax.f32 %v2466_v17, 0.0  ;;  %v2499_v14 = vmax.f32 %v2467_v16, 0.0  ;;  %9623 = vst [vmem:[#allocation36_spill] sm:$0xff] %v8172_v6 }
 0x774   : > { %2622 = vst.msk [vmem:[#allocation2 + $0x1a2] sm:$0xff] %vm2195_vm9, %v2492_v60  ;;  %2623 = vst.msk [vmem:[#allocation2 + $0x1b2] sm:$0xff] %vm2195_vm9, %v2493_v48  ;;  %v2429_v15 = vadd.f32 %v2428_v35, %v2427_v18  ;;  %v2907_v3 = vrot.slane %v7998_v10, 4  ;;  %v9624_v20 = vrot.slane %v7034_v21, 4  ;;  %v4156_v41 = vsel %vm295_vm1, %v4153_v24, %v4155_v51  ;;  %v8186_v60 = vpop.permute.xlu1 %3151  ;;  %v2673_v6 = vld [vmem:[#allocation2 + $0x118] sm:$0xf] }
 0x775   : > { %2624 = vst.msk [vmem:[#allocation2 + $0x1c2] sm:$0xff] %vm2195_vm9, %v2494_v12  ;;  %2625 = vst.msk [vmem:[#allocation2 + $0x1d2] sm:$0xff] %vm2195_vm9, %v2495_v25  ;;  %v2908_v18 = vrot.slane %v8121_v52, 4  ;;  %v4157_v43 = vrot.slane %v162_v36, 4  ;;  %v4159_v17 = vrot.slane %v163_v7, 4  ;;  %v2814_v21 = vrot.slane %v8000_v57, 2 }
 0x776   : > { %v4154_v11 = vsel %vm295_vm1, %v9624_v20, %v4153_v24  ;;  %2626 = vst.msk [vmem:[#allocation2 + $0x1e2] sm:$0xff] %vm2195_vm9, %v2496_v22  ;;  %2627 = vst.msk [vmem:[#allocation2 + $0x1f2] sm:$0xff] %vm2195_vm9, %v2497_v39  ;;  %v2430_v16 = vrot.slane %v2429_v15, 1  ;;  %3411 = vrot.lane.b32.xlu0 %v8146_v13, %s6245_s26  ;;  %v2815_v24 = vrot.slane %v2649_v9, 2  ;;  %3221 = vrot.lane.b32.xlu1 %v2906_v37, %s6240_s21  ;;  %v8194_v39 = vpop.permute.xlu0 %3627  ;;  %v2651_v20 = vld [vmem:[#allocation2 + $0x68] sm:$0xf] }
 0x777   : > { %2628 = vst.msk [vmem:[#allocation2 + $0x202] sm:$0xff] %vm2195_vm9, %v2498_v1  ;;  %2629 = vst.msk [vmem:[#allocation2 + $0x212] sm:$0xff] %vm2195_vm9, %v2499_v14  ;;  %v6080_v35 = vpack.c.bf16 %v4156_v41, %v4154_v11  ;;  %v4158_v48 = vsel %vm295_vm1, %v4155_v51, %v4157_v43  ;;  %v4160_v12 = vsel %vm295_vm1, %v4157_v43, %v4159_v17  ;;  %v2910_v51 = vrot.slane %v8000_v57, 4 }
 0x778   : > { %9625 = vst [vmem:[#allocation37_spill] sm:$0xff] %v8186_v60  ;;  %v2431_v52 = vadd.f32 %v2430_v16, %v2429_v15  ;;  %v6084_v25 = vpack.c.bf16 %v4160_v12, %v4158_v48  ;;  %v2909_v36 = vsel %vm295_vm1, %v2907_v3, %v2908_v18  ;;  %v2816_v22 = vsel %vm2798_vm11, %v2814_v21, %v2815_v24  ;;  %v8197_v1 = vpop.permute.xlu1 %3153 }
 0x779   : > { %6081 = vmatprep.subr.bf16.mxu0 %v6080_v35  ;;  %9626 = vst [vmem:[#allocation38_spill] sm:$0xff] %v8197_v1  ;;  %v2911_v14 = vrot.slane %v2649_v9, 4  ;;  %v2817_v9 = vrot.slane %v8036_v23, 2  ;;  %v2818_v41 = vrot.slane %v2651_v20, 2 }
 0x77a   : > { %6083 = vmatpush3.bf16.msra.mxu0 %v6080_v35  ;;  %v2435_v7 = vmul.f32 0.015625, %v2431_v52  ;;  %3791 = vrot.lane.b32.xlu0 %v2909_v36, %s6243_s24  ;;  %v8204_v15 = vpop.permute.xlu0 %3723 }
 0x77b   : > { %6085 = vmatprep.subr.bf16.mxu0 %v6084_v25  ;;  %3697 = vrot.lane.b32.xlu1 %v2816_v22, %s6242_s23  ;;  %9627 = vst [vmem:[#allocation39_spill] sm:$0xff] %v8204_v15  ;;  %v2912_v3 = vsel %vm295_vm1, %v2910_v51, %v2911_v14  ;;  %v2819_v35 = vsel %vm2798_vm11, %v2817_v9, %v2818_v41 }
 0x77c   : > { %v2439_v37 = vadd.f32 1e-05, %v2435_v7  ;;  %v8209_v11 = vpop.permute.xlu1 %3249 }
 0x77d   : > { %9628 = vst [vmem:[#allocation40_spill] sm:$0xff] %v8209_v11 }
 0x77e   : > { %6087 = vmatpush3.bf16.msra.mxu0 %v6084_v25  ;;  %6202 = vrsqrt.f32 %v2439_v37  ;;  %3413 = vrot.lane.b32.xlu0 %v2816_v22, %s6245_s26  ;;  %v8214_v18 = vpop.permute.xlu0 %3819 }
 0x77f   : > { %5962 = vmatprep.subr.msk.mxu0 %vm295_vm1, %v4159_v17  ;;  %3127 = vrot.lane.b32.xlu1 %v8146_v13, %s6239_s20  ;;  %9629 = vst [vmem:[#allocation41_spill] sm:$0xff] %v8214_v18 }
 0x780   : > { %v8218_v43 = vpop.permute.xlu1 %3629 }
 0x781   : > { %9630 = vst [vmem:[#allocation42_spill] sm:$0xff] %v8218_v43 }
 0x782   : > { %5963 = vmatpush3.msk.msra.mxu0 %vm295_vm1, %v4159_v17  ;;  %3793 = vrot.lane.b32.xlu0 %v2912_v3, %s6243_s24 }
 0x783   : > { %3507 = vrot.lane.b32.xlu1 %v2909_v36, %s6246_s27 }
 0x784   : > { %v8243_v9 = vpop.permute.xlu1 %3725 }
 0x785   : > { %9632 = vst [vmem:[#allocation44_spill] sm:$0xff] %v8243_v9  ;;  %v6214_v9 = vld [vmem:[#allocation2] sm:$0xff] }
 0x786   : > { %3223 = vrot.lane.b32.xlu0 %v2909_v36, %s6240_s21 }
 0x787   : > { %3129 = vrot.lane.b32.xlu1 %v2816_v22, %s6239_s20 }
 0x788   : > { %v6203_v13 = vpop.eup %6202 }
 0x789   : > { %v2468_v17 = vmul.f32 %v6203_v13, %v8016_v34  ;;  %v2469_v16 = vmul.f32 %v6203_v13, %v8019_v2  ;;  %v2470_v21 = vmul.f32 %v6203_v13, %v8022_v40  ;;  %v2471_v24 = vmul.f32 %v6203_v13, %v8025_v54  ;;  %v2653_v2 = vld [vmem:[#allocation2 + $0x78] sm:$0xf] }
 0x78a   : > { %v2472_v48 = vmul.f32 %v6203_v13, %v8028_v63  ;;  %v2473_v12 = vmul.f32 %v6203_v13, %v8031_v29  ;;  %v2474_v52 = vmul.f32 %v6203_v13, %v8034_v0  ;;  %v2475_v25 = vmul.f32 %v6203_v13, %v8039_v32  ;;  %3699 = vrot.lane.b32.xlu0 %v2819_v35, %s6242_s23  ;;  %v8230_v63 = vpop.permute.xlu0 %3821 }
 0x78b   : > { %v2500_v36 = vmax.f32 %v2468_v17, 0.0  ;;  %v2501_v7 = vmax.f32 %v2469_v16, 0.0  ;;  %v2502_v22 = vmax.f32 %v2470_v21, 0.0  ;;  %v2503_v34 = vmax.f32 %v2471_v24, 0.0  ;;  %3509 = vrot.lane.b32.xlu1 %v2912_v3, %s6246_s27  ;;  %9631 = vst [vmem:[#allocation43_spill] sm:$0xff] %v8230_v63  ;;  %v8252_v17 = vpop.permute.xlu1 %3167 }
 0x78c   : > { %v2504_v40 = vmax.f32 %v2472_v48, 0.0  ;;  %v2505_v37 = vmax.f32 %v2473_v12, 0.0  ;;  %v2506_v54 = vmax.f32 %v2474_v52, 0.0  ;;  %v2507_v51 = vmax.f32 %v2475_v25, 0.0  ;;  %9634 = vst [vmem:[#allocation46_spill] sm:$0xff] %v8252_v17 }
 0x78d   : > { %2630 = vst.msk [vmem:[#allocation2 + $0x262] sm:$0xff] %vm2195_vm9, %v2500_v36  ;;  %2631 = vst.msk [vmem:[#allocation2 + $0x272] sm:$0xff] %vm2195_vm9, %v2501_v7  ;;  %v2913_v29 = vrot.slane %v8036_v23, 4  ;;  %v2914_v0 = vrot.slane %v2651_v20, 4  ;;  %v2820_v32 = vrot.slane %v8049_v28, 2  ;;  %v2821_v14 = vrot.slane %v2653_v2, 2 }
 0x78e   : > { %2632 = vst.msk [vmem:[#allocation2 + $0x282] sm:$0xff] %vm2195_vm9, %v2502_v22  ;;  %2633 = vst.msk [vmem:[#allocation2 + $0x292] sm:$0xff] %vm2195_vm9, %v2503_v34  ;;  %3415 = vrot.lane.b32.xlu0 %v2819_v35, %s6245_s26  ;;  %v8249_v13 = vpop.permute.xlu0 %3263  ;;  %v2916_v16 = vrot.slane %v8049_v28, 4  ;;  %v2917_v21 = vrot.slane %v2653_v2, 4  ;;  %v2655_v12 = vld [vmem:[#allocation2 + $0x88] sm:$0xf] }
 0x78f   : > { %2634 = vst.msk [vmem:[#allocation2 + $0x2a2] sm:$0xff] %vm2195_vm9, %v2504_v40  ;;  %2635 = vst.msk [vmem:[#allocation2 + $0x2b2] sm:$0xff] %vm2195_vm9, %v2505_v37  ;;  %3225 = vrot.lane.b32.xlu1 %v2912_v3, %s6240_s21  ;;  %v2915_v41 = vsel %vm295_vm1, %v2913_v29, %v2914_v0  ;;  %v2822_v20 = vsel %vm2798_vm11, %v2820_v32, %v2821_v14  ;;  %v8261_v48 = vpop.permute.xlu1 %3169  ;;  %v3007_v52 = vrot.slane %v8083_v56, 2  ;;  %v3008_v25 = vrot.slane %v2655_v12, 2  ;;  %v2657_v22 = vld [vmem:[#allocation2 + $0x98] sm:$0xf] }
 0x790   : > { %2636 = vst.msk [vmem:[#allocation2 + $0x2c2] sm:$0xff] %vm2195_vm9, %v2506_v54  ;;  %2637 = vst.msk [vmem:[#allocation2 + $0x2d2] sm:$0xff] %vm2195_vm9, %v2507_v51  ;;  %v2918_v24 = vsel %vm295_vm1, %v2916_v16, %v2917_v21  ;;  %v3031_v40 = vrot.slane %v8083_v56, 4  ;;  %v3032_v37 = vrot.slane %v2655_v12, 4  ;;  %v3010_v54 = vrot.slane %v8090_v53, 2  ;;  %v8302_v12 = vld [vmem:[#allocation2 + $0xf0] sm:$0xff] }
 0x791   : > { %9633 = vst [vmem:[#allocation45_spill] sm:$0xff] %v8249_v13  ;;  %9636 = vst [vmem:[#allocation48_spill] sm:$0xff] %v8261_v48  ;;  %v3009_v7 = vsel %vm2798_vm11, %v3007_v52, %v3008_v25  ;;  %v3011_v51 = vrot.slane %v2657_v22, 2  ;;  %v3034_v56 = vrot.slane %v8090_v53, 4  ;;  %v8312_v25 = vld [vmem:[#allocation2 + $0x100] sm:$0xff] }
 0x792   : > { %3795 = vrot.lane.b32.xlu0 %v2915_v41, %s6243_s24  ;;  %v8257_v3 = vpop.permute.xlu0 %3643  ;;  %v3033_v29 = vsel %vm295_vm1, %v3031_v40, %v3032_v37 }
 0x793   : > { %3701 = vrot.lane.b32.xlu1 %v2822_v20, %s6242_s23  ;;  %9635 = vst [vmem:[#allocation47_spill] sm:$0xff] %v8257_v3  ;;  %v3012_v0 = vsel %vm2798_vm11, %v3010_v54, %v3011_v51  ;;  %v8332_v51 = vld [vmem:[#allocation2 + $0x120] sm:$0xff]  ;;  %v2671_v3 = vld [vmem:[#allocation2 + $0x108] sm:$0xf] }
 0x794   : > { %v2836_v11 = vrot.slane %v2671_v3, 2 }
 0x796   : > { %3417 = vrot.lane.b32.xlu0 %v2822_v20, %s6245_s26  ;;  %v8266_v36 = vpop.permute.xlu0 %3739 }
 0x797   : > { %3131 = vrot.lane.b32.xlu1 %v2819_v35, %s6239_s20  ;;  %9637 = vst [vmem:[#allocation49_spill] sm:$0xff] %v8266_v36  ;;  %v8269_v35 = vpop.permute.xlu1 %3265 }
 0x798   : > { %9638 = vst [vmem:[#allocation50_spill] sm:$0xff] %v8269_v35 }
 0x79a   : > { %3797 = vrot.lane.b32.xlu0 %v2918_v24, %s6243_s24  ;;  %v8274_v34 = vpop.permute.xlu0 %3835 }
 0x79b   : > { %3511 = vrot.lane.b32.xlu1 %v2915_v41, %s6246_s27  ;;  %9639 = vst [vmem:[#allocation51_spill] sm:$0xff] %v8274_v34  ;;  %v8276_v2 = vpop.permute.xlu1 %3645 }
 0x79c   : > { %9640 = vst [vmem:[#allocation52_spill] sm:$0xff] %v8276_v2 }
 0x79e   : > { %3227 = vrot.lane.b32.xlu0 %v2915_v41, %s6240_s21  ;;  %v8285_v32 = vpop.permute.xlu0 %3837  ;;  %v3035_v41 = vrot.slane %v2657_v22, 4 }
 0x79f   : > { %3133 = vrot.lane.b32.xlu1 %v2822_v20, %s6239_s20  ;;  %9641 = vst [vmem:[#allocation53_spill] sm:$0xff] %v8285_v32  ;;  %v8287_v14 = vpop.permute.xlu1 %3741  ;;  %v2926_v32 = vrot.slane %v2667_v50, 4 }
 0x7a0   : > { %9642 = vst [vmem:[#allocation54_spill] sm:$0xff] %v8287_v14  ;;  %v3036_v21 = vsel %vm295_vm1, %v3034_v56, %v3035_v41 }
 0x7a2   : > { %3703 = vrot.lane.b32.xlu0 %v3009_v7, %s6242_s23  ;;  %v8293_v20 = vpop.permute.xlu0 %3661 }
 0x7a3   : > { %3513 = vrot.lane.b32.xlu1 %v2918_v24, %s6246_s27  ;;  %9643 = vst [vmem:[#allocation55_spill] sm:$0xff] %v8293_v20  ;;  %v8295_v16 = vpop.permute.xlu1 %3659 }
 0x7a4   : > { %9644 = vst [vmem:[#allocation56_spill] sm:$0xff] %v8295_v16  ;;  %v2832_v16 = vrot.slane %v8302_v12, 2 }
 0x7a6   : > { %3419 = vrot.lane.b32.xlu0 %v3009_v7, %s6245_s26  ;;  %v8306_v53 = vpop.permute.xlu0 %3757  ;;  %v8314_v7 = vld [vmem:[#allocation2 + $0x110] sm:$0xff] }
 0x7a7   : > { %3229 = vrot.lane.b32.xlu1 %v2918_v24, %s6240_s21  ;;  %v8300_v24 = vld [vmem:[#allocation2 + $0xe0] sm:$0xff]  ;;  %9645 = vst [vmem:[#allocation57_spill] sm:$0xff] %v8306_v53  ;;  %v8308_v52 = vpop.permute.xlu1 %3755  ;;  %v2669_v53 = vld [vmem:[#allocation2 + $0xf8] sm:$0xf] }
 0x7a8   : > { %9646 = vst [vmem:[#allocation58_spill] sm:$0xff] %v8308_v52  ;;  %v2829_v45 = vrot.slane %v8300_v24, 2  ;;  %v2830_v52 = vrot.slane %v2667_v50, 2  ;;  %v2833_v13 = vrot.slane %v2669_v53, 2  ;;  %v2925_v17 = vrot.slane %v8300_v24, 4 }
 0x7a9   : > { %v2835_v50 = vrot.slane %v8312_v25, 2  ;;  %v2929_v1 = vrot.slane %v2669_v53, 4  ;;  %v2932_v53 = vrot.slane %v2671_v3, 4 }
 0x7aa   : > { %3799 = vrot.lane.b32.xlu0 %v3033_v29, %s6243_s24  ;;  %v2831_v48 = vsel %vm2798_vm11, %v2829_v45, %v2830_v52  ;;  %v2834_v34 = vsel %vm2798_vm11, %v2832_v16, %v2833_v13  ;;  %v2927_v36 = vsel %vm295_vm1, %v2925_v17, %v2926_v32 }
 0x7ab   : > { %3705 = vrot.lane.b32.xlu1 %v3012_v0, %s6242_s23  ;;  %v2837_v32 = vsel %vm2798_vm11, %v2835_v50, %v2836_v11  ;;  %v2839_v11 = vrot.slane %v2673_v6, 2 }
 0x7ae   : > { %3421 = vrot.lane.b32.xlu0 %v3012_v0, %s6245_s26 }
 0x7af   : > { %3515 = vrot.lane.b32.xlu1 %v3033_v29, %s6246_s27  ;;  %v8334_v29 = vld [vmem:[#allocation2 + $0x130] sm:$0xff] }
 0x7b2   : > { %3801 = vrot.lane.b32.xlu0 %v3036_v21, %s6243_s24 }
 0x7b3   : > { %3517 = vrot.lane.b32.xlu1 %v3036_v21, %s6246_s27 }
 0x7b6   : > { %3327 = vrot.lane.b32.xlu0 %v8300_v24, %s6244_s25 }
 0x7b7   : > { %3329 = vrot.lane.b32.xlu1 %v8302_v12, %s6244_s25 }
 0x7ba   : > { %3615 = vrot.lane.b32.xlu0 %v8312_v25, %s6241_s22 }
 0x7bb   : > { %3617 = vrot.lane.b32.xlu1 %v8314_v7, %s6241_s22 }
 0x7bc   : > { %v8320_v22 = vpop.permute.xlu0 %3313  ;;  %v8322_v40 = vpop.permute.xlu1 %3311 }
 0x7be   : > { %3331 = vrot.lane.b32.xlu0 %v8312_v25, %s6244_s25 }
 0x7bf   : > { %3333 = vrot.lane.b32.xlu1 %v8314_v7, %s6244_s25 }
 0x7c0   : > { %v8328_v37 = vpop.permute.xlu0 %3599  ;;  %v8330_v54 = vpop.permute.xlu1 %3601 }
 0x7c2   : > { %3619 = vrot.lane.b32.xlu0 %v8332_v51, %s6241_s22 }
 0x7c3   : > { %3621 = vrot.lane.b32.xlu1 %v8334_v29, %s6241_s22 }
 0x7c4   : > { %v8340_v0 = vpop.permute.xlu0 %3315  ;;  %v8342_v56 = vpop.permute.xlu1 %3317 }
 0x7c6   : > { %3335 = vrot.lane.b32.xlu0 %v8332_v51, %s6244_s25 }
 0x7c7   : > { %3337 = vrot.lane.b32.xlu1 %v8334_v29, %s6244_s25 }
 0x7c8   : > { %v8348_v41 = vpop.permute.xlu0 %3603  ;;  %v8350_v21 = vpop.permute.xlu1 %3605 }
 0x7ca   : > { %3623 = vrot.lane.b32.xlu0 %v8352_v31, %s6241_s22 }
 0x7cb   : > { %3625 = vrot.lane.b32.xlu1 %v8354_v55, %s6241_s22 }
 0x7cc   : > { %v8360_v49 = vpop.permute.xlu0 %3319  ;;  %v8363_v44 = vpop.permute.xlu1 %3321 }
 0x7ce   : > { %3339 = vrot.lane.b32.xlu0 %v8352_v31, %s6244_s25 }
 0x7cf   : > { %3341 = vrot.lane.b32.xlu1 %v8354_v55, %s6244_s25 }
 0x7d0   : > { %v8369_v20 = vpop.permute.xlu0 %3607  ;;  %v8372_v35 = vpop.permute.xlu1 %3609 }
 0x7d2   : > { %3423 = vrot.lane.b32.xlu0 %v2831_v48, %s6245_s26 }
 0x7d3   : > { %3139 = vrot.lane.b32.xlu1 %v2831_v48, %s6239_s20  ;;  %v2928_v48 = vrot.slane %v8302_v12, 4 }
 0x7d4   : > { %v8378_v14 = vpop.permute.xlu0 %3323  ;;  %v8380_v2 = vpop.permute.xlu1 %3325 }
 0x7d5   : > { %v2930_v16 = vsel %vm295_vm1, %v2928_v48, %v2929_v1  ;;  %v2838_v1 = vrot.slane %v8314_v7, 2 }
 0x7d6   : > { %3425 = vrot.lane.b32.xlu0 %v2834_v34, %s6245_s26 }
 0x7d7   : > { %3519 = vrot.lane.b32.xlu1 %v2927_v36, %s6246_s27 }
 0x7d8   : > { %v8386_v45 = vpop.permute.xlu0 %3123  ;;  %v3408_v52 = vpop.permute.xlu1 %3407 }
 0x7da   : > { %3235 = vrot.lane.b32.xlu0 %v2927_v36, %s6240_s21  ;;  %v2931_v36 = vrot.slane %v8312_v25, 4 }
 0x7db   : > { %3141 = vrot.lane.b32.xlu1 %v2834_v34, %s6239_s20  ;;  %v3887_v34 = vsel %vm2195_vm9, %v6214_v9, %v7994_v27  ;;  %v2840_v9 = vsel %vm2798_vm11, %v2838_v1, %v2839_v11 }
 0x7dc   : > { %v3504_v13 = vpop.permute.xlu0 %3503  ;;  %v3410_v17 = vpop.permute.xlu1 %3409  ;;  %v3920_v48 = vsel %vm3919_vm12, %v3887_v34, %v8013_v4  ;;  %v2933_v3 = vsel %vm295_vm1, %v2931_v36, %v2932_v53  ;;  %v2934_v36 = vrot.slane %v8314_v7, 4  ;;  %v2935_v53 = vrot.slane %v2673_v6, 4  ;;  %v6215_v34 = vld [vmem:[#allocation2 + $0x10] sm:$0xff] }
 0x7dd   : > { %v3953_v27 = vsel %vm3952_vm13, %v3920_v48, %v8322_v40  ;;  %v3888_v40 = vsel %vm2195_vm9, %v6215_v34, %v7996_v58 }
 0x7de   : > { %3711 = vrot.lane.b32.xlu0 %v2837_v32, %s6242_s23  ;;  %v3985_v18 = vsel %vm560_vm2, %v3953_v27, %v3408_v52  ;;  %v3921_v1 = vsel %vm3919_vm12, %v3888_v40, %v8011_v33  ;;  %v2936_v48 = vsel %vm295_vm1, %v2934_v36, %v2935_v53 }
 0x7df   : > { %3521 = vrot.lane.b32.xlu1 %v2930_v16, %s6246_s27  ;;  %v3954_v58 = vsel %vm3952_vm13, %v3921_v1, %v8320_v22  ;;  %v2844_v1 = vrot.slane %v8334_v29, 2 }
 0x7e0   : > { %v8396_v60 = vpop.permute.xlu0 %3219  ;;  %v8398_v63 = vpop.permute.xlu1 %3125 }
 0x7e2   : > { %3427 = vrot.lane.b32.xlu0 %v2837_v32, %s6245_s26 }
 0x7e3   : > { %3237 = vrot.lane.b32.xlu1 %v2930_v16, %s6240_s21  ;;  %v4018_v16 = vsel %vm4017_vm14, %v3985_v18, %v3504_v13 }
 0x7e4   : > { %v3696_v50 = vpop.permute.xlu0 %3695  ;;  %v3506_v43 = vpop.permute.xlu1 %3505  ;;  %v4051_v52 = vsel %vm4050_vm15, %v4018_v16, %v8328_v37  ;;  %v2675_v37 = vld [vmem:[#allocation2 + $0x128] sm:$0xf]  ;;  %v2841_v16 = vrot.slane %v8332_v51, 2 }
 0x7e5   : > { %v4084_v18 = vsel %vm4083_vm3, %v4051_v52, %v3696_v50  ;;  %v2842_v36 = vrot.slane %v2675_v37, 2 }
 0x7e6   : > { %3807 = vrot.lane.b32.xlu0 %v2933_v3, %s6243_s24 }
 0x7e7   : > { %3713 = vrot.lane.b32.xlu1 %v2840_v9, %s6242_s23 }
 0x7e8   : > { %v3412_v15 = vpop.permute.xlu0 %3411  ;;  %v8416_v4 = vpop.permute.xlu1 %3221 }
 0x7ea   : > { %3429 = vrot.lane.b32.xlu0 %v2840_v9, %s6245_s26 }
 0x7eb   : > { %3143 = vrot.lane.b32.xlu1 %v2837_v32, %s6239_s20  ;;  %v3986_v32 = vsel %vm560_vm2, %v3954_v58, %v3410_v17 }
 0x7ec   : > { %v3792_v13 = vpop.permute.xlu0 %3791  ;;  %v4019_v50 = vsel %vm4017_vm14, %v3986_v32, %v3506_v43  ;;  %v2843_v43 = vsel %vm2798_vm11, %v2841_v16, %v2842_v36 }
 0x7ed   : > { %v4117_v6 = vsel %vm4116_vm4, %v4084_v18, %v3792_v13  ;;  %v3698_v11 = vpop.permute.xlu1 %3697  ;;  %v4052_v22 = vsel %vm4050_vm15, %v4019_v50, %v8330_v54  ;;  %v2938_v18 = vrot.slane %v2675_v37, 4  ;;  %v3889_v13 = vsel %vm2195_vm9, %v7984_v38, %v8386_v45 }
 0x7ee   : > { %5964 = vmatprep.mubr.msk.f32.mxu0 %vm198_vm0, %v4117_v6  ;;  %3809 = vrot.lane.b32.xlu0 %v2936_v48, %s6243_s24  ;;  %v4085_v53 = vsel %vm4083_vm3, %v4052_v22, %v3698_v11  ;;  %v3922_v11 = vsel %vm3919_vm12, %v3889_v13, %v8396_v60 }
 0x7ef   : > { %3523 = vrot.lane.b32.xlu1 %v2933_v3, %s6246_s27  ;;  %v3955_v37 = vsel %vm3952_vm13, %v3922_v11, %v8340_v0 }
 0x7f0   : > { %v3414_v33 = vpop.permute.xlu0 %3413  ;;  %v3987_v38 = vsel %vm560_vm2, %v3955_v37, %v3412_v15 }
 0x7f1   : > { %v8437_v27 = vpop.permute.xlu1 %3127 }
 0x7f2   : > { %3239 = vrot.lane.b32.xlu0 %v2933_v3, %s6240_s21  ;;  %v2677_v3 = vld [vmem:[#allocation2 + $0x138] sm:$0xf] }
 0x7f3   : > { %3145 = vrot.lane.b32.xlu1 %v2840_v9, %s6239_s20  ;;  %v2937_v9 = vrot.slane %v8332_v51, 4  ;;  %v2845_v6 = vrot.slane %v2677_v3, 2  ;;  %v2941_v22 = vrot.slane %v2677_v3, 4 }
 0x7f4   : > { %v3794_v17 = vpop.permute.xlu0 %3793 }
 0x7f5   : > { %v4118_v34 = vsel %vm4116_vm4, %v4085_v53, %v3794_v17  ;;  %v3508_v40 = vpop.permute.xlu1 %3507  ;;  %v2939_v50 = vsel %vm295_vm1, %v2937_v9, %v2938_v18  ;;  %v2846_v16 = vsel %vm2798_vm11, %v2844_v1, %v2845_v6  ;;  %v3890_v53 = vsel %vm2195_vm9, %v7982_v62, %v8398_v63  ;;  %v2679_v63 = vld [vmem:[#allocation2 + $0x148] sm:$0xf] }
 0x7f6   : > { %5965 = vmatmul.mubr.msk.f32.vlgmr.msra.gmra.mrb[32].mxu0 %vm198_vm0, %v4118_v34  ;;  %3715 = vrot.lane.b32.xlu0 %v2843_v43, %s6242_s23  ;;  %v4020_v45 = vsel %vm4017_vm14, %v3987_v38, %v3508_v40  ;;  %v3923_v0 = vsel %vm3919_vm12, %v3890_v53, %v8416_v4  ;;  %v3013_v18 = vrot.slane %v8352_v31, 2  ;;  %v3014_v1 = vrot.slane %v2679_v63, 2 }
 0x7f7   : > { %3525 = vrot.lane.b32.xlu1 %v2936_v48, %s6246_s27  ;;  %v4053_v15 = vsel %vm4050_vm15, %v4020_v45, %v8348_v41  ;;  %v3956_v62 = vsel %vm3952_vm13, %v3923_v0, %v8342_v56  ;;  %v3016_v45 = vrot.slane %v8354_v55, 2 }
 0x7f8   : > { %v8450_v52 = vpop.permute.xlu0 %3223  ;;  %v3988_v41 = vsel %vm560_vm2, %v3956_v62, %v3414_v33 }
 0x7f9   : > { %v8452_v54 = vpop.permute.xlu1 %3129 }
 0x7fa   : > { %3431 = vrot.lane.b32.xlu0 %v2843_v43, %s6245_s26  ;;  %v3892_v62 = vsel %vm2195_vm9, %v8000_v57, %v8452_v54 }
 0x7fb   : > { %3241 = vrot.lane.b32.xlu1 %v2936_v48, %s6240_s21  ;;  %v2940_v48 = vrot.slane %v8334_v29, 4 }
 0x7fc   : > { %v3700_v58 = vpop.permute.xlu0 %3699 }
 0x7fd   : > { %v3510_v32 = vpop.permute.xlu1 %3509  ;;  %v4086_v17 = vsel %vm4083_vm3, %v4053_v15, %v3700_v58  ;;  %v2942_v9 = vsel %vm295_vm1, %v2940_v48, %v2941_v22  ;;  %v3891_v48 = vsel %vm2195_vm9, %v7998_v10, %v8437_v27 }
 0x7fe   : > { %3811 = vrot.lane.b32.xlu0 %v2939_v50, %s6243_s24  ;;  %v4021_v4 = vsel %vm4017_vm14, %v3988_v41, %v3510_v32  ;;  %v3015_v32 = vsel %vm2798_vm11, %v3013_v18, %v3014_v1  ;;  %v3924_v53 = vsel %vm3919_vm12, %v3891_v48, %v8450_v52  ;;  %v8571_v48 = vld [vmem:[#allocation2 + $0x1d0] sm:$0xff] }
 0x7ff   : > { %3717 = vrot.lane.b32.xlu1 %v2846_v16, %s6242_s23  ;;  %v4054_v56 = vsel %vm4050_vm15, %v4021_v4, %v8350_v21  ;;  %v3037_v21 = vrot.slane %v8352_v31, 4 }
 0x800   : > { %v3416_v60 = vpop.permute.xlu0 %3415 }
 0x801   : > { %v3226_v36 = vpop.permute.xlu1 %3225 }
 0x802   : > { %3433 = vrot.lane.b32.xlu0 %v2846_v16, %s6245_s26 }
 0x803   : > { %3147 = vrot.lane.b32.xlu1 %v2843_v43, %s6239_s20 }
 0x804   : > { %v3796_v34 = vpop.permute.xlu0 %3795 }
 0x805   : > { %v4119_v40 = vsel %vm4116_vm4, %v4086_v17, %v3796_v34  ;;  %v3702_v3 = vpop.permute.xlu1 %3701  ;;  %v3957_v17 = vsel %vm3952_vm13, %v3924_v53, %v8360_v49  ;;  %v3925_v49 = vsel %vm3919_vm12, %v3892_v62, %v3226_v36 }
 0x806   : > { %5967 = vmatprep.mubr.msk.f32.mxu0 %vm198_vm0, %v4119_v40  ;;  %3813 = vrot.lane.b32.xlu0 %v2942_v9, %s6243_s24  ;;  %v4087_v6 = vsel %vm4083_vm3, %v4054_v56, %v3702_v3  ;;  %v3989_v10 = vsel %vm560_vm2, %v3957_v17, %v3416_v60  ;;  %v3040_v40 = vrot.slane %v8354_v55, 4  ;;  %v3958_v36 = vsel %vm3952_vm13, %v3925_v49, %v8363_v44 }
 0x807   : > { %3527 = vrot.lane.b32.xlu1 %v2939_v50, %s6246_s27 }
 0x808   : > { %v3418_v43 = vpop.permute.xlu0 %3417 }
 0x809   : > { %v3132_v13 = vpop.permute.xlu1 %3131 }
 0x80a   : > { %3243 = vrot.lane.b32.xlu0 %v2939_v50, %s6240_s21  ;;  %v2681_v50 = vld [vmem:[#allocation2 + $0x158] sm:$0xf] }
 0x80b   : > { %3149 = vrot.lane.b32.xlu1 %v2846_v16, %s6239_s20  ;;  %v3038_v16 = vrot.slane %v2679_v63, 4  ;;  %v3017_v22 = vrot.slane %v2681_v50, 2  ;;  %v3893_v63 = vsel %vm2195_vm9, %v8036_v23, %v3132_v13 }
 0x80c   : > { %v3798_v11 = vpop.permute.xlu0 %3797 }
 0x80d   : > { %v4120_v33 = vsel %vm4116_vm4, %v4087_v6, %v3798_v11  ;;  %v3512_v58 = vpop.permute.xlu1 %3511  ;;  %v3039_v31 = vsel %vm295_vm1, %v3037_v21, %v3038_v16  ;;  %v3018_v34 = vsel %vm2798_vm11, %v3016_v45, %v3017_v22  ;;  %v8567_v45 = vld [vmem:[#allocation2 + $0x1c0] sm:$0xff] }
 0x80e   : > { %5968 = vmatmul.mubr.msk.f32.gmra.mrb[34].mxu0 %vm198_vm0, %v4120_v33  ;;  %3719 = vrot.lane.b32.xlu0 %v3015_v32, %s6242_s23  ;;  %v4022_v27 = vsel %vm4017_vm14, %v3989_v10, %v3512_v58  ;;  %v8547_v33 = vld [vmem:[#allocation2 + $0x1a0] sm:$0xff]  ;;  %v8550_v58 = vld [vmem:[#allocation2 + $0x1b0] sm:$0xff] }
 0x80f   : > { %3529 = vrot.lane.b32.xlu1 %v2942_v9, %s6246_s27  ;;  %v4055_v60 = vsel %vm4050_vm15, %v4022_v27, %v8369_v20  ;;  %v3990_v20 = vsel %vm560_vm2, %v3958_v36, %v3418_v43  ;;  %v8619_v27 = vld [vmem:[#allocation2 + $0x200] sm:$0xff] }
 0x810   : > { %v3228_v37 = vpop.permute.xlu0 %3227 }
 0x811   : > { %v3134_v38 = vpop.permute.xlu1 %3133  ;;  %v3926_v4 = vsel %vm3919_vm12, %v3893_v63, %v3228_v37 }
 0x812   : > { %3435 = vrot.lane.b32.xlu0 %v3015_v32, %s6245_s26  ;;  %v3894_v23 = vsel %vm2195_vm9, %v8049_v28, %v3134_v38  ;;  %v3959_v1 = vsel %vm3952_vm13, %v3926_v4, %v8378_v14 }
 0x813   : > { %3245 = vrot.lane.b32.xlu1 %v2942_v9, %s6240_s21  ;;  %v3041_v9 = vrot.slane %v2681_v50, 4 }
 0x814   : > { %v3704_v0 = vpop.permute.xlu0 %3703 }
 0x815   : > { %v3514_v15 = vpop.permute.xlu1 %3513  ;;  %v4088_v55 = vsel %vm4083_vm3, %v4055_v60, %v3704_v0  ;;  %v3042_v54 = vsel %vm295_vm1, %v3040_v40, %v3041_v9  ;;  %v2691_v40 = vld [vmem:[#allocation2 + $0x1a8] sm:$0xf]  ;;  %v2853_v9 = vrot.slane %v8547_v33, 2  ;;  %v2693_v60 = vld [vmem:[#allocation2 + $0x1b8] sm:$0xf] }
 0x816   : > { %3815 = vrot.lane.b32.xlu0 %v3039_v31, %s6243_s24  ;;  %v4023_v13 = vsel %vm4017_vm14, %v3990_v20, %v3514_v15  ;;  %v2854_v49 = vrot.slane %v2691_v40, 2 }
 0x817   : > { %3721 = vrot.lane.b32.xlu1 %v3018_v34, %s6242_s23  ;;  %v4056_v28 = vsel %vm4050_vm15, %v4023_v13, %v8372_v35 }
 0x818   : > { %v3420_v52 = vpop.permute.xlu0 %3419  ;;  %v2855_v4 = vsel %vm2798_vm11, %v2853_v9, %v2854_v49 }
 0x819   : > { %v3230_v3 = vpop.permute.xlu1 %3229  ;;  %v3991_v6 = vsel %vm560_vm2, %v3959_v1, %v3420_v52  ;;  %v8621_v52 = vld [vmem:[#allocation2 + $0x210] sm:$0xff]  ;;  %v2695_v1 = vld [vmem:[#allocation2 + $0x1c8] sm:$0xf] }
 0x81a   : > { %3437 = vrot.lane.b32.xlu0 %v3018_v34, %s6245_s26  ;;  %v3927_v44 = vsel %vm3919_vm12, %v3894_v23, %v3230_v3 }
 0x81b   : > { %3531 = vrot.lane.b32.xlu1 %v3039_v31, %s6246_s27  ;;  %v3960_v50 = vsel %vm3952_vm13, %v3927_v44, %v8380_v2  ;;  %v8599_v31 = vld [vmem:[#allocation2 + $0x1e0] sm:$0xff]  ;;  %v2859_v44 = vrot.slane %v8567_v45, 2 }
 0x81c   : > { %v3800_v41 = vpop.permute.xlu0 %3799 }
 0x81d   : > { %v4121_v18 = vsel %vm4116_vm4, %v4088_v55, %v3800_v41  ;;  %v3706_v57 = vpop.permute.xlu1 %3705  ;;  %v2856_v55 = vrot.slane %v8550_v58, 2 }
 0x81e   : > { %5970 = vmatprep.mubr.msk.f32.mxu0 %vm198_vm0, %v4121_v18  ;;  %3817 = vrot.lane.b32.xlu0 %v3042_v54, %s6243_s24  ;;  %v4089_v32 = vsel %vm4083_vm3, %v4056_v28, %v3706_v57  ;;  %v2857_v18 = vrot.slane %v2693_v60, 2  ;;  %v2949_v57 = vrot.slane %v8547_v33, 4  ;;  %v2953_v28 = vrot.slane %v2693_v60, 4 }
 0x81f   : > { %3533 = vrot.lane.b32.xlu1 %v3042_v54, %s6246_s27  ;;  %v2950_v54 = vrot.slane %v2691_v40, 4 }
 0x820   : > { %v3422_v56 = vpop.permute.xlu0 %3421  ;;  %v2858_v23 = vsel %vm2798_vm11, %v2856_v55, %v2857_v18 }
 0x821   : > { %v3516_v11 = vpop.permute.xlu1 %3515  ;;  %v3992_v38 = vsel %vm560_vm2, %v3960_v50, %v3422_v56  ;;  %v2951_v13 = vsel %vm295_vm1, %v2949_v57, %v2950_v54 }
 0x822   : > { %v4024_v43 = vsel %vm4017_vm14, %v3991_v6, %v3516_v11  ;;  %3343 = vrot.lane.b32.xlu0 %v8547_v33, %s6244_s25  ;;  %v2860_v11 = vrot.slane %v2695_v1, 2 }
 0x823   : > { %v4057_v14 = vsel %vm4050_vm15, %v4024_v43, %v8081_v26  ;;  %3345 = vrot.lane.b32.xlu1 %v8550_v58, %s6244_s25  ;;  %v2952_v43 = vrot.slane %v8550_v58, 4 }
 0x824   : > { %v3802_v37 = vpop.permute.xlu0 %3801  ;;  %v4090_v21 = vsel %vm4083_vm3, %v4057_v14, %v8105_v46  ;;  %v2861_v50 = vsel %vm2798_vm11, %v2859_v44, %v2860_v11 }
 0x825   : > { %v4122_v16 = vsel %vm4116_vm4, %v4089_v32, %v3802_v37  ;;  %v3518_v35 = vpop.permute.xlu1 %3517  ;;  %v4123_v2 = vsel %vm4116_vm4, %v4090_v21, %v8123_v30  ;;  %v2954_v37 = vsel %vm295_vm1, %v2952_v43, %v2953_v28  ;;  %v2697_v21 = vld [vmem:[#allocation2 + $0x1d8] sm:$0xf] }
 0x826   : > { %v4025_v26 = vsel %vm4017_vm14, %v3992_v38, %v3518_v35  ;;  %5971 = vmatmul.mubr.msk.f32.gmra.mrb[36].mxu0 %vm198_vm0, %v4122_v16  ;;  %3631 = vrot.lane.b32.xlu0 %v8567_v45, %s6241_s22  ;;  %v2955_v35 = vrot.slane %v8567_v45, 4 }
 0x827   : > { %v4058_v46 = vsel %vm4050_vm15, %v4025_v26, %v8129_v42  ;;  %3633 = vrot.lane.b32.xlu1 %v8571_v48, %s6241_s22  ;;  %5973 = vmatprep.mubr.msk.f32.mxu0 %vm198_vm0, %v4123_v2  ;;  %v2956_v26 = vrot.slane %v2695_v1, 4  ;;  %v6216_v2 = vld [vmem:[#allocation2 + $0xc0] sm:$0xff] }
 0x828   : > { %v8582_v22 = vpop.permute.xlu0 %3327  ;;  %v4091_v53 = vsel %vm4083_vm3, %v4058_v46, %v8152_v59  ;;  %v8601_v59 = vld [vmem:[#allocation2 + $0x1f0] sm:$0xff]  ;;  %v3895_v46 = vsel %vm2195_vm9, %v6216_v2, %v8063_v61 }
 0x829   : > { %v8586_v0 = vpop.permute.xlu1 %3329  ;;  %v4124_v15 = vsel %vm4116_vm4, %v4091_v53, %v8142_v8  ;;  %v2862_v53 = vrot.slane %v8571_v48, 2  ;;  %v3928_v9 = vsel %vm3919_vm12, %v3895_v46, %v8051_v19  ;;  %v2957_v60 = vsel %vm295_vm1, %v2955_v35, %v2956_v26 }
 0x82a   : > { %5974 = vmatmul.mubr.msk.f32.gmra.mrb[38].mxu0 %vm198_vm0, %v4124_v15  ;;  %3347 = vrot.lane.b32.xlu0 %v8567_v45, %s6244_s25  ;;  %v2863_v15 = vrot.slane %v2697_v21, 2  ;;  %v3961_v55 = vsel %vm3952_vm13, %v3928_v9, %v8582_v22  ;;  %v2958_v19 = vrot.slane %v8571_v48, 4  ;;  %v2865_v35 = vrot.slane %v8599_v31, 2 }
 0x82b   : > { %3349 = vrot.lane.b32.xlu1 %v8571_v48, %s6244_s25 }
 0x82c   : > { %v8595_v30 = vpop.permute.xlu0 %3615 }
 0x82d   : > { %v8597_v42 = vpop.permute.xlu1 %3617 }
 0x82e   : > { %3635 = vrot.lane.b32.xlu0 %v8599_v31, %s6241_s22 }
 0x82f   : > { %3637 = vrot.lane.b32.xlu1 %v8601_v59, %s6241_s22 }
 0x830   : > { %v8607_v8 = vpop.permute.xlu0 %3331 }
 0x831   : > { %v8609_v17 = vpop.permute.xlu1 %3333 }
 0x832   : > { %3351 = vrot.lane.b32.xlu0 %v8599_v31, %s6244_s25 }
 0x833   : > { %3353 = vrot.lane.b32.xlu1 %v8601_v59, %s6244_s25 }
 0x834   : > { %v8615_v34 = vpop.permute.xlu0 %3619 }
 0x835   : > { %v8617_v10 = vpop.permute.xlu1 %3621 }
 0x836   : > { %3639 = vrot.lane.b32.xlu0 %v8619_v27, %s6241_s22 }
 0x837   : > { %3641 = vrot.lane.b32.xlu1 %v8621_v52, %s6241_s22 }
 0x838   : > { %v8627_v3 = vpop.permute.xlu0 %3335 }
 0x839   : > { %v8630_v62 = vpop.permute.xlu1 %3337 }
 0x83a   : > { %3355 = vrot.lane.b32.xlu0 %v8619_v27, %s6244_s25 }
 0x83b   : > { %3357 = vrot.lane.b32.xlu1 %v8621_v52, %s6244_s25 }
 0x83c   : > { %v8636_v63 = vpop.permute.xlu0 %3623 }
 0x83d   : > { %v8639_v41 = vpop.permute.xlu1 %3625 }
 0x83e   : > { %3439 = vrot.lane.b32.xlu0 %v2855_v4, %s6245_s26 }
 0x83f   : > { %3155 = vrot.lane.b32.xlu1 %v2855_v4, %s6239_s20  ;;  %v2864_v4 = vsel %vm2798_vm11, %v2862_v53, %v2863_v15 }
 0x840   : > { %v8645_v36 = vpop.permute.xlu0 %3339 }
 0x841   : > { %v8647_v20 = vpop.permute.xlu1 %3341 }
 0x842   : > { %3441 = vrot.lane.b32.xlu0 %v2858_v23, %s6245_s26 }
 0x843   : > { %3535 = vrot.lane.b32.xlu1 %v2951_v13, %s6246_s27 }
 0x844   : > { %v3424_v56 = vpop.permute.xlu0 %3423 }
 0x845   : > { %v8653_v6 = vpop.permute.xlu1 %3139  ;;  %v3993_v61 = vsel %vm560_vm2, %v3961_v55, %v3424_v56 }
 0x846   : > { %3251 = vrot.lane.b32.xlu0 %v2951_v13, %s6240_s21  ;;  %v6217_v13 = vld [vmem:[#allocation2 + $0xd0] sm:$0xff]  ;;  %v3897_v55 = vsel %vm2195_vm9, %v8300_v24, %v8653_v6 }
 0x847   : > { %3157 = vrot.lane.b32.xlu1 %v2858_v23, %s6239_s20  ;;  %v2959_v23 = vrot.slane %v2697_v21, 4  ;;  %v3896_v22 = vsel %vm2195_vm9, %v6217_v13, %v8092_v47 }
 0x848   : > { %v3426_v14 = vpop.permute.xlu0 %3425  ;;  %v3929_v11 = vsel %vm3919_vm12, %v3896_v22, %v8113_v5 }
 0x849   : > { %v3520_v32 = vpop.permute.xlu1 %3519  ;;  %v3962_v47 = vsel %vm3952_vm13, %v3929_v11, %v8586_v0 }
 0x84a   : > { %3727 = vrot.lane.b32.xlu0 %v2861_v50, %s6242_s23  ;;  %v4026_v18 = vsel %vm4017_vm14, %v3993_v61, %v3520_v32  ;;  %v2960_v32 = vsel %vm295_vm1, %v2958_v19, %v2959_v23 }
 0x84b   : > { %3537 = vrot.lane.b32.xlu1 %v2954_v37, %s6246_s27  ;;  %v4059_v1 = vsel %vm4050_vm15, %v4026_v18, %v8595_v30  ;;  %v2699_v30 = vld [vmem:[#allocation2 + $0x1e8] sm:$0xf] }
 0x84c   : > { %v8663_v38 = vpop.permute.xlu0 %3235  ;;  %v2866_v26 = vrot.slane %v2699_v30, 2 }
 0x84d   : > { %v8665_v16 = vpop.permute.xlu1 %3141  ;;  %v3930_v18 = vsel %vm3919_vm12, %v3897_v55, %v8663_v38  ;;  %v3022_v55 = vrot.slane %v8621_v52, 2 }
 0x84e   : > { %3443 = vrot.lane.b32.xlu0 %v2861_v50, %s6245_s26  ;;  %v2867_v15 = vsel %vm2798_vm11, %v2865_v35, %v2866_v26  ;;  %v3963_v22 = vsel %vm3952_vm13, %v3930_v18, %v8607_v8  ;;  %v3019_v35 = vrot.slane %v8619_v27, 2 }
 0x84f   : > { %3253 = vrot.lane.b32.xlu1 %v2954_v37, %s6240_s21 }
 0x850   : > { %v3712_v40 = vpop.permute.xlu0 %3711 }
 0x851   : > { %v3522_v49 = vpop.permute.xlu1 %3521  ;;  %v4092_v56 = vsel %vm4083_vm3, %v4059_v1, %v3712_v40  ;;  %v2701_v40 = vld [vmem:[#allocation2 + $0x1f8] sm:$0xf] }
 0x852   : > { %3823 = vrot.lane.b32.xlu0 %v2957_v60, %s6243_s24  ;;  %v2869_v61 = vrot.slane %v2701_v40, 2  ;;  %v2965_v11 = vrot.slane %v2701_v40, 4 }
 0x853   : > { %3729 = vrot.lane.b32.xlu1 %v2864_v4, %s6242_s23 }
 0x854   : > { %v3428_v57 = vpop.permute.xlu0 %3427 }
 0x855   : > { %v8683_v54 = vpop.permute.xlu1 %3237  ;;  %v3995_v24 = vsel %vm560_vm2, %v3963_v22, %v3428_v57 }
 0x856   : > { %3445 = vrot.lane.b32.xlu0 %v2864_v4, %s6245_s26 }
 0x857   : > { %3159 = vrot.lane.b32.xlu1 %v2861_v50, %s6239_s20  ;;  %v3994_v50 = vsel %vm560_vm2, %v3962_v47, %v3426_v14 }
 0x858   : > { %v3808_v44 = vpop.permute.xlu0 %3807  ;;  %v4027_v37 = vsel %vm4017_vm14, %v3994_v50, %v3522_v49  ;;  %v2961_v49 = vrot.slane %v8599_v31, 4 }
 0x859   : > { %v3714_v43 = vpop.permute.xlu1 %3713  ;;  %v4125_v28 = vsel %vm4116_vm4, %v4092_v56, %v3808_v44  ;;  %v4060_v0 = vsel %vm4050_vm15, %v4027_v37, %v8597_v42  ;;  %v2964_v44 = vrot.slane %v8601_v59, 4 }
 0x85a   : > { %5976 = vmatprep.mubr.msk.f32.mxu0 %vm198_vm0, %v4125_v28  ;;  %3825 = vrot.lane.b32.xlu0 %v2960_v32, %s6243_s24  ;;  %v4093_v2 = vsel %vm4083_vm3, %v4060_v0, %v3714_v43  ;;  %v3898_v43 = vsel %vm2195_vm9, %v8302_v12, %v8665_v16  ;;  %v2703_v16 = vld [vmem:[#allocation2 + $0x208] sm:$0xf] }
 0x85b   : > { %3539 = vrot.lane.b32.xlu1 %v2957_v60, %s6246_s27  ;;  %v3931_v8 = vsel %vm3919_vm12, %v3898_v43, %v8683_v54  ;;  %v2966_v50 = vsel %vm295_vm1, %v2964_v44, %v2965_v11  ;;  %v3020_v0 = vrot.slane %v2703_v16, 2 }
 0x85c   : > { %v3430_v5 = vpop.permute.xlu0 %3429  ;;  %v3964_v12 = vsel %vm3952_vm13, %v3931_v8, %v8609_v17 }
 0x85d   : > { %v8704_v21 = vpop.permute.xlu1 %3143 }
 0x85e   : > { %3255 = vrot.lane.b32.xlu0 %v2957_v60, %s6240_s21  ;;  %v2962_v60 = vrot.slane %v2699_v30, 4 }
 0x85f   : > { %3161 = vrot.lane.b32.xlu1 %v2864_v4, %s6239_s20  ;;  %v2868_v4 = vrot.slane %v8601_v59, 2 }
 0x860   : > { %v3810_v14 = vpop.permute.xlu0 %3809  ;;  %v2963_v13 = vsel %vm295_vm1, %v2961_v49, %v2962_v60  ;;  %v3044_v60 = vrot.slane %v2703_v16, 4 }
 0x861   : > { %v3524_v46 = vpop.permute.xlu1 %3523  ;;  %v4126_v53 = vsel %vm4116_vm4, %v4093_v2, %v3810_v14  ;;  %v2870_v1 = vsel %vm2798_vm11, %v2868_v4, %v2869_v61  ;;  %v3899_v4 = vsel %vm2195_vm9, %v8312_v25, %v8704_v21 }
 0x862   : > { %5977 = vmatmul.mubr.msk.f32.gmra.mrb[40].mxu0 %vm198_vm0, %v4126_v53  ;;  %3731 = vrot.lane.b32.xlu0 %v2867_v15, %s6242_s23  ;;  %v4028_v6 = vsel %vm4017_vm14, %v3995_v24, %v3524_v46  ;;  %v3021_v53 = vsel %vm2798_vm11, %v3019_v35, %v3020_v0 }
 0x863   : > { %3541 = vrot.lane.b32.xlu1 %v2960_v32, %s6246_s27  ;;  %v4061_v57 = vsel %vm4050_vm15, %v4028_v6, %v8615_v34  ;;  %v3996_v34 = vsel %vm560_vm2, %v3964_v12, %v3430_v5  ;;  %v8814_v12 = vld [vmem:[#allocation2 + $0x260] sm:$0xff] }
 0x864   : > { %v8717_v9 = vpop.permute.xlu0 %3239 }
 0x865   : > { %v8719_v42 = vpop.permute.xlu1 %3145  ;;  %v3932_v18 = vsel %vm3919_vm12, %v3899_v4, %v8717_v9 }
 0x866   : > { %3447 = vrot.lane.b32.xlu0 %v2867_v15, %s6245_s26  ;;  %v3900_v44 = vsel %vm2195_vm9, %v8314_v7, %v8719_v42 }
 0x867   : > { %3257 = vrot.lane.b32.xlu1 %v2960_v32, %s6240_s21 }
 0x868   : > { %v3716_v19 = vpop.permute.xlu0 %3715 }
 0x869   : > { %v3526_v23 = vpop.permute.xlu1 %3525  ;;  %v4094_v28 = vsel %vm4083_vm3, %v4061_v57, %v3716_v19 }
 0x86a   : > { %3827 = vrot.lane.b32.xlu0 %v2963_v13, %s6243_s24  ;;  %v4029_v54 = vsel %vm4017_vm14, %v3996_v34, %v3526_v23  ;;  %v8817_v34 = vld [vmem:[#allocation2 + $0x270] sm:$0xff] }
 0x86b   : > { %3733 = vrot.lane.b32.xlu1 %v2870_v1, %s6242_s23  ;;  %v4062_v17 = vsel %vm4050_vm15, %v4029_v54, %v8617_v10  ;;  %v3043_v10 = vrot.slane %v8619_v27, 4 }
 0x86c   : > { %v3432_v38 = vpop.permute.xlu0 %3431 }
 0x86d   : > { %v3242_v56 = vpop.permute.xlu1 %3241  ;;  %v3045_v27 = vsel %vm295_vm1, %v3043_v10, %v3044_v60  ;;  %v9650_v10 = vld [vmem:[#allocation44_spill] sm:$0xff] }
 0x86e   : > { %3449 = vrot.lane.b32.xlu0 %v2870_v1, %s6245_s26 }
 0x86f   : > { %3163 = vrot.lane.b32.xlu1 %v2867_v15, %s6239_s20  ;;  %v2705_v15 = vld [vmem:[#allocation2 + $0x218] sm:$0xf] }
 0x870   : > { %v3812_v32 = vpop.permute.xlu0 %3811  ;;  %v3023_v61 = vrot.slane %v2705_v15, 2  ;;  %v3047_v6 = vrot.slane %v2705_v15, 4 }
 0x871   : > { %v3718_v47 = vpop.permute.xlu1 %3717  ;;  %v4127_v30 = vsel %vm4116_vm4, %v4094_v28, %v3812_v32 }
 0x872   : > { %5979 = vmatprep.mubr.msk.f32.mxu0 %vm198_vm0, %v4127_v30  ;;  %3829 = vrot.lane.b32.xlu0 %v2966_v50, %s6243_s24  ;;  %v4095_v2 = vsel %vm4083_vm3, %v4062_v17, %v3718_v47  ;;  %v3024_v22 = vsel %vm2798_vm11, %v3022_v55, %v3023_v61  ;;  %v9651_v55 = vld [vmem:[#allocation43_spill] sm:$0xff] }
 0x873   : > { %3543 = vrot.lane.b32.xlu1 %v2963_v13, %s6246_s27 }
 0x874   : > { %v3434_v37 = vpop.permute.xlu0 %3433 }
 0x875   : > { %v3148_v26 = vpop.permute.xlu1 %3147 }
 0x876   : > { %3259 = vrot.lane.b32.xlu0 %v2963_v13, %s6240_s21  ;;  %v3965_v13 = vsel %vm3952_vm13, %v3932_v18, %v8627_v3  ;;  %v3933_v3 = vsel %vm3919_vm12, %v3900_v44, %v3242_v56  ;;  %v3901_v11 = vsel %vm2195_vm9, %v8332_v51, %v3148_v26  ;;  %v9647_v26 = vld [vmem:[#allocation39_spill] sm:$0xff] }
 0x877   : > { %3165 = vrot.lane.b32.xlu1 %v2870_v1, %s6239_s20  ;;  %v3997_v25 = vsel %vm560_vm2, %v3965_v13, %v3432_v38  ;;  %v3046_v1 = vrot.slane %v8621_v52, 4  ;;  %v3966_v56 = vsel %vm3952_vm13, %v3933_v3, %v8630_v62 }
 0x878   : > { %v3814_v14 = vpop.permute.xlu0 %3813 }
 0x879   : > { %v3528_v5 = vpop.permute.xlu1 %3527  ;;  %v4128_v46 = vsel %vm4116_vm4, %v4095_v2, %v3814_v14  ;;  %v3048_v42 = vsel %vm295_vm1, %v3046_v1, %v3047_v6  ;;  %v8834_v14 = vld [vmem:[#allocation2 + $0x280] sm:$0xff]  ;;  %v2715_v1 = vld [vmem:[#allocation2 + $0x268] sm:$0xf]  ;;  %v2877_v6 = vrot.slane %v8814_v12, 2 }
 0x87a   : > { %5980 = vmatmul.mubr.msk.f32.gmra.mrb[42].mxu0 %vm198_vm0, %v4128_v46  ;;  %3735 = vrot.lane.b32.xlu0 %v3021_v53, %s6242_s23  ;;  %v4030_v21 = vsel %vm4017_vm14, %v3997_v25, %v3528_v5  ;;  %v8838_v5 = vld [vmem:[#allocation2 + $0x290] sm:$0xff]  ;;  %v2878_v3 = vrot.slane %v2715_v1, 2 }
 0x87b   : > { %3545 = vrot.lane.b32.xlu1 %v2966_v50, %s6246_s27  ;;  %v4063_v38 = vsel %vm4050_vm15, %v4030_v21, %v8636_v63  ;;  %v3998_v63 = vsel %vm560_vm2, %v3966_v56, %v3434_v37  ;;  %v8886_v21 = vld [vmem:[#allocation2 + $0x2c0] sm:$0xff] }
 0x87c   : > { %v3244_v40 = vpop.permute.xlu0 %3243 }
 0x87d   : > { %v3150_v49 = vpop.permute.xlu1 %3149  ;;  %v3934_v8 = vsel %vm3919_vm12, %v3901_v11, %v3244_v40 }
 0x87e   : > { %3451 = vrot.lane.b32.xlu0 %v3021_v53, %s6245_s26  ;;  %v3902_v51 = vsel %vm2195_vm9, %v8334_v29, %v3150_v49  ;;  %v3967_v32 = vsel %vm3952_vm13, %v3934_v8, %v8645_v36  ;;  %v9649_v53 = vld [vmem:[#allocation42_spill] sm:$0xff]  ;;  %v2879_v8 = vsel %vm2798_vm11, %v2877_v6, %v2878_v3 }
 0x87f   : > { %3261 = vrot.lane.b32.xlu1 %v2966_v50, %s6240_s21 }
 0x880   : > { %v3720_v19 = vpop.permute.xlu0 %3719 }
 0x881   : > { %v3530_v23 = vpop.permute.xlu1 %3529  ;;  %v4096_v52 = vsel %vm4083_vm3, %v4063_v38, %v3720_v19  ;;  %v8866_v19 = vld [vmem:[#allocation2 + $0x2a0] sm:$0xff]  ;;  %v2717_v38 = vld [vmem:[#allocation2 + $0x278] sm:$0xf] }
 0x882   : > { %3831 = vrot.lane.b32.xlu0 %v3045_v27, %s6243_s24  ;;  %v4031_v28 = vsel %vm4017_vm14, %v3998_v63, %v3530_v23  ;;  %v8868_v23 = vld [vmem:[#allocation2 + $0x2b0] sm:$0xff] }
 0x883   : > { %3737 = vrot.lane.b32.xlu1 %v3024_v22, %s6242_s23  ;;  %v4064_v29 = vsel %vm4050_vm15, %v4031_v28, %v8639_v41 }
 0x884   : > { %v3436_v9 = vpop.permute.xlu0 %3435 }
 0x885   : > { %v3246_v24 = vpop.permute.xlu1 %3245  ;;  %v3999_v62 = vsel %vm560_vm2, %v3967_v32, %v3436_v9  ;;  %v8888_v9 = vld [vmem:[#allocation2 + $0x2d0] sm:$0xff]  ;;  %v2719_v32 = vld [vmem:[#allocation2 + $0x288] sm:$0xf] }
 0x886   : > { %3453 = vrot.lane.b32.xlu0 %v3024_v22, %s6245_s26  ;;  %v3935_v30 = vsel %vm3919_vm12, %v3902_v51, %v3246_v24 }
 0x887   : > { %3547 = vrot.lane.b32.xlu1 %v3045_v27, %s6246_s27  ;;  %v3968_v37 = vsel %vm3952_vm13, %v3935_v30, %v8647_v20  ;;  %v9648_v20 = vld [vmem:[#allocation41_spill] sm:$0xff] }
 0x888   : > { %v3816_v43 = vpop.permute.xlu0 %3815 }
 0x889   : > { %v3722_v57 = vpop.permute.xlu1 %3721  ;;  %v4129_v7 = vsel %vm4116_vm4, %v4096_v52, %v3816_v43  ;;  %v2880_v52 = vrot.slane %v8817_v34, 2 }
 0x88a   : > { %5982 = vmatprep.mubr.msk.f32.mxu0 %vm198_vm0, %v4129_v7  ;;  %3833 = vrot.lane.b32.xlu0 %v3048_v42, %s6243_s24  ;;  %v4097_v54 = vsel %vm4083_vm3, %v4064_v29, %v3722_v57  ;;  %v2881_v57 = vrot.slane %v2717_v38, 2  ;;  %v2973_v7 = vrot.slane %v8814_v12, 4  ;;  %v2977_v29 = vrot.slane %v2717_v38, 4 }
 0x88b   : > { %3549 = vrot.lane.b32.xlu1 %v3048_v42, %s6246_s27  ;;  %v2974_v42 = vrot.slane %v2715_v1, 4 }
 0x88c   : > { %v3438_v47 = vpop.permute.xlu0 %3437  ;;  %v2882_v51 = vsel %vm2798_vm11, %v2880_v52, %v2881_v57 }
 0x88d   : > { %v3532_v50 = vpop.permute.xlu1 %3531  ;;  %v4000_v17 = vsel %vm560_vm2, %v3968_v37, %v3438_v47  ;;  %v2975_v28 = vsel %vm295_vm1, %v2973_v7, %v2974_v42  ;;  %v2982_v7 = vrot.slane %v8838_v5, 4 }
 0x88e   : > { %v4032_v16 = vsel %vm4017_vm14, %v3999_v62, %v3532_v50  ;;  %3359 = vrot.lane.b32.xlu0 %v8814_v12, %s6244_s25  ;;  %v2883_v62 = vrot.slane %v8834_v14, 2  ;;  %v2884_v50 = vrot.slane %v2719_v32, 2 }
 0x88f   : > { %v4065_v36 = vsel %vm4050_vm15, %v4032_v16, %v8194_v39  ;;  %3361 = vrot.lane.b32.xlu1 %v8817_v34, %s6244_s25  ;;  %v2976_v16 = vrot.slane %v8817_v34, 4 }
 0x890   : > { %v3818_v35 = vpop.permute.xlu0 %3817  ;;  %v4098_v0 = vsel %vm4083_vm3, %v4065_v36, %v9647_v26  ;;  %v2885_v37 = vsel %vm2798_vm11, %v2883_v62, %v2884_v50  ;;  %v2721_v26 = vld [vmem:[#allocation2 + $0x298] sm:$0xf]  ;;  %v9655_v50 = vld [vmem:[#allocation40_spill] sm:$0xff] }
 0x891   : > { %v3534_v2 = vpop.permute.xlu1 %3533  ;;  %v4130_v41 = vsel %vm4116_vm4, %v4097_v54, %v3818_v35  ;;  %v4131_v46 = vsel %vm4116_vm4, %v4098_v0, %v9648_v20  ;;  %v2978_v35 = vsel %vm295_vm1, %v2976_v16, %v2977_v29  ;;  %v9652_v20 = vld [vmem:[#allocation37_spill] sm:$0xff]  ;;  %v2983_v42 = vrot.slane %v2721_v26, 4 }
 0x892   : > { %v4033_v39 = vsel %vm4017_vm14, %v4000_v17, %v3534_v2  ;;  %5983 = vmatmul.mubr.msk.f32.gmra.mrb[44].mxu0 %vm198_vm0, %v4130_v41  ;;  %3647 = vrot.lane.b32.xlu0 %v8834_v14, %s6241_s22  ;;  %v2979_v2 = vrot.slane %v8834_v14, 4  ;;  %v2980_v41 = vrot.slane %v2719_v32, 4 }
 0x893   : > { %v4066_v15 = vsel %vm4050_vm15, %v4033_v39, %v9649_v53  ;;  %3649 = vrot.lane.b32.xlu1 %v8838_v5, %s6241_s22  ;;  %5985 = vmatprep.mubr.msk.f32.mxu0 %vm198_vm0, %v4131_v46  ;;  %v6218_v39 = vld [vmem:[#allocation2 + $0x180] sm:$0xff]  ;;  %v2886_v53 = vrot.slane %v8838_v5, 2 }
 0x894   : > { %v8849_v40 = vpop.permute.xlu0 %3343  ;;  %v4099_v49 = vsel %vm4083_vm3, %v4066_v15, %v9650_v10  ;;  %v3903_v46 = vsel %vm2195_vm9, %v6218_v39, %v9652_v20  ;;  %v2887_v15 = vrot.slane %v2721_v26, 2  ;;  %v2981_v1 = vsel %vm295_vm1, %v2979_v2, %v2980_v41 }
 0x895   : > { %v8853_v60 = vpop.permute.xlu1 %3345  ;;  %v4132_v4 = vsel %vm4116_vm4, %v4099_v49, %v9651_v55  ;;  %v9653_v49 = vld [vmem:[#allocation36_spill] sm:$0xff] }
 0x896   : > { %5986 = vmatmul.mubr.msk.f32.gmra.mrb[46].mxu0 %vm198_vm0, %v4132_v4  ;;  %3363 = vrot.lane.b32.xlu0 %v8834_v14, %s6244_s25  ;;  %v3936_v55 = vsel %vm3919_vm12, %v3903_v46, %v9653_v49  ;;  %v2888_v3 = vsel %vm2798_vm11, %v2886_v53, %v2887_v15  ;;  %v2889_v46 = vrot.slane %v8866_v19, 2 }
 0x897   : > { %3365 = vrot.lane.b32.xlu1 %v8838_v5, %s6244_s25  ;;  %v3969_v6 = vsel %vm3952_vm13, %v3936_v55, %v8849_v40 }
 0x898   : > { %v8862_v61 = vpop.permute.xlu0 %3631 }
 0x899   : > { %v8864_v18 = vpop.permute.xlu1 %3633 }
 0x89a   : > { %3651 = vrot.lane.b32.xlu0 %v8866_v19, %s6241_s22 }
 0x89b   : > { %3653 = vrot.lane.b32.xlu1 %v8868_v23, %s6241_s22 }
 0x89c   : > { %v8874_v27 = vpop.permute.xlu0 %3347 }
 0x89d   : > { %v8876_v13 = vpop.permute.xlu1 %3349 }
 0x89e   : > { %3367 = vrot.lane.b32.xlu0 %v8866_v19, %s6244_s25 }
 0x89f   : > { %3369 = vrot.lane.b32.xlu1 %v8868_v23, %s6244_s25 }
 0x8a0   : > { %v8882_v22 = vpop.permute.xlu0 %3635 }
 0x8a1   : > { %v8884_v25 = vpop.permute.xlu1 %3637 }
 0x8a2   : > { %3655 = vrot.lane.b32.xlu0 %v8886_v21, %s6241_s22 }
 0x8a3   : > { %3657 = vrot.lane.b32.xlu1 %v8888_v9, %s6241_s22 }
 0x8a4   : > { %v8894_v24 = vpop.permute.xlu0 %3351 }
 0x8a5   : > { %v8897_v44 = vpop.permute.xlu1 %3353 }
 0x8a6   : > { %3371 = vrot.lane.b32.xlu0 %v8886_v21, %s6244_s25 }
 0x8a7   : > { %3373 = vrot.lane.b32.xlu1 %v8888_v9, %s6244_s25 }
 0x8a8   : > { %v8903_v11 = vpop.permute.xlu0 %3639 }
 0x8a9   : > { %v8906_v43 = vpop.permute.xlu1 %3641 }
 0x8aa   : > { %3455 = vrot.lane.b32.xlu0 %v2879_v8, %s6245_s26 }
 0x8ab   : > { %3171 = vrot.lane.b32.xlu1 %v2879_v8, %s6239_s20 }
 0x8ac   : > { %v8912_v56 = vpop.permute.xlu0 %3355 }
 0x8ad   : > { %v8914_v63 = vpop.permute.xlu1 %3357 }
 0x8ae   : > { %3457 = vrot.lane.b32.xlu0 %v2882_v51, %s6245_s26 }
 0x8af   : > { %3551 = vrot.lane.b32.xlu1 %v2975_v28, %s6246_s27 }
 0x8b0   : > { %v3440_v47 = vpop.permute.xlu0 %3439 }
 0x8b1   : > { %v8920_v30 = vpop.permute.xlu1 %3155  ;;  %v4001_v38 = vsel %vm560_vm2, %v3969_v6, %v3440_v47 }
 0x8b2   : > { %3267 = vrot.lane.b32.xlu0 %v2975_v28, %s6240_s21  ;;  %v9654_v28 = vld [vmem:[#allocation38_spill] sm:$0xff] }
 0x8b3   : > { %3173 = vrot.lane.b32.xlu1 %v2882_v51, %s6239_s20  ;;  %v6219_v51 = vld [vmem:[#allocation2 + $0x190] sm:$0xff] }
 0x8b4   : > { %v3442_v36 = vpop.permute.xlu0 %3441  ;;  %v3904_v40 = vsel %vm2195_vm9, %v6219_v51, %v9654_v28  ;;  %v3905_v51 = vsel %vm2195_vm9, %v8547_v33, %v8920_v30  ;;  %v2892_v28 = vrot.slane %v8868_v23, 2 }
 0x8b5   : > { %v3536_v54 = vpop.permute.xlu1 %3535  ;;  %v3937_v16 = vsel %vm3919_vm12, %v3904_v40, %v9655_v50 }
 0x8b6   : > { %3743 = vrot.lane.b32.xlu0 %v2885_v37, %s6242_s23  ;;  %v4034_v52 = vsel %vm4017_vm14, %v4001_v38, %v3536_v54  ;;  %v3970_v26 = vsel %vm3952_vm13, %v3937_v16, %v8853_v60 }
 0x8b7   : > { %3553 = vrot.lane.b32.xlu1 %v2978_v35, %s6246_s27  ;;  %v4067_v32 = vsel %vm4050_vm15, %v4034_v52, %v8862_v61  ;;  %v2723_v61 = vld [vmem:[#allocation2 + $0x2a8] sm:$0xf] }
 0x8b8   : > { %v8930_v0 = vpop.permute.xlu0 %3251  ;;  %v2890_v53 = vrot.slane %v2723_v61, 2 }
 0x8b9   : > { %v8932_v17 = vpop.permute.xlu1 %3157 }
 0x8ba   : > { %3459 = vrot.lane.b32.xlu0 %v2885_v37, %s6245_s26  ;;  %v2891_v52 = vsel %vm2798_vm11, %v2889_v46, %v2890_v53 }
 0x8bb   : > { %3269 = vrot.lane.b32.xlu1 %v2978_v35, %s6240_s21  ;;  %v2984_v35 = vsel %vm295_vm1, %v2982_v7, %v2983_v42  ;;  %v2986_v42 = vrot.slane %v2723_v61, 4 }
 0x8bc   : > { %v3728_v10 = vpop.permute.xlu0 %3727 }
 0x8bd   : > { %v3538_v4 = vpop.permute.xlu1 %3537  ;;  %v4100_v47 = vsel %vm4083_vm3, %v4067_v32, %v3728_v10  ;;  %v3938_v32 = vsel %vm3919_vm12, %v3905_v51, %v8930_v0 }
 0x8be   : > { %3839 = vrot.lane.b32.xlu0 %v2981_v1, %s6243_s24  ;;  %v3971_v16 = vsel %vm3952_vm13, %v3938_v32, %v8874_v27  ;;  %v3906_v27 = vsel %vm2195_vm9, %v8550_v58, %v8932_v17  ;;  %v2727_v17 = vld [vmem:[#allocation2 + $0x2c8] sm:$0xf]  ;;  %v2729_v32 = vld [vmem:[#allocation2 + $0x2d8] sm:$0xf] }
 0x8bf   : > { %3745 = vrot.lane.b32.xlu1 %v2888_v3, %s6242_s23 }
 0x8c0   : > { %v3444_v8 = vpop.permute.xlu0 %3443 }
 0x8c1   : > { %v8950_v57 = vpop.permute.xlu1 %3253  ;;  %v4003_v33 = vsel %vm560_vm2, %v3971_v16, %v3444_v8  ;;  %v3028_v16 = vrot.slane %v8888_v9, 2 }
 0x8c2   : > { %3461 = vrot.lane.b32.xlu0 %v2888_v3, %s6245_s26  ;;  %v3939_v61 = vsel %vm3919_vm12, %v3906_v27, %v8950_v57 }
 0x8c3   : > { %3175 = vrot.lane.b32.xlu1 %v2885_v37, %s6239_s20  ;;  %v4002_v37 = vsel %vm560_vm2, %v3970_v26, %v3442_v36  ;;  %v3972_v58 = vsel %vm3952_vm13, %v3939_v61, %v8876_v13 }
 0x8c4   : > { %v3824_v62 = vpop.permute.xlu0 %3823  ;;  %v4035_v2 = vsel %vm4017_vm14, %v4002_v37, %v3538_v4 }
 0x8c5   : > { %v3730_v29 = vpop.permute.xlu1 %3729  ;;  %v4133_v54 = vsel %vm4116_vm4, %v4100_v47, %v3824_v62  ;;  %v4068_v36 = vsel %vm4050_vm15, %v4035_v2, %v8864_v18  ;;  %v2725_v18 = vld [vmem:[#allocation2 + $0x2b8] sm:$0xf] }
 0x8c6   : > { %5988 = vmatprep.mubr.msk.f32.mxu0 %vm198_vm0, %v4133_v54  ;;  %3841 = vrot.lane.b32.xlu0 %v2984_v35, %s6243_s24  ;;  %v4101_v49 = vsel %vm4083_vm3, %v4068_v36, %v3730_v29  ;;  %v2893_v40 = vrot.slane %v2725_v18, 2  ;;  %v2989_v26 = vrot.slane %v2725_v18, 4 }
 0x8c7   : > { %3555 = vrot.lane.b32.xlu1 %v2981_v1, %s6246_s27 }
 0x8c8   : > { %v3446_v41 = vpop.permute.xlu0 %3445  ;;  %v2894_v29 = vsel %vm2798_vm11, %v2892_v28, %v2893_v40 }
 0x8c9   : > { %v8971_v39 = vpop.permute.xlu1 %3159  ;;  %v8973_v20 = vpop.f32.mrb[32].mxu0 }
 0x8ca   : > { %v4489_v60 = vsel %vm2195_vm9, %v8973_v20, 0.0  ;;  %v8978_v15 = vpop.f32.mrb[33].mxu0  ;;  %3271 = vrot.lane.b32.xlu0 %v2981_v1, %s6240_s21 }
 0x8cb   : > { %v4488_v10 = vsel %vm2195_vm9, %v8978_v15, 0.0  ;;  %3177 = vrot.lane.b32.xlu1 %v2888_v3, %s6239_s20  ;;  %v2985_v3 = vrot.slane %v8866_v19, 4 }
 0x8cc   : > { %v4490_v55 = vadd.f32 %v4489_v60, %v4488_v10  ;;  %v3826_v4 = vpop.permute.xlu0 %3825  ;;  %v3025_v10 = vrot.slane %v8886_v21, 2 }
 0x8cd   : > { %v3540_v6 = vpop.permute.xlu1 %3539  ;;  %v4134_v38 = vsel %vm4116_vm4, %v4101_v49, %v3826_v4  ;;  %v2987_v50 = vsel %vm295_vm1, %v2985_v3, %v2986_v42 }
 0x8ce   : > { %5989 = vmatmul.mubr.msk.f32.gmra.mrb[48].mxu0 %vm198_vm0, %v4134_v38  ;;  %3747 = vrot.lane.b32.xlu0 %v2891_v52, %s6242_s23  ;;  %v4036_v30 = vsel %vm4017_vm14, %v4003_v33, %v3540_v6  ;;  %v3026_v6 = vrot.slane %v2727_v17, 2  ;;  %v3029_v33 = vrot.slane %v2729_v32, 2 }
 0x8cf   : > { %3557 = vrot.lane.b32.xlu1 %v2984_v35, %s6246_s27  ;;  %v4069_v8 = vsel %vm4050_vm15, %v4036_v30, %v8882_v22  ;;  %v4004_v22 = vsel %vm560_vm2, %v3972_v58, %v3446_v41  ;;  %v6221_v58 = vld [vmem:[#allocation2 + $0x2f8] sm:$0xf] }
 0x8d0   : > { %v8992_v1 = vpop.permute.xlu0 %3255  ;;  %v3027_v40 = vsel %vm2798_vm11, %v3025_v10, %v3026_v6  ;;  %v3030_v61 = vsel %vm2798_vm11, %v3028_v16, %v3029_v33  ;;  %v6223_v10 = vld [vmem:[#allocation2 + $0x2e8] sm:$0xf] }
 0x8d1   : > { %v8994_v7 = vpop.permute.xlu1 %3161  ;;  %v3114_v6 = vrot.slane %v6223_v10, 4 }
 0x8d2   : > { %3463 = vrot.lane.b32.xlu0 %v2891_v52, %s6245_s26 }
 0x8d3   : > { %3273 = vrot.lane.b32.xlu1 %v2984_v35, %s6240_s21  ;;  %v2988_v35 = vrot.slane %v8868_v23, 4 }
 0x8d4   : > { %v3732_v47 = vpop.permute.xlu0 %3731 }
 0x8d5   : > { %v3542_v62 = vpop.permute.xlu1 %3541  ;;  %v4102_v37 = vsel %vm4083_vm3, %v4069_v8, %v3732_v47  ;;  %v2990_v60 = vsel %vm295_vm1, %v2988_v35, %v2989_v26  ;;  %v3052_v8 = vrot.slane %v8888_v9, 4  ;;  %v3117_v9 = vrot.slane %v6221_v58, 4 }
 0x8d6   : > { %3843 = vrot.lane.b32.xlu0 %v2987_v50, %s6243_s24  ;;  %v4037_v57 = vsel %vm4017_vm14, %v4004_v22, %v3542_v62 }
 0x8d7   : > { %3749 = vrot.lane.b32.xlu1 %v2894_v29, %s6242_s23  ;;  %v4070_v38 = vsel %vm4050_vm15, %v4037_v57, %v8884_v25 }
 0x8d8   : > { %v3448_v0 = vpop.permute.xlu0 %3447 }
 0x8d9   : > { %v9013_v54 = vpop.permute.xlu1 %3257 }
 0x8da   : > { %3465 = vrot.lane.b32.xlu0 %v2894_v29, %s6245_s26 }
 0x8db   : > { %3179 = vrot.lane.b32.xlu1 %v2891_v52, %s6239_s20 }
 0x8dc   : > { %v3828_v2 = vpop.permute.xlu0 %3827 }
 0x8dd   : > { %v3734_v46 = vpop.permute.xlu1 %3733  ;;  %v4135_v53 = vsel %vm4116_vm4, %v4102_v37, %v3828_v2  ;;  %v3053_v2 = vrot.slane %v2729_v32, 4 }
 0x8de   : > { %5991 = vmatprep.mubr.msk.f32.mxu0 %vm198_vm0, %v4135_v53  ;;  %3845 = vrot.lane.b32.xlu0 %v2990_v60, %s6243_s24  ;;  %v4103_v52 = vsel %vm4083_vm3, %v4070_v38, %v3734_v46  ;;  %v3908_v46 = vsel %vm2195_vm9, %v8571_v48, %v8994_v7 }
 0x8df   : > { %3559 = vrot.lane.b32.xlu1 %v2987_v50, %s6246_s27 }
 0x8e0   : > { %v9035_v36 = vpop.permute.xlu0 %3449 }
 0x8e1   : > { %v3164_v49 = vpop.permute.xlu1 %3163  ;;  %v9038_v4 = vpop.f32.mrb[34].mxu0 }
 0x8e2   : > { %v9040_v13 = vpop.f32.mrb[35].mxu0  ;;  %3275 = vrot.lane.b32.xlu0 %v2987_v50, %s6240_s21  ;;  %v4493_v42 = vsel %vm2195_vm9, %v9038_v4, 0.0  ;;  %v3050_v50 = vrot.slane %v2727_v17, 4  ;;  %v6222_v17 = vld [vmem:[#allocation2 + $0x2e0] sm:$0xff]  ;;  %v3909_v57 = vsel %vm2195_vm9, %v8599_v31, %v3164_v49 }
 0x8e3   : > { %v4491_v41 = vsel %vm2195_vm9, %v9040_v13, 0.0  ;;  %3181 = vrot.lane.b32.xlu1 %v2894_v29, %s6239_s20  ;;  %v3907_v29 = vsel %vm2195_vm9, %v8567_v45, %v8971_v39  ;;  %v3113_v22 = vrot.slane %v6222_v17, 4  ;;  %v9661_v17 = vld [vmem:[#allocation53_spill] sm:$0xff] }
 0x8e4   : > { %v4492_v18 = vadd.f32 %v4491_v41, %v4490_v55  ;;  %v3830_v3 = vpop.permute.xlu0 %3829  ;;  %v3049_v55 = vrot.slane %v8886_v21, 4  ;;  %v3940_v30 = vsel %vm3919_vm12, %v3907_v29, %v8992_v1 }
 0x8e5   : > { %v3544_v51 = vpop.permute.xlu1 %3543  ;;  %v4136_v28 = vsel %vm4116_vm4, %v4103_v52, %v3830_v3  ;;  %v3973_v27 = vsel %vm3952_vm13, %v3940_v30, %v8894_v24  ;;  %v6220_v24 = vld [vmem:[#allocation2 + $0x2f0] sm:$0xff] }
 0x8e6   : > { %5992 = vmatmul.mubr.msk.f32.gmra.mrb[50].mxu0 %vm198_vm0, %v4136_v28  ;;  %3751 = vrot.lane.b32.xlu0 %v3027_v40, %s6242_s23  ;;  %v9055_v25 = vadd.f32 %v4493_v42, %v4492_v18  ;;  %v3051_v21 = vsel %vm295_vm1, %v3049_v55, %v3050_v50  ;;  %v4005_v45 = vsel %vm560_vm2, %v3973_v27, %v3448_v0  ;;  %v3116_v53 = vrot.slane %v6220_v24, 4 }
 0x8e7   : > { %3561 = vrot.lane.b32.xlu1 %v2990_v60, %s6246_s27  ;;  %v4038_v39 = vsel %vm4017_vm14, %v4005_v45, %v3544_v51  ;;  %v3941_v0 = vsel %vm3919_vm12, %v3908_v46, %v9013_v54  ;;  %v3115_v51 = vsel %vm295_vm1, %v3113_v22, %v3114_v6 }
 0x8e8   : > { %v3260_v47 = vpop.permute.xlu0 %3259  ;;  %v3974_v52 = vsel %vm3952_vm13, %v3941_v0, %v8897_v44  ;;  %v3118_v49 = vsel %vm295_vm1, %v3116_v53, %v3117_v9  ;;  %v9660_v0 = vld [vmem:[#allocation54_spill] sm:$0xff] }
 0x8e9   : > { %v3166_v62 = vpop.permute.xlu1 %3165  ;;  %v3942_v38 = vsel %vm3919_vm12, %v3909_v57, %v3260_v47  ;;  %v4006_v31 = vsel %vm560_vm2, %v3974_v52, %v9035_v36 }
 0x8ea   : > { %3467 = vrot.lane.b32.xlu0 %v3027_v40, %s6245_s26  ;;  %v3910_v18 = vsel %vm2195_vm9, %v8601_v59, %v3166_v62  ;;  %v3975_v42 = vsel %vm3952_vm13, %v3942_v38, %v8912_v56  ;;  %v9656_v62 = vld [vmem:[#allocation47_spill] sm:$0xff] }
 0x8eb   : > { %3277 = vrot.lane.b32.xlu1 %v2990_v60, %s6240_s21  ;;  %v4071_v60 = vsel %vm4050_vm15, %v4038_v39, %v8903_v11  ;;  %v3054_v11 = vsel %vm295_vm1, %v3052_v8, %v3053_v2 }
 0x8ec   : > { %v3736_v35 = vpop.permute.xlu0 %3735 }
 0x8ed   : > { %v3546_v26 = vpop.permute.xlu1 %3545  ;;  %v4104_v48 = vsel %vm4083_vm3, %v4071_v60, %v3736_v35  ;;  %v9657_v35 = vld [vmem:[#allocation49_spill] sm:$0xff] }
 0x8ee   : > { %3847 = vrot.lane.b32.xlu0 %v3051_v21, %s6243_s24  ;;  %v4039_v3 = vsel %vm4017_vm14, %v4006_v31, %v3546_v26 }
 0x8ef   : > { %3753 = vrot.lane.b32.xlu1 %v3030_v61, %s6242_s23  ;;  %v4072_v59 = vsel %vm4050_vm15, %v4039_v3, %v8906_v43 }
 0x8f0   : > { %v3452_v1 = vpop.permute.xlu0 %3451 }
 0x8f1   : > { %v3262_v37 = vpop.permute.xlu1 %3261  ;;  %v4007_v40 = vsel %vm560_vm2, %v3975_v42, %v3452_v1 }
 0x8f2   : > { %3563 = vrot.lane.b32.xlu0 %v3051_v21, %s6246_s27  ;;  %v3943_v28 = vsel %vm3919_vm12, %v3910_v18, %v3262_v37  ;;  %v9659_v37 = vld [vmem:[#allocation52_spill] sm:$0xff] }
 0x8f3   : > { %3469 = vrot.lane.b32.xlu1 %v3030_v61, %s6245_s26  ;;  %v3976_v29 = vsel %vm3952_vm13, %v3943_v28, %v8914_v63  ;;  %v9658_v63 = vld [vmem:[#allocation51_spill] sm:$0xff] }
 0x8f4   : > { %v3832_v7 = vpop.permute.xlu0 %3831 }
 0x8f5   : > { %v3738_v54 = vpop.permute.xlu1 %3737  ;;  %v4137_v41 = vsel %vm4116_vm4, %v4104_v48, %v3832_v7 }
 0x8f6   : > { %5994 = vmatprep.mubr.msk.f32.mxu0 %vm198_vm0, %v4137_v41  ;;  %3565 = vrot.lane.b32.xlu0 %v3054_v11, %s6246_s27  ;;  %v4105_v16 = vsel %vm4083_vm3, %v4072_v59, %v3738_v54 }
 0x8f7   : > { %3849 = vrot.lane.b32.xlu1 %v3054_v11, %s6243_s24 }
 0x8f8   : > { %v3454_v44 = vpop.permute.xlu0 %3453 }
 0x8f9   : > { %v3548_v36 = vpop.permute.xlu1 %3547  ;;  %v5972_v32 = vpop.f32.mrb[36].mxu0  ;;  %v4008_v43 = vsel %vm560_vm2, %v3976_v29, %v3454_v44 }
 0x8fa   : > { %v4040_v47 = vsel %vm4017_vm14, %v4007_v40, %v3548_v36  ;;  %v4349_v55 = vpop.f32.mrb[37].mxu0  ;;  %3853 = vrot.lane.b32.xlu0 %v3118_v49, %s6243_s24  ;;  %v4497_v21 = vsel %vm2195_vm9, %v5972_v32, 0.0 }
 0x8fb   : > { %v4073_v56 = vsel %vm4050_vm15, %v4040_v47, %v9656_v62  ;;  %v4495_v50 = vsel %vm2195_vm9, %v4349_v55, 0.0  ;;  %3851 = vrot.lane.b32.xlu1 %v3115_v51, %s6243_s24 }
 0x8fc   : > { %v4496_v33 = vadd.f32 %v4495_v50, %v9055_v25  ;;  %v3834_v30 = vpop.permute.xlu0 %3833  ;;  %v4106_v26 = vsel %vm4083_vm3, %v4073_v56, %v9657_v35 }
 0x8fd   : > { %v3550_v27 = vpop.permute.xlu1 %3549  ;;  %v4138_v61 = vsel %vm4116_vm4, %v4105_v16, %v3834_v30  ;;  %v5975_v45 = vpop.f32.mrb[38].mxu0  ;;  %v4139_v25 = vsel %vm4116_vm4, %v4106_v26, %v9658_v63 }
 0x8fe   : > { %v4041_v39 = vsel %vm4017_vm14, %v4008_v43, %v3550_v27  ;;  %v4359_v1 = vpop.f32.mrb[39].mxu0  ;;  %v4498_v8 = vadd.f32 %v4497_v21, %v4496_v33  ;;  %5995 = vmatmul.mubr.msk.f32.gmra.mrb[52].mxu0 %vm198_vm0, %v4138_v61  ;;  %v4501_v58 = vsel %vm2195_vm9, %v5975_v45, 0.0 }
 0x8ff   : > { %v4074_v2 = vsel %vm4050_vm15, %v4041_v39, %v9659_v37  ;;  %v4499_v46 = vsel %vm2195_vm9, %v4359_v1, 0.0  ;;  %5997 = vmatprep.mubr.msk.f32.mxu0 %vm198_vm0, %v4139_v25 }
 0x900   : > { %v4500_v24 = vadd.f32 %v4499_v46, %v4498_v8  ;;  %v9132_v53 = vpop.permute.xlu0 %3359  ;;  %v4107_v60 = vsel %vm4083_vm3, %v4074_v2, %v9660_v0 }
 0x901   : > { %v9137_v9 = vpop.permute.xlu1 %3361  ;;  %v4140_v22 = vsel %vm4116_vm4, %v4107_v60, %v9661_v17 }
 0x902   : > { %v4502_v57 = vadd.f32 %v4501_v58, %v4500_v24  ;;  %5998 = vmatmul.mubr.msk.f32.gmra.mrb[54].mxu0 %vm198_vm0, %v4140_v22 }
 0x904   : > { %v4503_v48 = vrot.slane %v4502_v57, 4  ;;  %v9142_v7 = vpop.permute.xlu0 %3647 }
 0x905   : > { %v9144_v10 = vpop.permute.xlu1 %3649 }
 0x906   : > { %v4504_v6 = vadd.f32 %v4503_v48, %v4502_v57 }
 0x908   : > { %v4505_v38 = vrot.slane %v4504_v6, 2  ;;  %v9146_v54 = vpop.permute.xlu0 %3363 }
 0x909   : > { %v9148_v41 = vpop.permute.xlu1 %3365 }
 0x90a   : > { %v4506_v11 = vadd.f32 %v4505_v38, %v4504_v6  ;;  %v6224_v6 = vld [vmem:[#allocation2 + $0x240] sm:$0xff]  ;;  %v9662_v38 = vld [vmem:[#allocation46_spill] sm:$0xff] }
 0x90c   : > { %v4507_v52 = vrot.slane %v4506_v11, 1  ;;  %v9150_v31 = vpop.permute.xlu0 %3651 }
 0x90d   : > { %v9152_v49 = vpop.permute.xlu1 %3653 }
 0x90e   : > { %v4508_v18 = vadd.f32 %v4507_v52, %v4506_v11  ;;  %v3911_v11 = vsel %vm2195_vm9, %v6224_v6, %v9662_v38 }
 0x910   : > { %v4572_v3 = vmul.f32 0.015625, %v4508_v18  ;;  %v9154_v42 = vpop.permute.xlu0 %3367 }
 0x911   : > { %v9156_v44 = vpop.permute.xlu1 %3369 }
 0x912   : > { %v9159_v51 = vsub.f32 %v8978_v15, %v4572_v3  ;;  %v9162_v28 = vsub.f32 %v8973_v20, %v4572_v3  ;;  %v9165_v40 = vsub.f32 %v9040_v13, %v4572_v3  ;;  %v9168_v36 = vsub.f32 %v9038_v4, %v4572_v3 }
 0x913   : > { %v9170_v47 = vsub.f32 %v4349_v55, %v4572_v3  ;;  %v9172_v59 = vsub.f32 %v5972_v32, %v4572_v3  ;;  %v9174_v62 = vsub.f32 %v4359_v1, %v4572_v3  ;;  %v9176_v56 = vsub.f32 %v5975_v45, %v4572_v3  ;;  %v9663_v3 = vld [vmem:[#allocation45_spill] sm:$0xff] }
 0x914   : > { %v4608_v15 = vmul.f32 %v9159_v51, %v9159_v51  ;;  %v4609_v20 = vmul.f32 %v9162_v28, %v9162_v28  ;;  %v4610_v13 = vmul.f32 %v9165_v40, %v9165_v40  ;;  %v9184_v50 = vpop.permute.xlu0 %3655  ;;  %v4611_v32 = vmul.f32 %v9168_v36, %v9168_v36 }
 0x915   : > { %v9186_v4 = vpop.permute.xlu1 %3657  ;;  %v4612_v33 = vmul.f32 %v9170_v47, %v9170_v47  ;;  %v4613_v21 = vmul.f32 %v9172_v59, %v9172_v59  ;;  %v4614_v45 = vmul.f32 %v9174_v62, %v9174_v62  ;;  %v4615_v25 = vmul.f32 %v9176_v56, %v9176_v56 }
 0x916   : > { %v4640_v55 = vsel %vm2195_vm9, %v4608_v15, 0.0  ;;  %v4641_v16 = vsel %vm2195_vm9, %v4609_v20, 0.0  ;;  %v4643_v30 = vsel %vm2195_vm9, %v4610_v13, 0.0  ;;  %v4645_v27 = vsel %vm2195_vm9, %v4611_v32, 0.0 }
 0x917   : > { %v4642_v29 = vadd.f32 %v4641_v16, %v4640_v55  ;;  %v4647_v39 = vsel %vm2195_vm9, %v4612_v33, 0.0  ;;  %v4649_v37 = vsel %vm2195_vm9, %v4613_v21, 0.0  ;;  %v4651_v46 = vsel %vm2195_vm9, %v4614_v45, 0.0  ;;  %v6225_v21 = vld [vmem:[#allocation2 + $0x250] sm:$0xff] }
 0x918   : > { %v9195_v35 = vpop.permute.xlu0 %3371  ;;  %v4653_v58 = vsel %vm2195_vm9, %v4615_v25, 0.0  ;;  %v3944_v15 = vsel %vm3919_vm12, %v3911_v11, %v9663_v3 }
 0x919   : > { %v4644_v26 = vadd.f32 %v4643_v30, %v4642_v29  ;;  %v9197_v43 = vpop.permute.xlu1 %3373  ;;  %v3977_v32 = vsel %vm3952_vm13, %v3944_v15, %v9132_v53  ;;  %v9665_v53 = vld [vmem:[#allocation50_spill] sm:$0xff] }
 0x91b   : > { %v4646_v61 = vadd.f32 %v4645_v27, %v4644_v26  ;;  %v9664_v27 = vld [vmem:[#allocation48_spill] sm:$0xff] }
 0x91c   : > { %v3456_v1 = vpop.permute.xlu0 %3455 }
 0x91d   : > { %v4648_v8 = vadd.f32 %v4647_v39, %v4646_v61  ;;  %v3172_v63 = vpop.permute.xlu1 %3171  ;;  %v4009_v16 = vsel %vm560_vm2, %v3977_v32, %v3456_v1  ;;  %v3912_v61 = vsel %vm2195_vm9, %v6225_v21, %v9664_v27 }
 0x91f   : > { %v4650_v2 = vadd.f32 %v4649_v37, %v4648_v8  ;;  %v3945_v37 = vsel %vm3919_vm12, %v3912_v61, %v9665_v53 }
 0x920   : > { %v3458_v24 = vpop.permute.xlu0 %3457 }
 0x921   : > { %v4652_v0 = vadd.f32 %v4651_v46, %v4650_v2  ;;  %v3552_v60 = vpop.permute.xlu1 %3551 }
 0x922   : > { %v4042_v29 = vsel %vm4017_vm14, %v4009_v16, %v3552_v60 }
 0x923   : > { %v4654_v17 = vadd.f32 %v4653_v58, %v4652_v0  ;;  %v4075_v39 = vsel %vm4050_vm15, %v4042_v29, %v9142_v7  ;;  %v3978_v0 = vsel %vm3952_vm13, %v3945_v37, %v9137_v9 }
 0x924   : > { %v3268_v22 = vpop.permute.xlu0 %3267  ;;  %v4010_v58 = vsel %vm560_vm2, %v3978_v0, %v3458_v24 }
 0x925   : > { %v4655_v57 = vrot.slane %v4654_v17, 4  ;;  %v3174_v48 = vpop.permute.xlu1 %3173 }
 0x927   : > { %v4656_v52 = vadd.f32 %v4655_v57, %v4654_v17 }
 0x928   : > { %v3744_v18 = vpop.permute.xlu0 %3743 }
 0x929   : > { %v4657_v20 = vrot.slane %v4656_v52, 2  ;;  %v3554_v13 = vpop.permute.xlu1 %3553  ;;  %v4108_v8 = vsel %vm4083_vm3, %v4075_v39, %v3744_v18 }
 0x92a   : > { %v4043_v7 = vsel %vm4017_vm14, %v4010_v58, %v3554_v13  ;;  %v3914_v13 = vsel %vm2195_vm9, %v8817_v34, %v3174_v48 }
 0x92b   : > { %v4658_v55 = vadd.f32 %v4657_v20, %v4656_v52  ;;  %v4076_v9 = vsel %vm4050_vm15, %v4043_v7, %v9144_v10  ;;  %v3913_v10 = vsel %vm2195_vm9, %v8814_v12, %v3172_v63 }
 0x92c   : > { %v3460_v33 = vpop.permute.xlu0 %3459 }
 0x92d   : > { %v4659_v30 = vrot.slane %v4658_v55, 1  ;;  %v3270_v26 = vpop.permute.xlu1 %3269 }
 0x92e   : > { %v3947_v32 = vsel %vm3919_vm12, %v3914_v13, %v3270_v26 }
 0x92f   : > { %v4660_v45 = vadd.f32 %v4659_v30, %v4658_v55  ;;  %v3946_v30 = vsel %vm3919_vm12, %v3913_v10, %v3268_v22  ;;  %v3980_v21 = vsel %vm3952_vm13, %v3947_v32, %v9148_v41 }
 0x930   : > { %v3840_v25 = vpop.permute.xlu0 %3839  ;;  %v3979_v41 = vsel %vm3952_vm13, %v3946_v30, %v9146_v54 }
 0x931   : > { %v4724_v1 = vmul.f32 0.015625, %v4660_v45  ;;  %v3746_v2 = vpop.permute.xlu1 %3745  ;;  %v4141_v46 = vsel %vm4116_vm4, %v4108_v8, %v3840_v25 }
 0x932   : > { %6000 = vmatprep.mubr.msk.f32.mxu0 %vm198_vm0, %v4141_v46  ;;  %v4109_v24 = vsel %vm4083_vm3, %v4076_v9, %v3746_v2 }
 0x933   : > { %v4728_v60 = vadd.f32 1e-05, %v4724_v1 }
 0x934   : > { %v3462_v17 = vpop.permute.xlu0 %3461 }
 0x935   : > { %6204 = vrsqrt.f32 %v4728_v60  ;;  %v3176_v57 = vpop.permute.xlu1 %3175  ;;  %v9231_v6 = vpop.f32.mrb[40].mxu0  ;;  %v4012_v26 = vsel %vm560_vm2, %v3980_v21, %v3462_v17 }
 0x936   : > { %v4510_v38 = vsel %vm2195_vm9, %v9231_v6, 0.0  ;;  %v9235_v11 = vpop.f32.mrb[41].mxu0  ;;  %v3915_v60 = vsel %vm2195_vm9, %v8834_v14, %v3176_v57 }
 0x937   : > { %v4509_v52 = vsel %vm2195_vm9, %v9235_v11, 0.0 }
 0x938   : > { %v4511_v18 = vadd.f32 %v4510_v38, %v4509_v52  ;;  %v3842_v3 = vpop.permute.xlu0 %3841 }
 0x939   : > { %v3556_v15 = vpop.permute.xlu1 %3555  ;;  %v4142_v20 = vsel %vm4116_vm4, %v4109_v24, %v3842_v3 }
 0x93a   : > { %6001 = vmatmul.mubr.msk.f32.gmra.mrb[56].mxu0 %vm198_vm0, %v4142_v20 }
 0x93c   : > { %v3272_v55 = vpop.permute.xlu0 %3271 }
 0x93d   : > { %v9247_v16 = vpop.permute.xlu1 %3177  ;;  %v3948_v58 = vsel %vm3919_vm12, %v3915_v60, %v3272_v55 }
 0x93e   : > { %v3981_v24 = vsel %vm3952_vm13, %v3948_v58, %v9154_v42  ;;  %v9668_v58 = vld [vmem:[#allocation57_spill] sm:$0xff] }
 0x93f   : > { %v6205_v29 = vpop.eup %6204 }
 0x940   : > { %v4742_v27 = vmul.f32 %v6205_v29, %v9174_v62  ;;  %v3748_v61 = vpop.permute.xlu0 %3747  ;;  %v4736_v45 = vmul.f32 %v6205_v29, %v9159_v51  ;;  %v4737_v34 = vmul.f32 %v6205_v29, %v9162_v28  ;;  %v4738_v48 = vmul.f32 %v6205_v29, %v9165_v40 }
 0x941   : > { %v3558_v39 = vpop.permute.xlu1 %3557  ;;  %v4739_v12 = vmul.f32 %v6205_v29, %v9168_v36  ;;  %v4740_v63 = vmul.f32 %v6205_v29, %v9170_v47  ;;  %v4741_v22 = vmul.f32 %v6205_v29, %v9172_v59  ;;  %v4011_v28 = vsel %vm560_vm2, %v3979_v41, %v3460_v33 }
 0x942   : > { %v4045_v62 = vsel %vm4017_vm14, %v4012_v26, %v3558_v39  ;;  %v4768_v8 = vmax.f32 %v4736_v45, 0.0  ;;  %v4769_v51 = vmax.f32 %v4737_v34, 0.0  ;;  %v4044_v25 = vsel %vm4017_vm14, %v4011_v28, %v3556_v15 }
 0x943   : > { %v4078_v40 = vsel %vm4050_vm15, %v4045_v62, %v9152_v49  ;;  %v4770_v47 = vmax.f32 %v4738_v48, 0.0  ;;  %v4743_v59 = vmul.f32 %v6205_v29, %v9176_v56  ;;  %v4077_v54 = vsel %vm4050_vm15, %v4044_v25, %v9150_v31 }
 0x944   : > { %6014 = vmatprep.mubr.msk.f32.mxu1 %vm2195_vm9, %v4768_v8  ;;  %v3464_v36 = vpop.permute.xlu0 %3463  ;;  %v4771_v33 = vmax.f32 %v4739_v12, 0.0  ;;  %v4110_v37 = vsel %vm4083_vm3, %v4077_v54, %v3748_v61  ;;  %v4772_v1 = vmax.f32 %v4740_v63, 0.0  ;;  %v4773_v56 = vmax.f32 %v4741_v22, 0.0 }
 0x945   : > { %v3274_v53 = vpop.permute.xlu1 %3273  ;;  %6015 = vmatmul.mubr.msk.f32.vlgmr.msra.gmra.mrb[36].mxu1 %vm2195_vm9, %v4769_v51  ;;  %v4774_v0 = vmax.f32 %v4742_v27, 0.0  ;;  %v4775_v52 = vmax.f32 %v4743_v59, 0.0  ;;  %v4013_v15 = vsel %vm560_vm2, %v3981_v24, %v3464_v36  ;;  %v3916_v45 = vsel %vm2195_vm9, %v8838_v5, %v9247_v16 }
 0x946   : > { %6017 = vmatprep.mubr.msk.f32.mxu1 %vm2195_vm9, %v4770_v47  ;;  %v3949_v34 = vsel %vm3919_vm12, %v3916_v45, %v3274_v53 }
 0x947   : > { %v3982_v22 = vsel %vm3952_vm13, %v3949_v34, %v9156_v44 }
 0x948   : > { %v3844_v49 = vpop.permute.xlu0 %3843 }
 0x949   : > { %v3750_v2 = vpop.permute.xlu1 %3749  ;;  %v4143_v46 = vsel %vm4116_vm4, %v4110_v37, %v3844_v49  ;;  %6018 = vmatmul.mubr.msk.f32.gmra.mrb[38].mxu1 %vm2195_vm9, %v4771_v33 }
 0x94a   : > { %6003 = vmatprep.mubr.msk.f32.mxu0 %vm198_vm0, %v4143_v46  ;;  %6020 = vmatprep.mubr.msk.f32.mxu1 %vm2195_vm9, %v4772_v1  ;;  %v4111_v14 = vsel %vm4083_vm3, %v4078_v40, %v3750_v2 }
 0x94c   : > { %v3466_v31 = vpop.permute.xlu0 %3465 }
 0x94d   : > { %v3180_v7 = vpop.permute.xlu1 %3179  ;;  %v9283_v17 = vpop.f32.mrb[42].mxu0  ;;  %6021 = vmatmul.mubr.msk.f32.gmra.mrb[40].mxu1 %vm2195_vm9, %v4773_v56  ;;  %v4014_v16 = vsel %vm560_vm2, %v3982_v22, %v3466_v31  ;;  %v9667_v56 = vld [vmem:[#allocation55_spill] sm:$0xff] }
 0x94e   : > { %v9286_v38 = vpop.f32.mrb[43].mxu0  ;;  %6023 = vmatprep.mubr.msk.f32.mxu1 %vm2195_vm9, %v4774_v0  ;;  %v4514_v20 = vsel %vm2195_vm9, %v9283_v17, 0.0  ;;  %v3917_v39 = vsel %vm2195_vm9, %v8866_v19, %v3180_v7 }
 0x94f   : > { %v4512_v9 = vsel %vm2195_vm9, %v9286_v38, 0.0 }
 0x950   : > { %v4513_v57 = vadd.f32 %v4512_v9, %v4511_v18  ;;  %v3846_v3 = vpop.permute.xlu0 %3845 }
 0x951   : > { %v3560_v13 = vpop.permute.xlu1 %3559  ;;  %v4144_v32 = vsel %vm4116_vm4, %v4111_v14, %v3846_v3  ;;  %6024 = vmatmul.mubr.msk.f32.gmra.mrb[42].mxu1 %vm2195_vm9, %v4775_v52 }
 0x952   : > { %v4046_v55 = vsel %vm4017_vm14, %v4013_v15, %v3560_v13  ;;  %6004 = vmatmul.mubr.msk.f32.gmra.mrb[58].mxu0 %vm198_vm0, %v4144_v32  ;;  %v4515_v10 = vadd.f32 %v4514_v20, %v4513_v57  ;;  %v9669_v57 = vld [vmem:[#allocation58_spill] sm:$0xff] }
 0x953   : > { %v4079_v42 = vsel %vm4050_vm15, %v4046_v55, %v9184_v50 }
 0x954   : > { %v3276_v18 = vpop.permute.xlu0 %3275 }
 0x955   : > { %v3182_v29 = vpop.permute.xlu1 %3181  ;;  %v3950_v63 = vsel %vm3919_vm12, %v3917_v39, %v3276_v18 }
 0x956   : > { %v3918_v5 = vsel %vm2195_vm9, %v8868_v23, %v3182_v29  ;;  %v3983_v8 = vsel %vm3952_vm13, %v3950_v63, %v9195_v35 }
 0x958   : > { %v3752_v30 = vpop.permute.xlu0 %3751 }
 0x959   : > { %v3562_v21 = vpop.permute.xlu1 %3561  ;;  %v4112_v48 = vsel %vm4083_vm3, %v4079_v42, %v3752_v30 }
 0x95a   : > { %v4047_v19 = vsel %vm4017_vm14, %v4014_v16, %v3562_v21 }
 0x95b   : > { %v4080_v47 = vsel %vm4050_vm15, %v4047_v19, %v9186_v4 }
 0x95c   : > { %v3468_v27 = vpop.permute.xlu0 %3467 }
 0x95d   : > { %v3278_v61 = vpop.permute.xlu1 %3277  ;;  %v4015_v40 = vsel %vm560_vm2, %v3983_v8, %v3468_v27 }
 0x95e   : > { %v3951_v41 = vsel %vm3919_vm12, %v3918_v5, %v3278_v61 }
 0x95f   : > { %v3984_v44 = vsel %vm3952_vm13, %v3951_v41, %v9197_v43  ;;  %v9666_v43 = vld [vmem:[#allocation56_spill] sm:$0xff] }
 0x960   : > { %v3848_v26 = vpop.permute.xlu0 %3847 }
 0x961   : > { %v3754_v12 = vpop.permute.xlu1 %3753  ;;  %v4145_v50 = vsel %vm4116_vm4, %v4112_v48, %v3848_v26 }
 0x962   : > { %6006 = vmatprep.mubr.msk.f32.mxu0 %vm198_vm0, %v4145_v50  ;;  %v4113_v35 = vsel %vm4083_vm3, %v4080_v47, %v3754_v12 }
 0x964   : > { %v3564_v62 = vpop.permute.xlu0 %3563 }
 0x965   : > { %v3470_v51 = vpop.permute.xlu1 %3469  ;;  %v5984_v28 = vpop.f32.mrb[44].mxu0  ;;  %v4048_v23 = vsel %vm4017_vm14, %v4015_v40, %v3564_v62 }
 0x966   : > { %v4389_v25 = vpop.f32.mrb[45].mxu0  ;;  %v4016_v59 = vsel %vm560_vm2, %v3984_v44, %v3470_v51  ;;  %v4518_v33 = vsel %vm2195_vm9, %v5984_v28, 0.0  ;;  %v4081_v2 = vsel %vm4050_vm15, %v4048_v23, %v9666_v43 }
 0x967   : > { %v4516_v36 = vsel %vm2195_vm9, %v4389_v25, 0.0  ;;  %v4114_v3 = vsel %vm4083_vm3, %v4081_v2, %v9669_v57 }
 0x968   : > { %v4517_v53 = vadd.f32 %v4516_v36, %v4515_v10  ;;  %v3566_v54 = vpop.permute.xlu0 %3565 }
 0x969   : > { %v3850_v37 = vpop.permute.xlu1 %3849  ;;  %v4049_v49 = vsel %vm4017_vm14, %v4016_v59, %v3566_v54  ;;  %v5987_v1 = vpop.f32.mrb[46].mxu0 }
 0x96a   : > { %v4146_v46 = vsel %vm4116_vm4, %v4113_v35, %v3850_v37  ;;  %v4082_v4 = vsel %vm4050_vm15, %v4049_v49, %v9667_v56  ;;  %v4399_v0 = vpop.f32.mrb[47].mxu0  ;;  %v4519_v60 = vadd.f32 %v4518_v33, %v4517_v53  ;;  %v4522_v24 = vsel %vm2195_vm9, %v5987_v1, 0.0 }
 0x96b   : > { %v4520_v31 = vsel %vm2195_vm9, %v4399_v0, 0.0  ;;  %6007 = vmatmul.mubr.msk.f32.gmra.mrb[60].mxu0 %vm198_vm0, %v4146_v46  ;;  %v4115_v7 = vsel %vm4083_vm3, %v4082_v4, %v9668_v58 }
 0x96c   : > { %v4521_v9 = vadd.f32 %v4520_v31, %v4519_v60  ;;  %v3854_v52 = vpop.permute.xlu0 %3853 }
 0x96d   : > { %v3852_v14 = vpop.permute.xlu1 %3851  ;;  %v4148_v15 = vsel %vm4116_vm4, %v4115_v7, %v3854_v52 }
 0x96e   : > { %v4523_v20 = vadd.f32 %v4522_v24, %v4521_v9  ;;  %v4147_v13 = vsel %vm4116_vm4, %v4114_v3, %v3852_v14 }
 0x96f   : > { %6009 = vmatprep.mubr.msk.f32.mxu0 %vm198_vm0, %v4147_v13 }
 0x970   : > { %v4524_v32 = vrot.slane %v4523_v20, 4  ;;  %6010 = vmatmul.mubr.msk.f32.gmra.mrb[62].mxu0 %vm198_vm0, %v4148_v15  ;;  %vm5452_vm0 = vcmask 523264  }
 0x972   : > { %v4525_v55 = vadd.f32 %v4524_v32, %v4523_v20 }
 0x974   : > { %v4526_v10 = vrot.slane %v4525_v55, 2 }
 0x976   : > { %v4527_v42 = vadd.f32 %v4526_v10, %v4525_v55 }
 0x978   : > { %v4528_v18 = vrot.slane %v4527_v42, 1 }
 0x97a   : > { %v4529_v29 = vadd.f32 %v4528_v18, %v4527_v42 }
 0x97c   : > { %v4573_v30 = vmul.f32 0.015625, %v4529_v29 }
 0x97e   : > { %v4584_v21 = vsub.f32 %v9235_v11, %v4573_v30  ;;  %v4585_v27 = vsub.f32 %v9231_v6, %v4573_v30  ;;  %v4586_v61 = vsub.f32 %v9286_v38, %v4573_v30  ;;  %v4587_v45 = vsub.f32 %v9283_v17, %v4573_v30 }
 0x97f   : > { %v4588_v34 = vsub.f32 %v4389_v25, %v4573_v30  ;;  %v4589_v48 = vsub.f32 %v5984_v28, %v4573_v30  ;;  %v4590_v26 = vsub.f32 %v4399_v0, %v4573_v30  ;;  %v4591_v39 = vsub.f32 %v5987_v1, %v4573_v30 }
 0x980   : > { %v4616_v12 = vmul.f32 %v4584_v21, %v4584_v21  ;;  %v4617_v50 = vmul.f32 %v4585_v27, %v4585_v27  ;;  %v4618_v63 = vmul.f32 %v4586_v61, %v4586_v61  ;;  %v4619_v22 = vmul.f32 %v4587_v45, %v4587_v45 }
 0x981   : > { %v4620_v11 = vmul.f32 %v4588_v34, %v4588_v34  ;;  %v4621_v38 = vmul.f32 %v4589_v48, %v4589_v48  ;;  %v4622_v8 = vmul.f32 %v4590_v26, %v4590_v26  ;;  %v4623_v40 = vmul.f32 %v4591_v39, %v4591_v39 }
 0x982   : > { %v4661_v5 = vsel %vm2195_vm9, %v4616_v12, 0.0  ;;  %v4662_v16 = vsel %vm2195_vm9, %v4617_v50, 0.0  ;;  %v4664_v6 = vsel %vm2195_vm9, %v4618_v63, 0.0  ;;  %v4666_v17 = vsel %vm2195_vm9, %v4619_v22, 0.0 }
 0x983   : > { %v4663_v41 = vadd.f32 %v4662_v16, %v4661_v5  ;;  %v4668_v51 = vsel %vm2195_vm9, %v4620_v11, 0.0  ;;  %v4670_v25 = vsel %vm2195_vm9, %v4621_v38, 0.0  ;;  %v4672_v23 = vsel %vm2195_vm9, %v4622_v8, 0.0 }
 0x984   : > { %v4674_v47 = vsel %vm2195_vm9, %v4623_v40, 0.0 }
 0x985   : > { %v4665_v62 = vadd.f32 %v4664_v6, %v4663_v41 }
 0x987   : > { %v4667_v19 = vadd.f32 %v4666_v17, %v4665_v62 }
 0x989   : > { %v4669_v28 = vadd.f32 %v4668_v51, %v4667_v19 }
 0x98b   : > { %v4671_v44 = vadd.f32 %v4670_v25, %v4669_v28 }
 0x98d   : > { %v4673_v36 = vadd.f32 %v4672_v23, %v4671_v44 }
 0x98f   : > { %v4675_v59 = vadd.f32 %v4674_v47, %v4673_v36 }
 0x991   : > { %v4676_v53 = vrot.slane %v4675_v59, 4 }
 0x993   : > { %v4677_v54 = vadd.f32 %v4676_v53, %v4675_v59 }
 0x995   : > { %v4678_v35 = vrot.slane %v4677_v54, 2 }
 0x997   : > { %v4679_v33 = vadd.f32 %v4678_v35, %v4677_v54 }
 0x999   : > { %v4680_v37 = vrot.slane %v4679_v33, 1 }
 0x99b   : > { %v4681_v49 = vadd.f32 %v4680_v37, %v4679_v33 }
 0x99d   : > { %v4725_v1 = vmul.f32 0.015625, %v4681_v49 }
 0x99f   : > { %v4729_v43 = vadd.f32 1e-05, %v4725_v1 }
 0x9a1   : > { %6206 = vrsqrt.f32 %v4729_v43  ;;  %v5990_v2 = vpop.f32.mrb[48].mxu0 }
 0x9a2   : > { %v4531_v46 = vsel %vm2195_vm9, %v5990_v2, 0.0  ;;  %v4409_v56 = vpop.f32.mrb[49].mxu0 }
 0x9a3   : > { %v4530_v4 = vsel %vm2195_vm9, %v4409_v56, 0.0 }
 0x9a4   : > { %v4532_v0 = vadd.f32 %v4531_v46, %v4530_v4 }
 0x9ab   : > { %v6207_v60 = vpop.eup %6206 }
 0x9ac   : > { %v4750_v31 = vmul.f32 %v6207_v60, %v4590_v26  ;;  %v4744_v58 = vmul.f32 %v6207_v60, %v4584_v21  ;;  %v4745_v7 = vmul.f32 %v6207_v60, %v4585_v27  ;;  %v4746_v9 = vmul.f32 %v6207_v60, %v4586_v61 }
 0x9ad   : > { %v4747_v52 = vmul.f32 %v6207_v60, %v4587_v45  ;;  %v4748_v24 = vmul.f32 %v6207_v60, %v4588_v34  ;;  %v4749_v14 = vmul.f32 %v6207_v60, %v4589_v48  ;;  %v4751_v57 = vmul.f32 %v6207_v60, %v4591_v39 }
 0x9ae   : > { %v4776_v3 = vmax.f32 %v4744_v58, 0.0  ;;  %v4777_v15 = vmax.f32 %v4745_v7, 0.0  ;;  %v4778_v20 = vmax.f32 %v4746_v9, 0.0  ;;  %v4782_v10 = vmax.f32 %v4750_v31, 0.0 }
 0x9af   : > { %v4779_v13 = vmax.f32 %v4747_v52, 0.0  ;;  %v4780_v32 = vmax.f32 %v4748_v24, 0.0  ;;  %v4781_v55 = vmax.f32 %v4749_v14, 0.0  ;;  %v4783_v30 = vmax.f32 %v4751_v57, 0.0 }
 0x9b0   : > { %6026 = vmatprep.mubr.msk.f32.mxu1 %vm2195_vm9, %v4776_v3 }
 0x9b1   : > { %6027 = vmatmul.mubr.msk.f32.gmra.mrb[44].mxu1 %vm2195_vm9, %v4777_v15 }
 0x9b2   : > { %6029 = vmatprep.mubr.msk.f32.mxu1 %vm2195_vm9, %v4778_v20 }
 0x9b5   : > { %6030 = vmatmul.mubr.msk.f32.gmra.mrb[46].mxu1 %vm2195_vm9, %v4779_v13 }
 0x9b6   : > { %6032 = vmatprep.mubr.msk.f32.mxu1 %vm2195_vm9, %v4780_v32 }
 0x9b9   : > { %v5993_v42 = vpop.f32.mrb[50].mxu0  ;;  %6033 = vmatmul.mubr.msk.f32.gmra.mrb[48].mxu1 %vm2195_vm9, %v4781_v55 }
 0x9ba   : > { %v4419_v18 = vpop.f32.mrb[51].mxu0  ;;  %6035 = vmatprep.mubr.msk.f32.mxu1 %vm2195_vm9, %v4782_v10  ;;  %v4535_v27 = vsel %vm2195_vm9, %v5993_v42, 0.0 }
 0x9bb   : > { %v4533_v29 = vsel %vm2195_vm9, %v4419_v18, 0.0 }
 0x9bc   : > { %v4534_v21 = vadd.f32 %v4533_v29, %v4532_v0 }
 0x9bd   : > { %6036 = vmatmul.mubr.msk.f32.gmra.mrb[50].mxu1 %vm2195_vm9, %v4783_v30 }
 0x9be   : > { %v4536_v61 = vadd.f32 %v4535_v27, %v4534_v21 }
 0x9d1   : > { %v5996_v45 = vpop.f32.mrb[52].mxu0 }
 0x9d2   : > { %v4429_v34 = vpop.f32.mrb[53].mxu0  ;;  %v4539_v39 = vsel %vm2195_vm9, %v5996_v45, 0.0 }
 0x9d3   : > { %v4537_v48 = vsel %vm2195_vm9, %v4429_v34, 0.0 }
 0x9d4   : > { %v4538_v26 = vadd.f32 %v4537_v48, %v4536_v61 }
 0x9d5   : > { %v5999_v12 = vpop.f32.mrb[54].mxu0 }
 0x9d6   : > { %v4439_v50 = vpop.f32.mrb[55].mxu0  ;;  %v4540_v63 = vadd.f32 %v4539_v39, %v4538_v26  ;;  %v4543_v16 = vsel %vm2195_vm9, %v5999_v12, 0.0 }
 0x9d7   : > { %v4541_v22 = vsel %vm2195_vm9, %v4439_v50, 0.0 }
 0x9d8   : > { %v4542_v5 = vadd.f32 %v4541_v22, %v4540_v63 }
 0x9da   : > { %v4544_v41 = vadd.f32 %v4543_v16, %v4542_v5 }
 0x9dc   : > { %v4545_v11 = vrot.slane %v4544_v41, 4 }
 0x9de   : > { %v4546_v6 = vadd.f32 %v4545_v11, %v4544_v41  ;;  %v9671_v41 = vld [vmem:[#allocation5_spill] sm:$0xff] }
 0x9e0   : > { %v4547_v62 = vrot.slane %v4546_v6, 2 }
 0x9e2   : > { %v4548_v38 = vadd.f32 %v4547_v62, %v4546_v6 }
 0x9e4   : > { %v4549_v17 = vrot.slane %v4548_v38, 1 }
 0x9e6   : > { %v4550_v19 = vadd.f32 %v4549_v17, %v4548_v38 }
 0x9e8   : > { %v4574_v8 = vmul.f32 0.015625, %v4550_v19 }
 0x9ea   : > { %v4592_v51 = vsub.f32 %v4409_v56, %v4574_v8  ;;  %v4593_v28 = vsub.f32 %v5990_v2, %v4574_v8  ;;  %v4594_v40 = vsub.f32 %v4419_v18, %v4574_v8  ;;  %v4595_v25 = vsub.f32 %v5993_v42, %v4574_v8 }
 0x9eb   : > { %v4596_v44 = vsub.f32 %v4429_v34, %v4574_v8  ;;  %v4597_v23 = vsub.f32 %v5996_v45, %v4574_v8  ;;  %v4598_v36 = vsub.f32 %v4439_v50, %v4574_v8  ;;  %v4599_v47 = vsub.f32 %v5999_v12, %v4574_v8  ;;  %v9670_v12 = vld [vmem:[#allocation4_spill] sm:$0xff] }
 0x9ec   : > { %v4624_v59 = vmul.f32 %v4592_v51, %v4592_v51  ;;  %v4625_v53 = vmul.f32 %v4593_v28, %v4593_v28  ;;  %v4626_v54 = vmul.f32 %v4594_v40, %v4594_v40  ;;  %v4627_v35 = vmul.f32 %v4595_v25, %v4595_v25 }
 0x9ed   : > { %v4628_v1 = vmul.f32 %v4596_v44, %v4596_v44  ;;  %v4629_v2 = vmul.f32 %v4597_v23, %v4597_v23  ;;  %v4630_v0 = vmul.f32 %v4598_v36, %v4598_v36  ;;  %v4631_v58 = vmul.f32 %v4599_v47, %v4599_v47 }
 0x9ee   : > { %v4682_v33 = vsel %vm2195_vm9, %v4624_v59, 0.0  ;;  %v4683_v37 = vsel %vm2195_vm9, %v4625_v53, 0.0  ;;  %v4685_v43 = vsel %vm2195_vm9, %v4626_v54, 0.0  ;;  %v4687_v56 = vsel %vm2195_vm9, %v4627_v35, 0.0  ;;  %v9674_v54 = vld [vmem:[#allocation8_spill] sm:$0xff] }
 0x9ef   : > { %v4684_v49 = vadd.f32 %v4683_v37, %v4682_v33  ;;  %v4689_v60 = vsel %vm2195_vm9, %v4628_v1, 0.0  ;;  %v4691_v7 = vsel %vm2195_vm9, %v4629_v2, 0.0  ;;  %v4693_v52 = vsel %vm2195_vm9, %v4630_v0, 0.0  ;;  %v9676_v2 = vld [vmem:[#allocation10_spill] sm:$0xff] }
 0x9f0   : > { %v4695_v14 = vsel %vm2195_vm9, %v4631_v58, 0.0 }
 0x9f1   : > { %v4686_v46 = vadd.f32 %v4685_v43, %v4684_v49 }
 0x9f3   : > { %v4688_v4 = vadd.f32 %v4687_v56, %v4686_v46 }
 0x9f5   : > { %v4690_v31 = vadd.f32 %v4689_v60, %v4688_v4  ;;  %v9677_v60 = vld [vmem:[#allocation11_spill] sm:$0xff] }
 0x9f7   : > { %v4692_v9 = vadd.f32 %v4691_v7, %v4690_v31 }
 0x9f9   : > { %v4694_v24 = vadd.f32 %v4693_v52, %v4692_v9 }
 0x9fb   : > { %v4696_v57 = vadd.f32 %v4695_v14, %v4694_v24 }
 0x9fd   : > { %v4697_v3 = vrot.slane %v4696_v57, 4 }
 0x9ff   : > { %v4698_v15 = vadd.f32 %v4697_v3, %v4696_v57 }
 0xa01   : > { %v4699_v20 = vrot.slane %v4698_v15, 2 }
 0xa03   : > { %v4700_v13 = vadd.f32 %v4699_v20, %v4698_v15 }
 0xa05   : > { %v4701_v32 = vrot.slane %v4700_v13, 1 }
 0xa07   : > { %v4702_v55 = vadd.f32 %v4701_v32, %v4700_v13 }
 0xa09   : > { %v4726_v10 = vmul.f32 0.015625, %v4702_v55 }
 0xa0b   : > { %v4730_v42 = vadd.f32 1e-05, %v4726_v10 }
 0xa0d   : > { %6208 = vrsqrt.f32 %v4730_v42  ;;  %v9385_v18 = vpop.f32.mrb[56].mxu0 }
 0xa0e   : > { %v4552_v29 = vsel %vm2195_vm9, %v9385_v18, 0.0  ;;  %v9389_v30 = vpop.f32.mrb[57].mxu0 }
 0xa0f   : > { %v4551_v21 = vsel %vm2195_vm9, %v9389_v30, 0.0 }
 0xa10   : > { %v4553_v27 = vadd.f32 %v4552_v29, %v4551_v21 }
 0xa17   : > { %v6209_v61 = vpop.eup %6208 }
 0xa18   : > { %v4758_v45 = vmul.f32 %v6209_v61, %v4598_v36  ;;  %v6016_v34 = vpop.f32.mrb[36].mxu1  ;;  %v4752_v48 = vmul.f32 %v6209_v61, %v4592_v51  ;;  %v4753_v26 = vmul.f32 %v6209_v61, %v4593_v28  ;;  %v4754_v39 = vmul.f32 %v6209_v61, %v4594_v40  ;;  %v9672_v36 = vld [vmem:[#allocation6_spill] sm:$0xff]  ;;  %v9673_v40 = vld [vmem:[#allocation7_spill] sm:$0xff] }
 0xa19   : > { %v4971_v50 = vadd.f32 %v6016_v34, %v9670_v12  ;;  %v4965_v63 = vpop.f32.mrb[37].mxu1  ;;  %v4755_v22 = vmul.f32 %v6209_v61, %v4595_v25  ;;  %v4756_v5 = vmul.f32 %v6209_v61, %v4596_v44  ;;  %v4757_v16 = vmul.f32 %v6209_v61, %v4597_v23 }
 0xa1a   : > { %v4966_v11 = vadd.f32 %v4965_v63, %v9671_v41  ;;  %v4784_v6 = vmax.f32 %v4752_v48, 0.0  ;;  %v4785_v62 = vmax.f32 %v4753_v26, 0.0  ;;  %v4786_v19 = vmax.f32 %v4754_v39, 0.0 }
 0xa1b   : > { %v4759_v8 = vmul.f32 %v6209_v61, %v4599_v47  ;;  %v4787_v25 = vmax.f32 %v4755_v22, 0.0  ;;  %v5125_v44 = vmax.f32 %v4971_v50, 0.0  ;;  %v4788_v53 = vmax.f32 %v4756_v5, 0.0  ;;  %v9675_v47 = vld [vmem:[#allocation9_spill] sm:$0xff] }
 0xa1c   : > { %v5124_v38 = vmax.f32 %v4966_v11, 0.0  ;;  %v6019_v17 = vpop.f32.mrb[38].mxu1  ;;  %6038 = vmatprep.mubr.msk.f32.mxu1 %vm2195_vm9, %v4784_v6  ;;  %v4789_v49 = vmax.f32 %v4757_v16, 0.0  ;;  %v4790_v1 = vmax.f32 %v4758_v45, 0.0 }
 0xa1d   : > { %v4981_v51 = vadd.f32 %v6019_v17, %v9672_v36  ;;  %v4975_v28 = vpop.f32.mrb[39].mxu1  ;;  %6039 = vmatmul.mubr.msk.f32.gmra.mrb[52].mxu1 %vm2195_vm9, %v4785_v62  ;;  %v4791_v9 = vmax.f32 %v4759_v8, 0.0 }
 0xa1e   : > { %v4976_v59 = vadd.f32 %v4975_v28, %v9673_v40  ;;  %6041 = vmatprep.mubr.msk.f32.mxu1 %vm2195_vm9, %v4786_v19  ;;  %5156 = vxpose.xlu1.b32.start [1/8] (short) (narrow) %v5124_v38, 16 }
 0xa1f   : > { %v5127_v52 = vmax.f32 %v4981_v51, 0.0 }
 0xa20   : > { %v6022_v23 = vpop.f32.mrb[40].mxu1  ;;  %v5126_v43 = vmax.f32 %v4976_v59, 0.0 }
 0xa21   : > { %v4991_v35 = vadd.f32 %v6022_v23, %v9674_v54  ;;  %v4985_v33 = vpop.f32.mrb[41].mxu1  ;;  %6042 = vmatmul.mubr.msk.f32.gmra.mrb[54].mxu1 %vm2195_vm9, %v4787_v25 }
 0xa22   : > { %v4986_v37 = vadd.f32 %v4985_v33, %v9675_v47  ;;  %6044 = vmatprep.mubr.msk.f32.mxu1 %vm2195_vm9, %v4788_v53  ;;  %5157 = vxpose.xlu1.b32.cont [2/8] (short) (narrow) %v5125_v44, 16 }
 0xa23   : > { %v5129_v15 = vmax.f32 %v4991_v35, 0.0 }
 0xa24   : > { %v6025_v46 = vpop.f32.mrb[42].mxu1  ;;  %v5128_v3 = vmax.f32 %v4986_v37, 0.0 }
 0xa25   : > { %v5001_v56 = vadd.f32 %v6025_v46, %v9676_v2  ;;  %v6005_v4 = vpop.f32.mrb[58].mxu0  ;;  %v4995_v0 = vpop.f32.mrb[43].mxu1  ;;  %6045 = vmatmul.mubr.msk.f32.gmra.mrb[56].mxu1 %vm2195_vm9, %v4789_v49 }
 0xa26   : > { %v4996_v31 = vadd.f32 %v4995_v0, %v9677_v60  ;;  %6047 = vmatprep.mubr.msk.f32.mxu1 %vm2195_vm9, %v4790_v1  ;;  %5158 = vxpose.xlu1.b32.cont [3/8] (short) (narrow) %v5126_v43, 16  ;;  %v4459_v58 = vpop.f32.mrb[59].mxu0  ;;  %v4556_v14 = vsel %vm2195_vm9, %v6005_v4, 0.0 }
 0xa27   : > { %v4554_v7 = vsel %vm2195_vm9, %v4459_v58, 0.0  ;;  %v5131_v13 = vmax.f32 %v5001_v56, 0.0 }
 0xa28   : > { %v4555_v24 = vadd.f32 %v4554_v7, %v4553_v27  ;;  %v5130_v20 = vmax.f32 %v4996_v31, 0.0 }
 0xa29   : > { %6048 = vmatmul.mubr.msk.f32.gmra.mrb[58].mxu1 %vm2195_vm9, %v4791_v9 }
 0xa2a   : > { %5159 = vxpose.xlu1.b32.cont [4/8] (short) (narrow) %v5127_v52, 16  ;;  %v4557_v57 = vadd.f32 %v4556_v14, %v4555_v24 }
 0xa2e   : > { %5160 = vxpose.xlu1.b32.cont [5/8] (short) (narrow) %v5128_v3, 16  ;;  %v9678_v3 = vld [vmem:[#allocation12_spill] sm:$0xff] }
 0xa32   : > { %5161 = vxpose.xlu1.b32.cont [6/8] (short) (narrow) %v5129_v15, 16 }
 0xa36   : > { %5162 = vxpose.xlu1.b32.cont [7/8] (short) (narrow) %v5130_v20, 16 }
 0xa3a   : > { %5163 = vxpose.xlu1.b32.end [8/8] (short) (narrow) %v5131_v13, 16 }
 0xa3e   : > { %v6008_v32 = vpop.f32.mrb[60].mxu0 }
 0xa3f   : > { %v4469_v55 = vpop.f32.mrb[61].mxu0  ;;  %v4560_v29 = vsel %vm2195_vm9, %v6008_v32, 0.0 }
 0xa40   : > { %v4558_v10 = vsel %vm2195_vm9, %v4469_v55, 0.0 }
 0xa41   : > { %v4559_v42 = vadd.f32 %v4558_v10, %v4557_v57 }
 0xa43   : > { %v6011_v21 = vpop.f32.mrb[62].mxu0  ;;  %v4561_v27 = vadd.f32 %v4560_v29, %v4559_v42 }
 0xa44   : > { %v4479_v61 = vpop.f32.mrb[63].mxu0  ;;  %v4564_v48 = vsel %vm2195_vm9, %v6011_v21, 0.0 }
 0xa45   : > { %v4562_v45 = vsel %vm2195_vm9, %v4479_v61, 0.0 }
 0xa46   : > { %v4563_v34 = vadd.f32 %v4562_v45, %v4561_v27 }
 0xa48   : > { %v4565_v26 = vadd.f32 %v4564_v48, %v4563_v34 }
 0xa4a   : > { %v4566_v39 = vrot.slane %v4565_v26, 4 }
 0xa4c   : > { %v4567_v12 = vadd.f32 %v4566_v39, %v4565_v26  ;;  %v9680_v26 = vld [vmem:[#allocation14_spill] sm:$0xff] }
 0xa4e   : > { %v4568_v50 = vrot.slane %v4567_v12, 2 }
 0xa50   : > { %v4569_v63 = vadd.f32 %v4568_v50, %v4567_v12  ;;  %v9681_v50 = vld [vmem:[#allocation15_spill] sm:$0xff] }
 0xa52   : > { %v4570_v22 = vrot.slane %v4569_v63, 1 }
 0xa54   : > { %v4571_v5 = vadd.f32 %v4570_v22, %v4569_v63 }
 0xa56   : > { %v4575_v16 = vmul.f32 0.015625, %v4571_v5 }
 0xa58   : > { %v4600_v41 = vsub.f32 %v9389_v30, %v4575_v16  ;;  %v4601_v11 = vsub.f32 %v9385_v18, %v4575_v16  ;;  %v4602_v6 = vsub.f32 %v4459_v58, %v4575_v16  ;;  %v4603_v62 = vsub.f32 %v6005_v4, %v4575_v16 }
 0xa59   : > { %v4604_v38 = vsub.f32 %v4469_v55, %v4575_v16  ;;  %v4605_v17 = vsub.f32 %v6008_v32, %v4575_v16  ;;  %v4606_v19 = vsub.f32 %v4479_v61, %v4575_v16  ;;  %v4607_v8 = vsub.f32 %v6011_v21, %v4575_v16  ;;  %v9679_v32 = vld [vmem:[#allocation13_spill] sm:$0xff] }
 0xa5a   : > { %v4632_v36 = vmul.f32 %v4600_v41, %v4600_v41  ;;  %v4633_v51 = vmul.f32 %v4601_v11, %v4601_v11  ;;  %v4634_v28 = vmul.f32 %v4602_v6, %v4602_v6  ;;  %v4635_v40 = vmul.f32 %v4603_v62, %v4603_v62 }
 0xa5b   : > { %v4636_v23 = vmul.f32 %v4604_v38, %v4604_v38  ;;  %v4637_v18 = vmul.f32 %v4605_v17, %v4605_v17  ;;  %v4638_v33 = vmul.f32 %v4606_v19, %v4606_v19  ;;  %v4639_v49 = vmul.f32 %v4607_v8, %v4607_v8 }
 0xa5c   : > { %v4703_v59 = vsel %vm2195_vm9, %v4632_v36, 0.0  ;;  %v4704_v25 = vsel %vm2195_vm9, %v4633_v51, 0.0  ;;  %v4706_v30 = vsel %vm2195_vm9, %v4634_v28, 0.0  ;;  %v4708_v54 = vsel %vm2195_vm9, %v4635_v40, 0.0  ;;  %v9683_v36 = vld [vmem:[#allocation17_spill] sm:$0xff] }
 0xa5d   : > { %v4705_v44 = vadd.f32 %v4704_v25, %v4703_v59  ;;  %v4710_v47 = vsel %vm2195_vm9, %v4636_v23, 0.0  ;;  %v4712_v1 = vsel %vm2195_vm9, %v4637_v18, 0.0  ;;  %v4714_v46 = vsel %vm2195_vm9, %v4638_v33, 0.0 }
 0xa5e   : > { %v4716_v56 = vsel %vm2195_vm9, %v4639_v49, 0.0 }
 0xa5f   : > { %v4707_v53 = vadd.f32 %v4706_v30, %v4705_v44  ;;  %v9685_v30 = vld [vmem:[#allocation19_spill] sm:$0xff] }
 0xa61   : > { %v4709_v35 = vadd.f32 %v4708_v54, %v4707_v53 }
 0xa63   : > { %v4711_v37 = vadd.f32 %v4710_v47, %v4709_v35 }
 0xa65   : > { %v4713_v43 = vadd.f32 %v4712_v1, %v4711_v37  ;;  %v9686_v1 = vld [vmem:[#allocation20_spill] sm:$0xff] }
 0xa67   : > { %v4715_v2 = vadd.f32 %v4714_v46, %v4713_v43 }
 0xa69   : > { %v4717_v4 = vadd.f32 %v4716_v56, %v4715_v2  ;;  %v9687_v2 = vld [vmem:[#allocation21_spill] sm:$0xff] }
 0xa6b   : > { %v4718_v0 = vrot.slane %v4717_v4, 4 }
 0xa6d   : > { %v4719_v60 = vadd.f32 %v4718_v0, %v4717_v4 }
 0xa6f   : > { %v4720_v31 = vrot.slane %v4719_v60, 2 }
 0xa71   : > { %v4721_v58 = vadd.f32 %v4720_v31, %v4719_v60  ;;  %v9688_v60 = vld [vmem:[#allocation22_spill] sm:$0xff] }
 0xa73   : > { %v4722_v7 = vrot.slane %v4721_v58, 1 }
 0xa75   : > { %v4723_v9 = vadd.f32 %v4722_v7, %v4721_v58  ;;  %v9689_v7 = vld [vmem:[#allocation23_spill] sm:$0xff] }
 0xa77   : > { %v4727_v52 = vmul.f32 0.015625, %v4723_v9 }
 0xa79   : > { %v4731_v24 = vadd.f32 1e-05, %v4727_v52 }
 0xa7b   : > { %6210 = vrsqrt.f32 %v4731_v24 }
 0xa84   : > { %v6028_v14 = vpop.f32.mrb[44].mxu1 }
 0xa85   : > { %v6211_v57 = vpop.eup %6210  ;;  %v5011_v15 = vadd.f32 %v6028_v14, %v9678_v3  ;;  %v5005_v20 = vpop.f32.mrb[45].mxu1  ;;  %v9690_v14 = vld [vmem:[#allocation24_spill] sm:$0xff] }
 0xa86   : > { %v4766_v13 = vmul.f32 %v6211_v57, %v4606_v19  ;;  %v5006_v55 = vadd.f32 %v5005_v20, %v9679_v32  ;;  %v4760_v10 = vmul.f32 %v6211_v57, %v4600_v41  ;;  %v4761_v42 = vmul.f32 %v6211_v57, %v4601_v11 }
 0xa87   : > { %v4762_v29 = vmul.f32 %v6211_v57, %v4602_v6  ;;  %v4763_v21 = vmul.f32 %v6211_v57, %v4603_v62  ;;  %v4764_v27 = vmul.f32 %v6211_v57, %v4604_v38  ;;  %v4765_v5 = vmul.f32 %v6211_v57, %v4605_v17  ;;  %v9682_v6 = vld [vmem:[#allocation16_spill] sm:$0xff] }
 0xa88   : > { %v5132_v61 = vmax.f32 %v5006_v55, 0.0  ;;  %v6031_v45 = vpop.f32.mrb[46].mxu1  ;;  %v4792_v34 = vmax.f32 %v4760_v10, 0.0  ;;  %v4793_v48 = vmax.f32 %v4761_v42, 0.0  ;;  %v4767_v16 = vmul.f32 %v6211_v57, %v4607_v8  ;;  %v9684_v8 = vld [vmem:[#allocation18_spill] sm:$0xff] }
 0xa89   : > { %v5021_v39 = vadd.f32 %v6031_v45, %v9680_v26  ;;  %v5015_v12 = vpop.f32.mrb[47].mxu1  ;;  %v4794_v22 = vmax.f32 %v4762_v29, 0.0  ;;  %v5133_v41 = vmax.f32 %v5011_v15, 0.0  ;;  %v4795_v19 = vmax.f32 %v4763_v21, 0.0  ;;  %v9691_v15 = vld [vmem:[#allocation25_spill] sm:$0xff]  ;;  %v9692_v55 = vld [vmem:[#allocation26_spill] sm:$0xff] }
 0xa8a   : > { %v5016_v63 = vadd.f32 %v5015_v12, %v9681_v50  ;;  %6050 = vmatprep.mubr.msk.f32.mxu1 %vm2195_vm9, %v4792_v34  ;;  %5188 = vxpose.xlu0.b32.start [1/8] (short) (narrow) %v5132_v61, 16  ;;  %v4796_v28 = vmax.f32 %v4764_v27, 0.0  ;;  %v4797_v44 = vmax.f32 %v4765_v5, 0.0  ;;  %v4798_v23 = vmax.f32 %v4766_v13, 0.0  ;;  %v9693_v29 = vld [vmem:[#allocation27_spill] sm:$0xff] }
 0xa8b   : > { %6051 = vmatmul.mubr.msk.f32.gmra.mrb[60].mxu1 %vm2195_vm9, %v4793_v48  ;;  %v5135_v18 = vmax.f32 %v5021_v39, 0.0  ;;  %v4799_v54 = vmax.f32 %v4767_v16, 0.0  ;;  %v9694_v39 = vld [vmem:[#allocation28_spill] sm:$0xff] }
 0xa8c   : > { %6053 = vmatprep.mubr.msk.f32.mxu1 %vm2195_vm9, %v4794_v22  ;;  %v6034_v11 = vpop.f32.mrb[48].mxu1  ;;  %v5134_v40 = vmax.f32 %v5016_v63, 0.0  ;;  %v9695_v63 = vld [vmem:[#allocation29_spill] sm:$0xff] }
 0xa8d   : > { %v5031_v62 = vadd.f32 %v6034_v11, %v9682_v6  ;;  %v5025_v38 = vpop.f32.mrb[49].mxu1 }
 0xa8e   : > { %v5026_v51 = vadd.f32 %v5025_v38, %v9683_v36  ;;  %5189 = vxpose.xlu0.b32.cont [2/8] (short) (narrow) %v5133_v41, 16  ;;  %v9696_v41 = vld [vmem:[#allocation30_spill] sm:$0xff] }
 0xa8f   : > { %6054 = vmatmul.mubr.msk.f32.gmra.mrb[62].mxu1 %vm2195_vm9, %v4795_v19  ;;  %v5137_v33 = vmax.f32 %v5031_v62, 0.0  ;;  %v9697_v62 = vld [vmem:[#allocation31_spill] sm:$0xff] }
 0xa90   : > { %6056 = vmatprep.mubr.msk.f32.mxu1 %vm2195_vm9, %v4796_v28  ;;  %v6037_v17 = vpop.f32.mrb[50].mxu1  ;;  %v5136_v35 = vmax.f32 %v5026_v51, 0.0  ;;  %v9698_v51 = vld [vmem:[#allocation32_spill] sm:$0xff] }
 0xa91   : > { %v5041_v59 = vadd.f32 %v6037_v17, %v9684_v8  ;;  %v5035_v25 = vpop.f32.mrb[51].mxu1  ;;  %v9699_v17 = vld [vmem:[#allocation33_spill] sm:$0xff] }
 0xa92   : > { %v5036_v53 = vadd.f32 %v5035_v25, %v9685_v30  ;;  %5190 = vxpose.xlu0.b32.cont [3/8] (short) (narrow) %v5134_v40, 16 }
 0xa93   : > { %6057 = vmatmul.mubr.msk.f32.gmra.mrb[64].mxu1 %vm2195_vm9, %v4797_v44  ;;  %v5139_v37 = vmax.f32 %v5041_v59, 0.0  ;;  %v9700_v44 = vld [vmem:[#allocation34_spill] sm:$0xff] }
 0xa94   : > { %6059 = vmatprep.mubr.msk.f32.mxu1 %vm2195_vm9, %v4798_v23  ;;  %v5138_v47 = vmax.f32 %v5036_v53, 0.0  ;;  %v9701_v53 = vld [vmem:[#allocation35_spill] sm:$0xff] }
 0xa96   : > { %5191 = vxpose.xlu0.b32.cont [4/8] (short) (narrow) %v5135_v18, 16 }
 0xa97   : > { %6060 = vmatmul.mubr.msk.f32.gmra.mrb[66].mxu1 %vm2195_vm9, %v4799_v54 }
 0xa9a   : > { %5192 = vxpose.xlu0.b32.cont [5/8] (short) (narrow) %v5136_v35, 16 }
 0xa9e   : > { %5193 = vxpose.xlu0.b32.cont [6/8] (short) (narrow) %v5137_v33, 16 }
 0xaa2   : > { %5194 = vxpose.xlu0.b32.cont [7/8] (short) (narrow) %v5138_v47, 16 }
 0xaa6   : > { %5195 = vxpose.xlu0.b32.end [8/8] (short) (narrow) %v5139_v37, 16 }
 0xaf0   : > { %v6040_v49 = vpop.f32.mrb[52].mxu1 }
 0xaf1   : > { %v5051_v43 = vadd.f32 %v6040_v49, %v9686_v1  ;;  %v5045_v46 = vpop.f32.mrb[53].mxu1  ;;  %v5172_v1 = vpop.trf.xlu1 }
 0xaf2   : > { %v5046_v56 = vadd.f32 %v5045_v46, %v9687_v2  ;;  %v6247_v46 = vmov 1983009808  }
 0xaf3   : > { %v5141_v52 = vmax.f32 %v5051_v43, 0.0  ;;  %v5287_v2 = vunpack.c.l.s4 %v6247_v46 }
 0xaf4   : > { %v5140_v4 = vmax.f32 %v5046_v56, 0.0  ;;  %v6043_v0 = vpop.f32.mrb[54].mxu1 }
 0xaf5   : > { %v5061_v31 = vadd.f32 %v6043_v0, %v9688_v60  ;;  %v5055_v58 = vpop.f32.mrb[55].mxu1  ;;  %v5173_v56 = vpop.trf.xlu1  ;;  %v5288_v60 = vunpack.c.0.s8 %v5287_v2 }
 0xaf6   : > { %v5056_v9 = vadd.f32 %v5055_v58, %v9689_v7  ;;  %5220 = vxpose.xlu0.b32.start [1/8] (short) (narrow) %v5140_v4, 16  ;;  %v6248_v4 = vmov 1934713408   ;;  %v9702_v7 = vld [vmem:[#allocation3_spill] sm:$0xff] }
 0xaf7   : > { %v5143_v27 = vmax.f32 %v5061_v31, 0.0  ;;  %v5319_v0 = vunpack.c.l.s4 %v6248_v4 }
 0xaf8   : > { %v6046_v24 = vpop.f32.mrb[56].mxu1  ;;  %v5142_v13 = vmax.f32 %v5056_v9, 0.0  ;;  %v5291_v9 = vsub.s32 %v5288_v60, %v9702_v7 }
 0xaf9   : > { %v5071_v57 = vadd.f32 %v6046_v24, %v9690_v14  ;;  %v5065_v3 = vpop.f32.mrb[57].mxu1  ;;  %v5320_v58 = vunpack.c.0.s8 %v5319_v0 }
 0xafa   : > { %v5066_v20 = vadd.f32 %v5065_v3, %v9691_v15  ;;  %5221 = vxpose.xlu0.b32.cont [2/8] (short) (narrow) %v5141_v52, 16 }
 0xafb   : > { %v5145_v45 = vmax.f32 %v5071_v57, 0.0 }
 0xafc   : > { %v6049_v32 = vpop.f32.mrb[58].mxu1  ;;  %v5144_v61 = vmax.f32 %v5066_v20, 0.0  ;;  %v5323_v20 = vsub.s32 %v5320_v58, %v9702_v7 }
 0xafd   : > { %v5081_v10 = vadd.f32 %v6049_v32, %v9692_v55  ;;  %v5075_v42 = vpop.f32.mrb[59].mxu1 }
 0xafe   : > { %v5076_v21 = vadd.f32 %v5075_v42, %v9693_v29  ;;  %5222 = vxpose.xlu0.b32.cont [3/8] (short) (narrow) %v5142_v13, 16 }
 0xaff   : > { %v5147_v48 = vmax.f32 %v5081_v10, 0.0 }
 0xb00   : > { %v5146_v34 = vmax.f32 %v5076_v21, 0.0 }
 0xb02   : > { %5223 = vxpose.xlu0.b32.cont [4/8] (short) (narrow) %v5143_v27, 16 }
 0xb06   : > { %5224 = vxpose.xlu0.b32.cont [5/8] (short) (narrow) %v5144_v61, 16 }
 0xb0a   : > { %5225 = vxpose.xlu0.b32.cont [6/8] (short) (narrow) %v5145_v45, 16  ;;  %v5204_v49 = vpop.trf.xlu0 }
 0xb0e   : > { %5226 = vxpose.xlu0.b32.cont [7/8] (short) (narrow) %v5146_v34, 16  ;;  %v5205_v43 = vpop.trf.xlu0 }
 0xb12   : > { %5227 = vxpose.xlu0.b32.end [8/8] (short) (narrow) %v5147_v48, 16 }
 0xb5e   : > { %v6052_v26 = vpop.f32.mrb[60].mxu1 }
 0xb5f   : > { %v5091_v12 = vadd.f32 %v6052_v26, %v9694_v39  ;;  %v5085_v50 = vpop.f32.mrb[61].mxu1 }
 0xb60   : > { %v5086_v22 = vadd.f32 %v5085_v50, %v9695_v63 }
 0xb61   : > { %v5149_v19 = vmax.f32 %v5091_v12, 0.0 }
 0xb62   : > { %v5148_v5 = vmax.f32 %v5086_v22, 0.0  ;;  %v6055_v16 = vpop.f32.mrb[62].mxu1 }
 0xb63   : > { %v5101_v11 = vadd.f32 %v6055_v16, %v9696_v41  ;;  %v5095_v6 = vpop.f32.mrb[63].mxu1  ;;  %v9703_v41 = vmov 0.0  }
 0xb64   : > { %v5096_v38 = vadd.f32 %v5095_v6, %v9697_v62  ;;  %5252 = vxpose.xlu1.b32.start [1/8] (short) (narrow) %v5148_v5, 16 }
 0xb65   : > { %v5151_v54 = vmax.f32 %v5101_v11, 0.0 }
 0xb66   : > { %v6058_v36 = vpop.f32.mrb[64].mxu1  ;;  %v5150_v59 = vmax.f32 %v5096_v38, 0.0 }
 0xb67   : > { %v5111_v28 = vadd.f32 %v6058_v36, %v9698_v51  ;;  %v5105_v40 = vpop.f32.mrb[65].mxu1 }
 0xb68   : > { %v5106_v8 = vadd.f32 %v5105_v40, %v9699_v17  ;;  %5253 = vxpose.xlu1.b32.cont [2/8] (short) (narrow) %v5149_v19, 16 }
 0xb69   : > { %v5153_v33 = vmax.f32 %v5111_v28, 0.0 }
 0xb6a   : > { %v6061_v25 = vpop.f32.mrb[66].mxu1  ;;  %v5152_v35 = vmax.f32 %v5106_v8, 0.0 }
 0xb6b   : > { %v5121_v23 = vadd.f32 %v6061_v25, %v9700_v44  ;;  %v5115_v30 = vpop.f32.mrb[67].mxu1 }
 0xb6c   : > { %v5116_v18 = vadd.f32 %v5115_v30, %v9701_v53  ;;  %5254 = vxpose.xlu1.b32.cont [3/8] (short) (narrow) %v5150_v59, 16 }
 0xb6d   : > { %v5155_v37 = vmax.f32 %v5121_v23, 0.0 }
 0xb6e   : > { %v5154_v47 = vmax.f32 %v5116_v18, 0.0 }
 0xb70   : > { %5255 = vxpose.xlu1.b32.cont [4/8] (short) (narrow) %v5151_v54, 16 }
 0xb74   : > { %5256 = vxpose.xlu1.b32.cont [5/8] (short) (narrow) %v5152_v35, 16 }
 0xb76   : > { %v5236_v31 = vpop.trf.xlu0 }
 0xb77   : > { %v5284_v52 = vcombine.low %v5172_v1, %v5236_v31  ;;  %v5285_v24 = vcombine.high %v5172_v1, %v5236_v31 }
 0xb78   : > { %5257 = vxpose.xlu1.b32.cont [6/8] (short) (narrow) %v5153_v33, 16 }
 0xb79   : > { %v5292_v13 = vrot.slane %v5284_v52, %v5291_v9  ;;  %v5299_v32 = vrot.slane %v5285_v24, %v5291_v9 }
 0xb7a   : > { %v5237_v57 = vpop.trf.xlu0 }
 0xb7b   : > { %v5352_v42 = vcombine.low %v5173_v56, %v5237_v57  ;;  %v5353_v26 = vcombine.high %v5173_v56, %v5237_v57 }
 0xb7c   : > { %5258 = vxpose.xlu1.b32.cont [7/8] (short) (narrow) %v5154_v47, 16 }
 0xb7d   : > { %v5360_v50 = vrot.slane %v5352_v42, %v5291_v9  ;;  %v5367_v19 = vrot.slane %v5353_v26, %v5291_v9 }
 0xb80   : > { %5259 = vxpose.xlu1.b32.end [8/8] (short) (narrow) %v5155_v37, 16 }
 0xbe4   : > { %v5268_v14 = vpop.trf.xlu1 }
 0xbe5   : > { %v5300_v3 = vcombine.low %v5204_v49, %v5268_v14  ;;  %v5301_v15 = vcombine.high %v5204_v49, %v5268_v14 }
 0xbe7   : > { %v5308_v55 = vrot.slane %v5300_v3, %v5291_v9  ;;  %v5315_v10 = vrot.slane %v5301_v15, %v5291_v9 }
 0xbe8   : > { %v5269_v29 = vpop.trf.xlu1 }
 0xbe9   : > { %v5316_v21 = vcombine.low %v5292_v13, %v5308_v55  ;;  %v5317_v27 = vcombine.high %v5292_v13, %v5308_v55  ;;  %v5332_v61 = vcombine.low %v5299_v32, %v5315_v10  ;;  %v5333_v45 = vcombine.high %v5299_v32, %v5315_v10 }
 0xbea   : > { %v5368_v34 = vcombine.low %v5205_v43, %v5269_v29  ;;  %v5369_v48 = vcombine.high %v5205_v43, %v5269_v29 }
 0xbeb   : > { %v5324_v39 = vrot.slane %v5316_v21, %v5323_v20  ;;  %v5331_v12 = vrot.slane %v5317_v27, %v5323_v20  ;;  %v5340_v63 = vrot.slane %v5332_v61, %v5323_v20  ;;  %v5347_v22 = vrot.slane %v5333_v45, %v5323_v20 }
 0xbec   : > { %v5376_v5 = vrot.slane %v5368_v34, %v5291_v9  ;;  %v5383_v16 = vrot.slane %v5369_v48, %v5291_v9 }
 0xbed   : > { %v5349_v11 = vcombine.high %v5331_v12, %v9703_v41  ;;  %v5348_v6 = vcombine.high %v5324_v39, %v9703_v41  ;;  %v5350_v36 = vcombine.high %v5340_v63, %v9703_v41  ;;  %v5351_v51 = vcombine.high %v5347_v22, %v9703_v41 }
 0xbee   : > { %v5384_v62 = vcombine.low %v5360_v50, %v5376_v5  ;;  %v5385_v38 = vcombine.high %v5360_v50, %v5376_v5  ;;  %v5400_v17 = vcombine.low %v5367_v19, %v5383_v16  ;;  %v5401_v8 = vcombine.high %v5367_v19, %v5383_v16 }
 0xbef   : > { %5425 = vrot.lane.b32.xlu1 %v5349_v11, %s6249_s8  ;;  %5421 = vrot.lane.b32.xlu0 %v5348_v6, %s6249_s8 }
 0xbf0   : > { %v5392_v28 = vrot.slane %v5384_v62, %v5323_v20  ;;  %v5399_v40 = vrot.slane %v5385_v38, %v5323_v20  ;;  %v5408_v59 = vrot.slane %v5400_v17, %v5323_v20  ;;  %v5415_v25 = vrot.slane %v5401_v8, %v5323_v20 }
 0xbf2   : > { %v5417_v44 = vcombine.high %v5399_v40, %v9703_v41  ;;  %v5416_v23 = vcombine.high %v5392_v28, %v9703_v41  ;;  %v5419_v30 = vcombine.high %v5415_v25, %v9703_v41  ;;  %v5418_v53 = vcombine.high %v5408_v59, %v9703_v41 }
 0xbf3   : > { %5429 = vrot.lane.b32.xlu1 %v5350_v36, %s6249_s8  ;;  %5433 = vrot.lane.b32.xlu0 %v5351_v51, %s6249_s8 }
 0xbf7   : > { %5441 = vrot.lane.b32.xlu0 %v5417_v44, %s6249_s8  ;;  %5437 = vrot.lane.b32.xlu1 %v5416_v23, %s6249_s8 }
 0xbfb   : > { %5449 = vrot.lane.b32.xlu0 %v5419_v30, %s6249_s8  ;;  %5445 = vrot.lane.b32.xlu1 %v5418_v53, %s6249_s8 }
 0xc61   : > { %v5426_v18 = vpop.permute.xlu1 %5425  ;;  %v5422_v54 = vpop.permute.xlu0 %5421 }
 0xc62   : > { %v5454_v35 = vsel %vm5452_vm0, %v5331_v12, %v5426_v18  ;;  %v5453_v33 = vsel %vm5452_vm0, %v5324_v39, %v5422_v54 }
 0xc63   : > { %v5469_v47 = vcombine.low %v5453_v33, %v5454_v35 }
 0xc65   : > { %5477 = vst [vmem:[%s148_s14] sm:$0xff] %v5469_v47  ;;  %v5430_v37 = vpop.permute.xlu1 %5429  ;;  %v5434_v49 = vpop.permute.xlu0 %5433 }
 0xc66   : > { %v5455_v1 = vsel %vm5452_vm0, %v5340_v63, %v5430_v37  ;;  %v5456_v43 = vsel %vm5452_vm0, %v5347_v22, %v5434_v49 }
 0xc67   : > { %v5470_v46 = vcombine.low %v5455_v1, %v5456_v43 }
 0xc69   : > { %5478 = vst [vmem:[%s148_s14 + $0x8] sm:$0xff] %v5470_v46  ;;  %v5438_v2 = vpop.permute.xlu1 %5437  ;;  %v5442_v56 = vpop.permute.xlu0 %5441 }
 0xc6a   : > { %v5457_v4 = vsel %vm5452_vm0, %v5392_v28, %v5438_v2  ;;  %v5458_v0 = vsel %vm5452_vm0, %v5399_v40, %v5442_v56 }
 0xc6b   : > { %v5471_v60 = vcombine.low %v5457_v4, %v5458_v0 }
 0xc6d   : > { %5479 = vst [vmem:[%s148_s14 + $0x10] sm:$0xff] %v5471_v60  ;;  %v5446_v31 = vpop.permute.xlu1 %5445  ;;  %v5450_v58 = vpop.permute.xlu0 %5449 }
 0xc6e   : > { %v5459_v7 = vsel %vm5452_vm0, %v5408_v59, %v5446_v31  ;;  %v5460_v9 = vsel %vm5452_vm0, %v5415_v25, %v5450_v58 }
 0xc6f   : > { %v5472_v52 = vcombine.low %v5459_v7, %v5460_v9 }
 0xc71   : > { %5480 = vst [vmem:[%s148_s14 + $0x18] sm:$0xff] %v5472_v52 }
 0xc72 PF: > { %s12_s9 = sadd.s32 1, %s6232_s9  }
 0xc73   : > { %p9_p5 = scmp.ge.s32.totalorder %s12_s9, 4  }
 0xc75   :  { %11 = sbr.rel (!%p9_p5) target bundleno = 1 (0x1), region = 59 }

</bundles_post_ra>
